<compile_context>
chip_gen: v7x
topology: tpu7x:2x2x1
jax: 0.10.0
libtpu: 0.0.40
codegen_flags: <defaults>
</compile_context>

<pallas_src>
import jax
import jax.numpy as jnp
from jax import lax
from jax.experimental import pallas as pl
from jax.experimental.pallas import tpu as pltpu

K = 7          # kernel_size (module default)
PAD = 3        # padding for kernel_size == 7
TOP = 8        # top halo rows: one full sublane tile -> hot-path stores stay 8-aligned
LOFF = 128     # left halo cols: one full lane tile   -> hot-path stores stay 128-aligned


def _round_up(x, m):
    return (x + m - 1) // m * m


def _sublane_rows(itemsize):
    # rows per sublane tile: 8 (f32), 16 (bf16), 32 (int8)
    return 8 * max(1, 4 // itemsize)


def _vmem_capacity_bytes():
    try:
        cap = int(pltpu.get_tpu_info().vmem_capacity_bytes)
        if cap > 0:
            return cap
    except Exception:
        pass
    return 64 * 1024 * 1024  # conservative default (v7x has 64 MiB per TensorCore)


def _make_kernel(C, c_blk, n_cblk, H, W, HPS, WPS):
    """Kernel factory: closes over all static shape/tiling parameters."""
    tail = (n_cblk * c_blk != C)   # last channel block is partial -> mask it

    def kernel(w_ref, x_ref, o_ref, pad_ref):
        # w_ref   : (2*K*K,) f32 SMEM. Flattened conv weights [in_ch, kh, kw];
        #           the avg-channel taps are pre-scaled by 1/C (kernel only sums).
        # x_ref   : (c_blk, H, W) VMEM tile of the input (batch dim squeezed).
        # o_ref   : (H, W) VMEM tile of the conv output (written on last C block).
        # pad_ref : (2, HPS, WPS) f32 VMEM scratch. Data lives at
        #           [TOP:TOP+H, LOFF:LOFF+W]; the surrounding bands are zero and
        #           act as the conv halo.
        c_idx = pl.program_id(1)

        # ---- single fused pass over the channel block: running sum + max ----
        plane0 = x_ref[0].astype(jnp.float32)   # first plane of a block is always valid

        def step(i, s, m):
            p = x_ref[i].astype(jnp.float32)
            if tail:
                valid = (c_idx * c_blk + i) < C
                s = s + jnp.where(valid, p, 0.0)
                m = jnp.maximum(m, jnp.where(valid, p, -jnp.inf))
            else:
                s = s + p
                m = jnp.maximum(m, p)
            return s, m

        if c_blk <= 16:
            part_sum, part_max = plane0, plane0
            for i in range(1, c_blk):
                part_sum, part_max = step(i, part_sum, part_max)
        else:
            part_sum, part_max = lax.fori_loop(
                1, c_blk,
                lambda i, carry: step(i, carry[0], carry[1]),
                (plane0, plane0),
                unroll=8)

        @pl.when(c_idx == 0)
        def _init():
            # Zero only the halo bands the conv epilogue reads (not the whole
            # scratch); the interior is overwritten just below. Once per batch
            # element, so correctness holds when the batch axis is sharded
            # across TensorCores.
            for c in range(2):
                pad_ref[c, :TOP, :] = jnp.zeros((TOP, WPS), jnp.float32)
                pad_ref[c, TOP + H:, :] = jnp.zeros((HPS - TOP - H, WPS), jnp.float32)
                pad_ref[c, TOP:TOP + H, :LOFF] = jnp.zeros((H, LOFF), jnp.float32)
                pad_ref[c, TOP:TOP + H, LOFF + W:] = jnp.zeros(
                    (H, WPS - LOFF - W), jnp.float32)
            # First block writes the running maps at tile-aligned offsets.
            pad_ref[0, TOP:TOP + H, LOFF:LOFF + W] = part_sum
            pad_ref[1, TOP:TOP + H, LOFF:LOFF + W] = part_max

        if n_cblk > 1:
            @pl.when(c_idx > 0)
            def _accumulate():
                pad_ref[0, TOP:TOP + H, LOFF:LOFF + W] = (
                    pad_ref[0, TOP:TOP + H, LOFF:LOFF + W] + part_sum)
                pad_ref[1, TOP:TOP + H, LOFF:LOFF + W] = jnp.maximum(
                    pad_ref[1, TOP:TOP + H, LOFF:LOFF + W], part_max)

        @pl.when(c_idx == n_cblk - 1)
        def _conv_and_store():
            # 7x7 conv, 2 in-channels -> 1 out-channel, as shift-and-accumulate.
            # One lane-offset ref load per (channel, kw) column shift (14 total);
            # the 7 kh taps reuse that slab via static sublane slices of the
            # loaded value. The halo bands supply the implicit zero padding.
            acc = jnp.zeros((H, W), jnp.float32)
            r0 = TOP - PAD
            for c in range(2):
                for kw in range(K):
                    c0 = LOFF - PAD + kw
                    base = pad_ref[c, r0:r0 + H + K - 1, c0:c0 + W]   # (H+6, W)
                    for kh in range(K):
                        wgt = w_ref[c * K * K + kh * K + kw]
                        acc = acc + wgt * base[kh:kh + H, :]
            # Per the reference forward(): no sigmoid, no re-weighting of x.
            o_ref[...] = acc.astype(o_ref.dtype)

    return kernel


def spatial_attention(x, conv_w):
    """x: (N, C, H, W); conv_w: (1, 2, K, K) as in nn.Conv2d(2, 1, K, bias=False)."""
    N, C, H, W = x.shape
    itemsize = jnp.dtype(x.dtype).itemsize
    sub = _sublane_rows(itemsize)

    HPS = _round_up(TOP + H + PAD, 8)            # scratch rows (top/bottom halo included)
    WPS = LOFF + _round_up(W + PAD, 128)         # scratch cols (left/right halo included)

    # ---- padding-aware VMEM budgeting (v5e/v6e: 128 MiB, v7x: 64 MiB) ----
    vmem_cap = _vmem_capacity_bytes()
    vmem_limit = min(vmem_cap * 3 // 4, 96 * 1024 * 1024)
    scratch_bytes = 2 * HPS * WPS * 4
    out_bytes = 2 * _round_up(H, sub) * _round_up(W, 128) * itemsize
    plane_bytes = _round_up(H, sub) * _round_up(W, 128) * itemsize   # one padded channel plane
    fixed_bytes = scratch_bytes + out_bytes + (6 * 1024 * 1024)      # + compiler headroom
    budget = max(2 * plane_bytes, vmem_limit - fixed_bytes)
    c_blk = max(1, min(C, budget // (2 * plane_bytes)))              # double-buffered input
    n_cblk = pl.cdiv(C, c_blk)
    vmem_limit = max(vmem_limit, fixed_bytes + 2 * c_blk * plane_bytes)

    # Fold the 1/C of the channel mean into the avg-channel taps: the kernel then
    # only needs a channel sum (no per-pixel divide).
    w32 = conv_w.astype(jnp.float32)
    w_flat = jnp.concatenate(
        [w32[0, 0].reshape(-1) / jnp.float32(C), w32[0, 1].reshape(-1)])   # (2*K*K,)

    kernel = _make_kernel(C, c_blk, n_cblk, H, W, HPS, WPS)

    return pl.pallas_call(
        kernel,
        out_shape=jax.ShapeDtypeStruct((N, 1, H, W), x.dtype),
        grid_spec=pltpu.PrefetchScalarGridSpec(
            num_scalar_prefetch=0,
            grid=(N, n_cblk),                                   # reduction (C) axis last
            in_specs=[
                pl.BlockSpec(memory_space=pltpu.MemorySpace.SMEM),            # weights
                pl.BlockSpec((None, c_blk, H, W), lambda n, c: (n, c, 0, 0)),  # x block
            ],
            out_specs=pl.BlockSpec((None, None, H, W), lambda n, c: (n, 0, 0, 0)),
            scratch_shapes=[pltpu.VMEM((2, HPS, WPS), jnp.float32)],
        ),
        compiler_params=pltpu.CompilerParams(
            dimension_semantics=("parallel", "arbitrary"),      # batch shards across TCs
            vmem_limit_bytes=int(vmem_limit)),
    )(w_flat, x)


def _reference(x, conv_w):
    """Pure-JAX reference mirroring the PyTorch forward."""
    avg_out = jnp.mean(x, axis=1, keepdims=True)
    max_out = jnp.max(x, axis=1, keepdims=True)
    cat = jnp.concatenate([avg_out, max_out], axis=1)           # (N, 2, H, W)
    return lax.conv_general_dilated(
        cat, conv_w.astype(cat.dtype),
        window_strides=(1, 1),
        padding=((PAD, PAD), (PAD, PAD)),
        dimension_numbers=("NCHW", "OIHW", "NCHW"),
        precision=lax.Precision.HIGHEST)


if __name__ == "__main__":
    key = jax.random.PRNGKey(0)
    kx, kw = jax.random.split(key)

    # Small NCHW input consistent with the module.
    x = jax.random.normal(kx, (2, 4, 16, 16), dtype=jnp.float32)
    # Conv2d(2, 1, 7, bias=False) weights, shape (O, I, K, K).
    conv_w = jax.random.normal(kw, (1, 2, K, K), dtype=jnp.float32) * 0.05

    out = jax.block_until_ready(spatial_attention(x, conv_w))

    ref = _reference(x, conv_w)
    assert out.shape == (2, 1, 16, 16), out.shape
    max_err = float(jnp.max(jnp.abs(out - ref)))
    assert jnp.allclose(out, ref, rtol=1e-4, atol=1e-4), max_err

    print("KERNEL_OK")
</pallas_src>

<mosaic_0001>
module attributes {stable_mosaic.version = 11 : i64} {
  func.func @kernel(%arg0: i32, %arg1: i32, %arg2: memref<98xf32, #tpu.memory_space<smem>>, %arg3: memref<1x4x16x16xf32, #tpu.memory_space<vmem>>, %arg4: memref<1x1x16x16xf32, #tpu.memory_space<vmem>>, %arg5: memref<2x32x256xf32, #tpu.memory_space<vmem>>) attributes {dimension_semantics = [#tpu.dimension_semantics<parallel>, #tpu.dimension_semantics<arbitrary>], iteration_bounds = array<i64: 2, 1>, scalar_prefetch = 0 : i64, scratch_operands = 1 : i64, tpu.core_type = #tpu.core_type<tc>, window_params = [{transform_indices = @transform_0, window_bounds = array<i64: 98>}, {transform_indices = @transform_1, window_bounds = array<i64: 1, 4, 16, 16>}, {transform_indices = @transform_2, window_bounds = array<i64: 1, 1, 16, 16>}]} {
    %c0 = arith.constant 0 : index
    %c0_0 = arith.constant 0 : index
    %c0_1 = arith.constant 0 : index
    %c0_2 = arith.constant 0 : index
    %0 = vector.load %arg3[%c0, %c0_0, %c0_1, %c0_2] : memref<1x4x16x16xf32, #tpu.memory_space<vmem>>, vector<1x1x16x16xf32>
    %1 = vector.shape_cast %0 : vector<1x1x16x16xf32> to vector<16x16xf32>
    %c0_3 = arith.constant 0 : index
    %c1 = arith.constant 1 : index
    %c0_4 = arith.constant 0 : index
    %c0_5 = arith.constant 0 : index
    %2 = vector.load %arg3[%c0_3, %c1, %c0_4, %c0_5] : memref<1x4x16x16xf32, #tpu.memory_space<vmem>>, vector<1x1x16x16xf32>
    %3 = vector.shape_cast %2 : vector<1x1x16x16xf32> to vector<16x16xf32>
    %4 = arith.addf %1, %3 : vector<16x16xf32>
    %5 = arith.maximumf %1, %3 : vector<16x16xf32>
    %c0_6 = arith.constant 0 : index
    %c2 = arith.constant 2 : index
    %c0_7 = arith.constant 0 : index
    %c0_8 = arith.constant 0 : index
    %6 = vector.load %arg3[%c0_6, %c2, %c0_7, %c0_8] : memref<1x4x16x16xf32, #tpu.memory_space<vmem>>, vector<1x1x16x16xf32>
    %7 = vector.shape_cast %6 : vector<1x1x16x16xf32> to vector<16x16xf32>
    %8 = arith.addf %4, %7 : vector<16x16xf32>
    %9 = arith.maximumf %5, %7 : vector<16x16xf32>
    %c0_9 = arith.constant 0 : index
    %c3 = arith.constant 3 : index
    %c0_10 = arith.constant 0 : index
    %c0_11 = arith.constant 0 : index
    %10 = vector.load %arg3[%c0_9, %c3, %c0_10, %c0_11] : memref<1x4x16x16xf32, #tpu.memory_space<vmem>>, vector<1x1x16x16xf32>
    %11 = vector.shape_cast %10 : vector<1x1x16x16xf32> to vector<16x16xf32>
    %12 = arith.addf %8, %11 : vector<16x16xf32>
    %13 = arith.maximumf %9, %11 : vector<16x16xf32>
    %c0_i32 = arith.constant 0 : i32
    %14 = arith.cmpi eq, %arg1, %c0_i32 : i32
    %15 = arith.extui %14 : i1 to i32
    %c0_i32_12 = arith.constant 0 : i32
    %16 = arith.cmpi ne, %15, %c0_i32_12 : i32
    scf.if %16 {
      %cst = arith.constant 0.000000e+00 : f32
      %20 = vector.broadcast %cst : f32 to vector<8x256xf32>
      %c0_15 = arith.constant 0 : index
      %c0_16 = arith.constant 0 : index
      %c0_17 = arith.constant 0 : index
      %21 = vector.load %arg5[%c0_15, %c0_16, %c0_17] : memref<2x32x256xf32, #tpu.memory_space<vmem>>, vector<1x8x256xf32>
      %22 = vector.shape_cast %21 : vector<1x8x256xf32> to vector<8x256xf32>
      %23 = vector.shape_cast %20 : vector<8x256xf32> to vector<1x8x256xf32>
      tpu.vector_store %arg5[%c0_15, %c0_16, %c0_17], %23 {strides = array<i32>} : memref<2x32x256xf32, #tpu.memory_space<vmem>>, vector<1x8x256xf32>,
      %cst_18 = arith.constant 0.000000e+00 : f32
      %24 = vector.broadcast %cst_18 : f32 to vector<8x256xf32>
      %c0_19 = arith.constant 0 : index
      %c24 = arith.constant 24 : index
      %c0_20 = arith.constant 0 : index
      %25 = vector.load %arg5[%c0_19, %c24, %c0_20] : memref<2x32x256xf32, #tpu.memory_space<vmem>>, vector<1x8x256xf32>
      %26 = vector.shape_cast %25 : vector<1x8x256xf32> to vector<8x256xf32>
      %27 = vector.shape_cast %24 : vector<8x256xf32> to vector<1x8x256xf32>
      tpu.vector_store %arg5[%c0_19, %c24, %c0_20], %27 {strides = array<i32>} : memref<2x32x256xf32, #tpu.memory_space<vmem>>, vector<1x8x256xf32>,
      %cst_21 = arith.constant 0.000000e+00 : f32
      %28 = vector.broadcast %cst_21 : f32 to vector<16x128xf32>
      %c0_22 = arith.constant 0 : index
      %c8 = arith.constant 8 : index
      %c0_23 = arith.constant 0 : index
      %29 = vector.load %arg5[%c0_22, %c8, %c0_23] : memref<2x32x256xf32, #tpu.memory_space<vmem>>, vector<1x16x128xf32>
      %30 = vector.shape_cast %29 : vector<1x16x128xf32> to vector<16x128xf32>
      %31 = vector.shape_cast %28 : vector<16x128xf32> to vector<1x16x128xf32>
      tpu.vector_store %arg5[%c0_22, %c8, %c0_23], %31 {strides = array<i32>} : memref<2x32x256xf32, #tpu.memory_space<vmem>>, vector<1x16x128xf32>,
      %cst_24 = arith.constant 0.000000e+00 : f32
      %32 = vector.broadcast %cst_24 : f32 to vector<16x112xf32>
      %c0_25 = arith.constant 0 : index
      %c8_26 = arith.constant 8 : index
      %c144 = arith.constant 144 : index
      %33 = vector.load %arg5[%c0_25, %c8_26, %c144] : memref<2x32x256xf32, #tpu.memory_space<vmem>>, vector<1x16x112xf32>
      %34 = vector.shape_cast %33 : vector<1x16x112xf32> to vector<16x112xf32>
      %35 = vector.shape_cast %32 : vector<16x112xf32> to vector<1x16x112xf32>
      tpu.vector_store %arg5[%c0_25, %c8_26, %c144], %35 {strides = array<i32>} : memref<2x32x256xf32, #tpu.memory_space<vmem>>, vector<1x16x112xf32>,
      %cst_27 = arith.constant 0.000000e+00 : f32
      %36 = vector.broadcast %cst_27 : f32 to vector<8x256xf32>
      %c1_28 = arith.constant 1 : index
      %c0_29 = arith.constant 0 : index
      %c0_30 = arith.constant 0 : index
      %37 = vector.load %arg5[%c1_28, %c0_29, %c0_30] : memref<2x32x256xf32, #tpu.memory_space<vmem>>, vector<1x8x256xf32>
      %38 = vector.shape_cast %37 : vector<1x8x256xf32> to vector<8x256xf32>
      %39 = vector.shape_cast %36 : vector<8x256xf32> to vector<1x8x256xf32>
      tpu.vector_store %arg5[%c1_28, %c0_29, %c0_30], %39 {strides = array<i32>} : memref<2x32x256xf32, #tpu.memory_space<vmem>>, vector<1x8x256xf32>,
      %cst_31 = arith.constant 0.000000e+00 : f32
      %40 = vector.broadcast %cst_31 : f32 to vector<8x256xf32>
      %c1_32 = arith.constant 1 : index
      %c24_33 = arith.constant 24 : index
      %c0_34 = arith.constant 0 : index
      %41 = vector.load %arg5[%c1_32, %c24_33, %c0_34] : memref<2x32x256xf32, #tpu.memory_space<vmem>>, vector<1x8x256xf32>
      %42 = vector.shape_cast %41 : vector<1x8x256xf32> to vector<8x256xf32>
      %43 = vector.shape_cast %40 : vector<8x256xf32> to vector<1x8x256xf32>
      tpu.vector_store %arg5[%c1_32, %c24_33, %c0_34], %43 {strides = array<i32>} : memref<2x32x256xf32, #tpu.memory_space<vmem>>, vector<1x8x256xf32>,
      %cst_35 = arith.constant 0.000000e+00 : f32
      %44 = vector.broadcast %cst_35 : f32 to vector<16x128xf32>
      %c1_36 = arith.constant 1 : index
      %c8_37 = arith.constant 8 : index
      %c0_38 = arith.constant 0 : index
      %45 = vector.load %arg5[%c1_36, %c8_37, %c0_38] : memref<2x32x256xf32, #tpu.memory_space<vmem>>, vector<1x16x128xf32>
      %46 = vector.shape_cast %45 : vector<1x16x128xf32> to vector<16x128xf32>
      %47 = vector.shape_cast %44 : vector<16x128xf32> to vector<1x16x128xf32>
      tpu.vector_store %arg5[%c1_36, %c8_37, %c0_38], %47 {strides = array<i32>} : memref<2x32x256xf32, #tpu.memory_space<vmem>>, vector<1x16x128xf32>,
      %cst_39 = arith.constant 0.000000e+00 : f32
      %48 = vector.broadcast %cst_39 : f32 to vector<16x112xf32>
      %c1_40 = arith.constant 1 : index
      %c8_41 = arith.constant 8 : index
      %c144_42 = arith.constant 144 : index
      %49 = vector.load %arg5[%c1_40, %c8_41, %c144_42] : memref<2x32x256xf32, #tpu.memory_space<vmem>>, vector<1x16x112xf32>
      %50 = vector.shape_cast %49 : vector<1x16x112xf32> to vector<16x112xf32>
      %51 = vector.shape_cast %48 : vector<16x112xf32> to vector<1x16x112xf32>
      tpu.vector_store %arg5[%c1_40, %c8_41, %c144_42], %51 {strides = array<i32>} : memref<2x32x256xf32, #tpu.memory_space<vmem>>, vector<1x16x112xf32>,
      %c0_43 = arith.constant 0 : index
      %c8_44 = arith.constant 8 : index
      %c128 = arith.constant 128 : index
      %52 = vector.load %arg5[%c0_43, %c8_44, %c128] : memref<2x32x256xf32, #tpu.memory_space<vmem>>, vector<1x16x16xf32>
      %53 = vector.shape_cast %52 : vector<1x16x16xf32> to vector<16x16xf32>
      %54 = vector.shape_cast %12 : vector<16x16xf32> to vector<1x16x16xf32>
      tpu.vector_store %arg5[%c0_43, %c8_44, %c128], %54 {strides = array<i32>} : memref<2x32x256xf32, #tpu.memory_space<vmem>>, vector<1x16x16xf32>,
      %c1_45 = arith.constant 1 : index
      %c8_46 = arith.constant 8 : index
      %c128_47 = arith.constant 128 : index
      %55 = vector.load %arg5[%c1_45, %c8_46, %c128_47] : memref<2x32x256xf32, #tpu.memory_space<vmem>>, vector<1x16x16xf32>
      %56 = vector.shape_cast %55 : vector<1x16x16xf32> to vector<16x16xf32>
      %57 = vector.shape_cast %13 : vector<16x16xf32> to vector<1x16x16xf32>
      tpu.vector_store %arg5[%c1_45, %c8_46, %c128_47], %57 {strides = array<i32>} : memref<2x32x256xf32, #tpu.memory_space<vmem>>, vector<1x16x16xf32>,
    } else {
    }
    %c0_i32_13 = arith.constant 0 : i32
    %17 = arith.cmpi eq, %arg1, %c0_i32_13 : i32
    %18 = arith.extui %17 : i1 to i32
    %c0_i32_14 = arith.constant 0 : i32
    %19 = arith.cmpi ne, %18, %c0_i32_14 : i32
    scf.if %19 {
      %cst = arith.constant 0.000000e+00 : f32
      %20 = vector.broadcast %cst : f32 to vector<16x16xf32>
      %c0_15 = arith.constant 0 : index
      %c5 = arith.constant 5 : index
      %c125 = arith.constant 125 : index
      %21 = vector.load %arg5[%c0_15, %c5, %c125] : memref<2x32x256xf32, #tpu.memory_space<vmem>>, vector<1x22x16xf32>
      %22 = vector.shape_cast %21 : vector<1x22x16xf32> to vector<22x16xf32>
      %c0_16 = arith.constant 0 : index
      %23 = memref.load %arg2[%c0_16] : memref<98xf32, #tpu.memory_space<smem>>
      %24 = vector.extract_strided_slice %22 {offsets = [0, 0], sizes = [16, 16], strides = [1, 1]} : vector<22x16xf32> to vector<16x16xf32>
      %25 = vector.broadcast %23 : f32 to vector<16x16xf32>
      %26 = arith.mulf %25, %24 : vector<16x16xf32>
      %27 = arith.addf %20, %26 : vector<16x16xf32>
      %c7 = arith.constant 7 : index
      %28 = memref.load %arg2[%c7] : memref<98xf32, #tpu.memory_space<smem>>
      %29 = vector.extract_strided_slice %22 {offsets = [1, 0], sizes = [16, 16], strides = [1, 1]} : vector<22x16xf32> to vector<16x16xf32>
      %30 = vector.broadcast %28 : f32 to vector<16x16xf32>
      %31 = arith.mulf %30, %29 : vector<16x16xf32>
      %32 = arith.addf %27, %31 : vector<16x16xf32>
      %c14 = arith.constant 14 : index
      %33 = memref.load %arg2[%c14] : memref<98xf32, #tpu.memory_space<smem>>
      %34 = vector.extract_strided_slice %22 {offsets = [2, 0], sizes = [16, 16], strides = [1, 1]} : vector<22x16xf32> to vector<16x16xf32>
      %35 = vector.broadcast %33 : f32 to vector<16x16xf32>
      %36 = arith.mulf %35, %34 : vector<16x16xf32>
      %37 = arith.addf %32, %36 : vector<16x16xf32>
      %c21 = arith.constant 21 : index
      %38 = memref.load %arg2[%c21] : memref<98xf32, #tpu.memory_space<smem>>
      %39 = vector.extract_strided_slice %22 {offsets = [3, 0], sizes = [16, 16], strides = [1, 1]} : vector<22x16xf32> to vector<16x16xf32>
      %40 = vector.broadcast %38 : f32 to vector<16x16xf32>
      %41 = arith.mulf %40, %39 : vector<16x16xf32>
      %42 = arith.addf %37, %41 : vector<16x16xf32>
      %c28 = arith.constant 28 : index
      %43 = memref.load %arg2[%c28] : memref<98xf32, #tpu.memory_space<smem>>
      %44 = vector.extract_strided_slice %22 {offsets = [4, 0], sizes = [16, 16], strides = [1, 1]} : vector<22x16xf32> to vector<16x16xf32>
      %45 = vector.broadcast %43 : f32 to vector<16x16xf32>
      %46 = arith.mulf %45, %44 : vector<16x16xf32>
      %47 = arith.addf %42, %46 : vector<16x16xf32>
      %c35 = arith.constant 35 : index
      %48 = memref.load %arg2[%c35] : memref<98xf32, #tpu.memory_space<smem>>
      %49 = vector.extract_strided_slice %22 {offsets = [5, 0], sizes = [16, 16], strides = [1, 1]} : vector<22x16xf32> to vector<16x16xf32>
      %50 = vector.broadcast %48 : f32 to vector<16x16xf32>
      %51 = arith.mulf %50, %49 : vector<16x16xf32>
      %52 = arith.addf %47, %51 : vector<16x16xf32>
      %c42 = arith.constant 42 : index
      %53 = memref.load %arg2[%c42] : memref<98xf32, #tpu.memory_space<smem>>
      %54 = vector.extract_strided_slice %22 {offsets = [6, 0], sizes = [16, 16], strides = [1, 1]} : vector<22x16xf32> to vector<16x16xf32>
      %55 = vector.broadcast %53 : f32 to vector<16x16xf32>
      %56 = arith.mulf %55, %54 : vector<16x16xf32>
      %57 = arith.addf %52, %56 : vector<16x16xf32>
      %c0_17 = arith.constant 0 : index
      %c5_18 = arith.constant 5 : index
      %c126 = arith.constant 126 : index
      %58 = vector.load %arg5[%c0_17, %c5_18, %c126] : memref<2x32x256xf32, #tpu.memory_space<vmem>>, vector<1x22x16xf32>
      %59 = vector.shape_cast %58 : vector<1x22x16xf32> to vector<22x16xf32>
      %c1_19 = arith.constant 1 : index
      %60 = memref.load %arg2[%c1_19] : memref<98xf32, #tpu.memory_space<smem>>
      %61 = vector.extract_strided_slice %59 {offsets = [0, 0], sizes = [16, 16], strides = [1, 1]} : vector<22x16xf32> to vector<16x16xf32>
      %62 = vector.broadcast %60 : f32 to vector<16x16xf32>
      %63 = arith.mulf %62, %61 : vector<16x16xf32>
      %64 = arith.addf %57, %63 : vector<16x16xf32>
      %c8 = arith.constant 8 : index
      %65 = memref.load %arg2[%c8] : memref<98xf32, #tpu.memory_space<smem>>
      %66 = vector.extract_strided_slice %59 {offsets = [1, 0], sizes = [16, 16], strides = [1, 1]} : vector<22x16xf32> to vector<16x16xf32>
      %67 = vector.broadcast %65 : f32 to vector<16x16xf32>
      %68 = arith.mulf %67, %66 : vector<16x16xf32>
      %69 = arith.addf %64, %68 : vector<16x16xf32>
      %c15 = arith.constant 15 : index
      %70 = memref.load %arg2[%c15] : memref<98xf32, #tpu.memory_space<smem>>
      %71 = vector.extract_strided_slice %59 {offsets = [2, 0], sizes = [16, 16], strides = [1, 1]} : vector<22x16xf32> to vector<16x16xf32>
      %72 = vector.broadcast %70 : f32 to vector<16x16xf32>
      %73 = arith.mulf %72, %71 : vector<16x16xf32>
      %74 = arith.addf %69, %73 : vector<16x16xf32>
      %c22 = arith.constant 22 : index
      %75 = memref.load %arg2[%c22] : memref<98xf32, #tpu.memory_space<smem>>
      %76 = vector.extract_strided_slice %59 {offsets = [3, 0], sizes = [16, 16], strides = [1, 1]} : vector<22x16xf32> to vector<16x16xf32>
      %77 = vector.broadcast %75 : f32 to vector<16x16xf32>
      %78 = arith.mulf %77, %76 : vector<16x16xf32>
      %79 = arith.addf %74, %78 : vector<16x16xf32>
      %c29 = arith.constant 29 : index
      %80 = memref.load %arg2[%c29] : memref<98xf32, #tpu.memory_space<smem>>
      %81 = vector.extract_strided_slice %59 {offsets = [4, 0], sizes = [16, 16], strides = [1, 1]} : vector<22x16xf32> to vector<16x16xf32>
      %82 = vector.broadcast %80 : f32 to vector<16x16xf32>
      %83 = arith.mulf %82, %81 : vector<16x16xf32>
      %84 = arith.addf %79, %83 : vector<16x16xf32>
      %c36 = arith.constant 36 : index
      %85 = memref.load %arg2[%c36] : memref<98xf32, #tpu.memory_space<smem>>
      %86 = vector.extract_strided_slice %59 {offsets = [5, 0], sizes = [16, 16], strides = [1, 1]} : vector<22x16xf32> to vector<16x16xf32>
      %87 = vector.broadcast %85 : f32 to vector<16x16xf32>
      %88 = arith.mulf %87, %86 : vector<16x16xf32>
      %89 = arith.addf %84, %88 : vector<16x16xf32>
      %c43 = arith.constant 43 : index
      %90 = memref.load %arg2[%c43] : memref<98xf32, #tpu.memory_space<smem>>
      %91 = vector.extract_strided_slice %59 {offsets = [6, 0], sizes = [16, 16], strides = [1, 1]} : vector<22x16xf32> to vector<16x16xf32>
      %92 = vector.broadcast %90 : f32 to vector<16x16xf32>
      %93 = arith.mulf %92, %91 : vector<16x16xf32>
      %94 = arith.addf %89, %93 : vector<16x16xf32>
      %c0_20 = arith.constant 0 : index
      %c5_21 = arith.constant 5 : index
      %c127 = arith.constant 127 : index
      %95 = vector.load %arg5[%c0_20, %c5_21, %c127] : memref<2x32x256xf32, #tpu.memory_space<vmem>>, vector<1x22x16xf32>
      %96 = vector.shape_cast %95 : vector<1x22x16xf32> to vector<22x16xf32>
      %c2_22 = arith.constant 2 : index
      %97 = memref.load %arg2[%c2_22] : memref<98xf32, #tpu.memory_space<smem>>
      %98 = vector.extract_strided_slice %96 {offsets = [0, 0], sizes = [16, 16], strides = [1, 1]} : vector<22x16xf32> to vector<16x16xf32>
      %99 = vector.broadcast %97 : f32 to vector<16x16xf32>
      %100 = arith.mulf %99, %98 : vector<16x16xf32>
      %101 = arith.addf %94, %100 : vector<16x16xf32>
      %c9 = arith.constant 9 : index
      %102 = memref.load %arg2[%c9] : memref<98xf32, #tpu.memory_space<smem>>
      %103 = vector.extract_strided_slice %96 {offsets = [1, 0], sizes = [16, 16], strides = [1, 1]} : vector<22x16xf32> to vector<16x16xf32>
      %104 = vector.broadcast %102 : f32 to vector<16x16xf32>
      %105 = arith.mulf %104, %103 : vector<16x16xf32>
      %106 = arith.addf %101, %105 : vector<16x16xf32>
      %c16 = arith.constant 16 : index
      %107 = memref.load %arg2[%c16] : memref<98xf32, #tpu.memory_space<smem>>
      %108 = vector.extract_strided_slice %96 {offsets = [2, 0], sizes = [16, 16], strides = [1, 1]} : vector<22x16xf32> to vector<16x16xf32>
      %109 = vector.broadcast %107 : f32 to vector<16x16xf32>
      %110 = arith.mulf %109, %108 : vector<16x16xf32>
      %111 = arith.addf %106, %110 : vector<16x16xf32>
      %c23 = arith.constant 23 : index
      %112 = memref.load %arg2[%c23] : memref<98xf32, #tpu.memory_space<smem>>
      %113 = vector.extract_strided_slice %96 {offsets = [3, 0], sizes = [16, 16], strides = [1, 1]} : vector<22x16xf32> to vector<16x16xf32>
      %114 = vector.broadcast %112 : f32 to vector<16x16xf32>
      %115 = arith.mulf %114, %113 : vector<16x16xf32>
      %116 = arith.addf %111, %115 : vector<16x16xf32>
      %c30 = arith.constant 30 : index
      %117 = memref.load %arg2[%c30] : memref<98xf32, #tpu.memory_space<smem>>
      %118 = vector.extract_strided_slice %96 {offsets = [4, 0], sizes = [16, 16], strides = [1, 1]} : vector<22x16xf32> to vector<16x16xf32>
      %119 = vector.broadcast %117 : f32 to vector<16x16xf32>
      %120 = arith.mulf %119, %118 : vector<16x16xf32>
      %121 = arith.addf %116, %120 : vector<16x16xf32>
      %c37 = arith.constant 37 : index
      %122 = memref.load %arg2[%c37] : memref<98xf32, #tpu.memory_space<smem>>
      %123 = vector.extract_strided_slice %96 {offsets = [5, 0], sizes = [16, 16], strides = [1, 1]} : vector<22x16xf32> to vector<16x16xf32>
      %124 = vector.broadcast %122 : f32 to vector<16x16xf32>
      %125 = arith.mulf %124, %123 : vector<16x16xf32>
      %126 = arith.addf %121, %125 : vector<16x16xf32>
      %c44 = arith.constant 44 : index
      %127 = memref.load %arg2[%c44] : memref<98xf32, #tpu.memory_space<smem>>
      %128 = vector.extract_strided_slice %96 {offsets = [6, 0], sizes = [16, 16], strides = [1, 1]} : vector<22x16xf32> to vector<16x16xf32>
      %129 = vector.broadcast %127 : f32 to vector<16x16xf32>
      %130 = arith.mulf %129, %128 : vector<16x16xf32>
      %131 = arith.addf %126, %130 : vector<16x16xf32>
      %c0_23 = arith.constant 0 : index
      %c5_24 = arith.constant 5 : index
      %c128 = arith.constant 128 : index
      %132 = vector.load %arg5[%c0_23, %c5_24, %c128] : memref<2x32x256xf32, #tpu.memory_space<vmem>>, vector<1x22x16xf32>
      %133 = vector.shape_cast %132 : vector<1x22x16xf32> to vector<22x16xf32>
      %c3_25 = arith.constant 3 : index
      %134 = memref.load %arg2[%c3_25] : memref<98xf32, #tpu.memory_space<smem>>
      %135 = vector.extract_strided_slice %133 {offsets = [0, 0], sizes = [16, 16], strides = [1, 1]} : vector<22x16xf32> to vector<16x16xf32>
      %136 = vector.broadcast %134 : f32 to vector<16x16xf32>
      %137 = arith.mulf %136, %135 : vector<16x16xf32>
      %138 = arith.addf %131, %137 : vector<16x16xf32>
      %c10 = arith.constant 10 : index
      %139 = memref.load %arg2[%c10] : memref<98xf32, #tpu.memory_space<smem>>
      %140 = vector.extract_strided_slice %133 {offsets = [1, 0], sizes = [16, 16], strides = [1, 1]} : vector<22x16xf32> to vector<16x16xf32>
      %141 = vector.broadcast %139 : f32 to vector<16x16xf32>
      %142 = arith.mulf %141, %140 : vector<16x16xf32>
      %143 = arith.addf %138, %142 : vector<16x16xf32>
      %c17 = arith.constant 17 : index
      %144 = memref.load %arg2[%c17] : memref<98xf32, #tpu.memory_space<smem>>
      %145 = vector.extract_strided_slice %133 {offsets = [2, 0], sizes = [16, 16], strides = [1, 1]} : vector<22x16xf32> to vector<16x16xf32>
      %146 = vector.broadcast %144 : f32 to vector<16x16xf32>
      %147 = arith.mulf %146, %145 : vector<16x16xf32>
      %148 = arith.addf %143, %147 : vector<16x16xf32>
      %c24 = arith.constant 24 : index
      %149 = memref.load %arg2[%c24] : memref<98xf32, #tpu.memory_space<smem>>
      %150 = vector.extract_strided_slice %133 {offsets = [3, 0], sizes = [16, 16], strides = [1, 1]} : vector<22x16xf32> to vector<16x16xf32>
      %151 = vector.broadcast %149 : f32 to vector<16x16xf32>
      %152 = arith.mulf %151, %150 : vector<16x16xf32>
      %153 = arith.addf %148, %152 : vector<16x16xf32>
      %c31 = arith.constant 31 : index
      %154 = memref.load %arg2[%c31] : memref<98xf32, #tpu.memory_space<smem>>
      %155 = vector.extract_strided_slice %133 {offsets = [4, 0], sizes = [16, 16], strides = [1, 1]} : vector<22x16xf32> to vector<16x16xf32>
      %156 = vector.broadcast %154 : f32 to vector<16x16xf32>
      %157 = arith.mulf %156, %155 : vector<16x16xf32>
      %158 = arith.addf %153, %157 : vector<16x16xf32>
      %c38 = arith.constant 38 : index
      %159 = memref.load %arg2[%c38] : memref<98xf32, #tpu.memory_space<smem>>
      %160 = vector.extract_strided_slice %133 {offsets = [5, 0], sizes = [16, 16], strides = [1, 1]} : vector<22x16xf32> to vector<16x16xf32>
      %161 = vector.broadcast %159 : f32 to vector<16x16xf32>
      %162 = arith.mulf %161, %160 : vector<16x16xf32>
      %163 = arith.addf %158, %162 : vector<16x16xf32>
      %c45 = arith.constant 45 : index
      %164 = memref.load %arg2[%c45] : memref<98xf32, #tpu.memory_space<smem>>
      %165 = vector.extract_strided_slice %133 {offsets = [6, 0], sizes = [16, 16], strides = [1, 1]} : vector<22x16xf32> to vector<16x16xf32>
      %166 = vector.broadcast %164 : f32 to vector<16x16xf32>
      %167 = arith.mulf %166, %165 : vector<16x16xf32>
      %168 = arith.addf %163, %167 : vector<16x16xf32>
      %c0_26 = arith.constant 0 : index
      %c5_27 = arith.constant 5 : index
      %c129 = arith.constant 129 : index
      %169 = vector.load %arg5[%c0_26, %c5_27, %c129] : memref<2x32x256xf32, #tpu.memory_space<vmem>>, vector<1x22x16xf32>
      %170 = vector.shape_cast %169 : vector<1x22x16xf32> to vector<22x16xf32>
      %c4 = arith.constant 4 : index
      %171 = memref.load %arg2[%c4] : memref<98xf32, #tpu.memory_space<smem>>
      %172 = vector.extract_strided_slice %170 {offsets = [0, 0], sizes = [16, 16], strides = [1, 1]} : vector<22x16xf32> to vector<16x16xf32>
      %173 = vector.broadcast %171 : f32 to vector<16x16xf32>
      %174 = arith.mulf %173, %172 : vector<16x16xf32>
      %175 = arith.addf %168, %174 : vector<16x16xf32>
      %c11 = arith.constant 11 : index
      %176 = memref.load %arg2[%c11] : memref<98xf32, #tpu.memory_space<smem>>
      %177 = vector.extract_strided_slice %170 {offsets = [1, 0], sizes = [16, 16], strides = [1, 1]} : vector<22x16xf32> to vector<16x16xf32>
      %178 = vector.broadcast %176 : f32 to vector<16x16xf32>
      %179 = arith.mulf %178, %177 : vector<16x16xf32>
      %180 = arith.addf %175, %179 : vector<16x16xf32>
      %c18 = arith.constant 18 : index
      %181 = memref.load %arg2[%c18] : memref<98xf32, #tpu.memory_space<smem>>
      %182 = vector.extract_strided_slice %170 {offsets = [2, 0], sizes = [16, 16], strides = [1, 1]} : vector<22x16xf32> to vector<16x16xf32>
      %183 = vector.broadcast %181 : f32 to vector<16x16xf32>
      %184 = arith.mulf %183, %182 : vector<16x16xf32>
      %185 = arith.addf %180, %184 : vector<16x16xf32>
      %c25 = arith.constant 25 : index
      %186 = memref.load %arg2[%c25] : memref<98xf32, #tpu.memory_space<smem>>
      %187 = vector.extract_strided_slice %170 {offsets = [3, 0], sizes = [16, 16], strides = [1, 1]} : vector<22x16xf32> to vector<16x16xf32>
      %188 = vector.broadcast %186 : f32 to vector<16x16xf32>
      %189 = arith.mulf %188, %187 : vector<16x16xf32>
      %190 = arith.addf %185, %189 : vector<16x16xf32>
      %c32 = arith.constant 32 : index
      %191 = memref.load %arg2[%c32] : memref<98xf32, #tpu.memory_space<smem>>
      %192 = vector.extract_strided_slice %170 {offsets = [4, 0], sizes = [16, 16], strides = [1, 1]} : vector<22x16xf32> to vector<16x16xf32>
      %193 = vector.broadcast %191 : f32 to vector<16x16xf32>
      %194 = arith.mulf %193, %192 : vector<16x16xf32>
      %195 = arith.addf %190, %194 : vector<16x16xf32>
      %c39 = arith.constant 39 : index
      %196 = memref.load %arg2[%c39] : memref<98xf32, #tpu.memory_space<smem>>
      %197 = vector.extract_strided_slice %170 {offsets = [5, 0], sizes = [16, 16], strides = [1, 1]} : vector<22x16xf32> to vector<16x16xf32>
      %198 = vector.broadcast %196 : f32 to vector<16x16xf32>
      %199 = arith.mulf %198, %197 : vector<16x16xf32>
      %200 = arith.addf %195, %199 : vector<16x16xf32>
      %c46 = arith.constant 46 : index
      %201 = memref.load %arg2[%c46] : memref<98xf32, #tpu.memory_space<smem>>
      %202 = vector.extract_strided_slice %170 {offsets = [6, 0], sizes = [16, 16], strides = [1, 1]} : vector<22x16xf32> to vector<16x16xf32>
      %203 = vector.broadcast %201 : f32 to vector<16x16xf32>
      %204 = arith.mulf %203, %202 : vector<16x16xf32>
      %205 = arith.addf %200, %204 : vector<16x16xf32>
      %c0_28 = arith.constant 0 : index
      %c5_29 = arith.constant 5 : index
      %c130 = arith.constant 130 : index
      %206 = vector.load %arg5[%c0_28, %c5_29, %c130] : memref<2x32x256xf32, #tpu.memory_space<vmem>>, vector<1x22x16xf32>
      %207 = vector.shape_cast %206 : vector<1x22x16xf32> to vector<22x16xf32>
      %c5_30 = arith.constant 5 : index
      %208 = memref.load %arg2[%c5_30] : memref<98xf32, #tpu.memory_space<smem>>
      %209 = vector.extract_strided_slice %207 {offsets = [0, 0], sizes = [16, 16], strides = [1, 1]} : vector<22x16xf32> to vector<16x16xf32>
      %210 = vector.broadcast %208 : f32 to vector<16x16xf32>
      %211 = arith.mulf %210, %209 : vector<16x16xf32>
      %212 = arith.addf %205, %211 : vector<16x16xf32>
      %c12 = arith.constant 12 : index
      %213 = memref.load %arg2[%c12] : memref<98xf32, #tpu.memory_space<smem>>
      %214 = vector.extract_strided_slice %207 {offsets = [1, 0], sizes = [16, 16], strides = [1, 1]} : vector<22x16xf32> to vector<16x16xf32>
      %215 = vector.broadcast %213 : f32 to vector<16x16xf32>
      %216 = arith.mulf %215, %214 : vector<16x16xf32>
      %217 = arith.addf %212, %216 : vector<16x16xf32>
      %c19 = arith.constant 19 : index
      %218 = memref.load %arg2[%c19] : memref<98xf32, #tpu.memory_space<smem>>
      %219 = vector.extract_strided_slice %207 {offsets = [2, 0], sizes = [16, 16], strides = [1, 1]} : vector<22x16xf32> to vector<16x16xf32>
      %220 = vector.broadcast %218 : f32 to vector<16x16xf32>
      %221 = arith.mulf %220, %219 : vector<16x16xf32>
      %222 = arith.addf %217, %221 : vector<16x16xf32>
      %c26 = arith.constant 26 : index
      %223 = memref.load %arg2[%c26] : memref<98xf32, #tpu.memory_space<smem>>
      %224 = vector.extract_strided_slice %207 {offsets = [3, 0], sizes = [16, 16], strides = [1, 1]} : vector<22x16xf32> to vector<16x16xf32>
      %225 = vector.broadcast %223 : f32 to vector<16x16xf32>
      %226 = arith.mulf %225, %224 : vector<16x16xf32>
      %227 = arith.addf %222, %226 : vector<16x16xf32>
      %c33 = arith.constant 33 : index
      %228 = memref.load %arg2[%c33] : memref<98xf32, #tpu.memory_space<smem>>
      %229 = vector.extract_strided_slice %207 {offsets = [4, 0], sizes = [16, 16], strides = [1, 1]} : vector<22x16xf32> to vector<16x16xf32>
      %230 = vector.broadcast %228 : f32 to vector<16x16xf32>
      %231 = arith.mulf %230, %229 : vector<16x16xf32>
      %232 = arith.addf %227, %231 : vector<16x16xf32>
      %c40 = arith.constant 40 : index
      %233 = memref.load %arg2[%c40] : memref<98xf32, #tpu.memory_space<smem>>
      %234 = vector.extract_strided_slice %207 {offsets = [5, 0], sizes = [16, 16], strides = [1, 1]} : vector<22x16xf32> to vector<16x16xf32>
      %235 = vector.broadcast %233 : f32 to vector<16x16xf32>
      %236 = arith.mulf %235, %234 : vector<16x16xf32>
      %237 = arith.addf %232, %236 : vector<16x16xf32>
      %c47 = arith.constant 47 : index
      %238 = memref.load %arg2[%c47] : memref<98xf32, #tpu.memory_space<smem>>
      %239 = vector.extract_strided_slice %207 {offsets = [6, 0], sizes = [16, 16], strides = [1, 1]} : vector<22x16xf32> to vector<16x16xf32>
      %240 = vector.broadcast %238 : f32 to vector<16x16xf32>
      %241 = arith.mulf %240, %239 : vector<16x16xf32>
      %242 = arith.addf %237, %241 : vector<16x16xf32>
      %c0_31 = arith.constant 0 : index
      %c5_32 = arith.constant 5 : index
      %c131 = arith.constant 131 : index
      %243 = vector.load %arg5[%c0_31, %c5_32, %c131] : memref<2x32x256xf32, #tpu.memory_space<vmem>>, vector<1x22x16xf32>
      %244 = vector.shape_cast %243 : vector<1x22x16xf32> to vector<22x16xf32>
      %c6 = arith.constant 6 : index
      %245 = memref.load %arg2[%c6] : memref<98xf32, #tpu.memory_space<smem>>
      %246 = vector.extract_strided_slice %244 {offsets = [0, 0], sizes = [16, 16], strides = [1, 1]} : vector<22x16xf32> to vector<16x16xf32>
      %247 = vector.broadcast %245 : f32 to vector<16x16xf32>
      %248 = arith.mulf %247, %246 : vector<16x16xf32>
      %249 = arith.addf %242, %248 : vector<16x16xf32>
      %c13 = arith.constant 13 : index
      %250 = memref.load %arg2[%c13] : memref<98xf32, #tpu.memory_space<smem>>
      %251 = vector.extract_strided_slice %244 {offsets = [1, 0], sizes = [16, 16], strides = [1, 1]} : vector<22x16xf32> to vector<16x16xf32>
      %252 = vector.broadcast %250 : f32 to vector<16x16xf32>
      %253 = arith.mulf %252, %251 : vector<16x16xf32>
      %254 = arith.addf %249, %253 : vector<16x16xf32>
      %c20 = arith.constant 20 : index
      %255 = memref.load %arg2[%c20] : memref<98xf32, #tpu.memory_space<smem>>
      %256 = vector.extract_strided_slice %244 {offsets = [2, 0], sizes = [16, 16], strides = [1, 1]} : vector<22x16xf32> to vector<16x16xf32>
      %257 = vector.broadcast %255 : f32 to vector<16x16xf32>
      %258 = arith.mulf %257, %256 : vector<16x16xf32>
      %259 = arith.addf %254, %258 : vector<16x16xf32>
      %c27 = arith.constant 27 : index
      %260 = memref.load %arg2[%c27] : memref<98xf32, #tpu.memory_space<smem>>
      %261 = vector.extract_strided_slice %244 {offsets = [3, 0], sizes = [16, 16], strides = [1, 1]} : vector<22x16xf32> to vector<16x16xf32>
      %262 = vector.broadcast %260 : f32 to vector<16x16xf32>
      %263 = arith.mulf %262, %261 : vector<16x16xf32>
      %264 = arith.addf %259, %263 : vector<16x16xf32>
      %c34 = arith.constant 34 : index
      %265 = memref.load %arg2[%c34] : memref<98xf32, #tpu.memory_space<smem>>
      %266 = vector.extract_strided_slice %244 {offsets = [4, 0], sizes = [16, 16], strides = [1, 1]} : vector<22x16xf32> to vector<16x16xf32>
      %267 = vector.broadcast %265 : f32 to vector<16x16xf32>
      %268 = arith.mulf %267, %266 : vector<16x16xf32>
      %269 = arith.addf %264, %268 : vector<16x16xf32>
      %c41 = arith.constant 41 : index
      %270 = memref.load %arg2[%c41] : memref<98xf32, #tpu.memory_space<smem>>
      %271 = vector.extract_strided_slice %244 {offsets = [5, 0], sizes = [16, 16], strides = [1, 1]} : vector<22x16xf32> to vector<16x16xf32>
      %272 = vector.broadcast %270 : f32 to vector<16x16xf32>
      %273 = arith.mulf %272, %271 : vector<16x16xf32>
      %274 = arith.addf %269, %273 : vector<16x16xf32>
      %c48 = arith.constant 48 : index
      %275 = memref.load %arg2[%c48] : memref<98xf32, #tpu.memory_space<smem>>
      %276 = vector.extract_strided_slice %244 {offsets = [6, 0], sizes = [16, 16], strides = [1, 1]} : vector<22x16xf32> to vector<16x16xf32>
      %277 = vector.broadcast %275 : f32 to vector<16x16xf32>
      %278 = arith.mulf %277, %276 : vector<16x16xf32>
      %279 = arith.addf %274, %278 : vector<16x16xf32>
      %c1_33 = arith.constant 1 : index
      %c5_34 = arith.constant 5 : index
      %c125_35 = arith.constant 125 : index
      %280 = vector.load %arg5[%c1_33, %c5_34, %c125_35] : memref<2x32x256xf32, #tpu.memory_space<vmem>>, vector<1x22x16xf32>
      %281 = vector.shape_cast %280 : vector<1x22x16xf32> to vector<22x16xf32>
      %c49 = arith.constant 49 : index
      %282 = memref.load %arg2[%c49] : memref<98xf32, #tpu.memory_space<smem>>
      %283 = vector.extract_strided_slice %281 {offsets = [0, 0], sizes = [16, 16], strides = [1, 1]} : vector<22x16xf32> to vector<16x16xf32>
      %284 = vector.broadcast %282 : f32 to vector<16x16xf32>
      %285 = arith.mulf %284, %283 : vector<16x16xf32>
      %286 = arith.addf %279, %285 : vector<16x16xf32>
      %c56 = arith.constant 56 : index
      %287 = memref.load %arg2[%c56] : memref<98xf32, #tpu.memory_space<smem>>
      %288 = vector.extract_strided_slice %281 {offsets = [1, 0], sizes = [16, 16], strides = [1, 1]} : vector<22x16xf32> to vector<16x16xf32>
      %289 = vector.broadcast %287 : f32 to vector<16x16xf32>
      %290 = arith.mulf %289, %288 : vector<16x16xf32>
      %291 = arith.addf %286, %290 : vector<16x16xf32>
      %c63 = arith.constant 63 : index
      %292 = memref.load %arg2[%c63] : memref<98xf32, #tpu.memory_space<smem>>
      %293 = vector.extract_strided_slice %281 {offsets = [2, 0], sizes = [16, 16], strides = [1, 1]} : vector<22x16xf32> to vector<16x16xf32>
      %294 = vector.broadcast %292 : f32 to vector<16x16xf32>
      %295 = arith.mulf %294, %293 : vector<16x16xf32>
      %296 = arith.addf %291, %295 : vector<16x16xf32>
      %c70 = arith.constant 70 : index
      %297 = memref.load %arg2[%c70] : memref<98xf32, #tpu.memory_space<smem>>
      %298 = vector.extract_strided_slice %281 {offsets = [3, 0], sizes = [16, 16], strides = [1, 1]} : vector<22x16xf32> to vector<16x16xf32>
      %299 = vector.broadcast %297 : f32 to vector<16x16xf32>
      %300 = arith.mulf %299, %298 : vector<16x16xf32>
      %301 = arith.addf %296, %300 : vector<16x16xf32>
      %c77 = arith.constant 77 : index
      %302 = memref.load %arg2[%c77] : memref<98xf32, #tpu.memory_space<smem>>
      %303 = vector.extract_strided_slice %281 {offsets = [4, 0], sizes = [16, 16], strides = [1, 1]} : vector<22x16xf32> to vector<16x16xf32>
      %304 = vector.broadcast %302 : f32 to vector<16x16xf32>
      %305 = arith.mulf %304, %303 : vector<16x16xf32>
      %306 = arith.addf %301, %305 : vector<16x16xf32>
      %c84 = arith.constant 84 : index
      %307 = memref.load %arg2[%c84] : memref<98xf32, #tpu.memory_space<smem>>
      %308 = vector.extract_strided_slice %281 {offsets = [5, 0], sizes = [16, 16], strides = [1, 1]} : vector<22x16xf32> to vector<16x16xf32>
      %309 = vector.broadcast %307 : f32 to vector<16x16xf32>
      %310 = arith.mulf %309, %308 : vector<16x16xf32>
      %311 = arith.addf %306, %310 : vector<16x16xf32>
      %c91 = arith.constant 91 : index
      %312 = memref.load %arg2[%c91] : memref<98xf32, #tpu.memory_space<smem>>
      %313 = vector.extract_strided_slice %281 {offsets = [6, 0], sizes = [16, 16], strides = [1, 1]} : vector<22x16xf32> to vector<16x16xf32>
      %314 = vector.broadcast %312 : f32 to vector<16x16xf32>
      %315 = arith.mulf %314, %313 : vector<16x16xf32>
      %316 = arith.addf %311, %315 : vector<16x16xf32>
      %c1_36 = arith.constant 1 : index
      %c5_37 = arith.constant 5 : index
      %c126_38 = arith.constant 126 : index
      %317 = vector.load %arg5[%c1_36, %c5_37, %c126_38] : memref<2x32x256xf32, #tpu.memory_space<vmem>>, vector<1x22x16xf32>
      %318 = vector.shape_cast %317 : vector<1x22x16xf32> to vector<22x16xf32>
      %c50 = arith.constant 50 : index
      %319 = memref.load %arg2[%c50] : memref<98xf32, #tpu.memory_space<smem>>
      %320 = vector.extract_strided_slice %318 {offsets = [0, 0], sizes = [16, 16], strides = [1, 1]} : vector<22x16xf32> to vector<16x16xf32>
      %321 = vector.broadcast %319 : f32 to vector<16x16xf32>
      %322 = arith.mulf %321, %320 : vector<16x16xf32>
      %323 = arith.addf %316, %322 : vector<16x16xf32>
      %c57 = arith.constant 57 : index
      %324 = memref.load %arg2[%c57] : memref<98xf32, #tpu.memory_space<smem>>
      %325 = vector.extract_strided_slice %318 {offsets = [1, 0], sizes = [16, 16], strides = [1, 1]} : vector<22x16xf32> to vector<16x16xf32>
      %326 = vector.broadcast %324 : f32 to vector<16x16xf32>
      %327 = arith.mulf %326, %325 : vector<16x16xf32>
      %328 = arith.addf %323, %327 : vector<16x16xf32>
      %c64 = arith.constant 64 : index
      %329 = memref.load %arg2[%c64] : memref<98xf32, #tpu.memory_space<smem>>
      %330 = vector.extract_strided_slice %318 {offsets = [2, 0], sizes = [16, 16], strides = [1, 1]} : vector<22x16xf32> to vector<16x16xf32>
      %331 = vector.broadcast %329 : f32 to vector<16x16xf32>
      %332 = arith.mulf %331, %330 : vector<16x16xf32>
      %333 = arith.addf %328, %332 : vector<16x16xf32>
      %c71 = arith.constant 71 : index
      %334 = memref.load %arg2[%c71] : memref<98xf32, #tpu.memory_space<smem>>
      %335 = vector.extract_strided_slice %318 {offsets = [3, 0], sizes = [16, 16], strides = [1, 1]} : vector<22x16xf32> to vector<16x16xf32>
      %336 = vector.broadcast %334 : f32 to vector<16x16xf32>
      %337 = arith.mulf %336, %335 : vector<16x16xf32>
      %338 = arith.addf %333, %337 : vector<16x16xf32>
      %c78 = arith.constant 78 : index
      %339 = memref.load %arg2[%c78] : memref<98xf32, #tpu.memory_space<smem>>
      %340 = vector.extract_strided_slice %318 {offsets = [4, 0], sizes = [16, 16], strides = [1, 1]} : vector<22x16xf32> to vector<16x16xf32>
      %341 = vector.broadcast %339 : f32 to vector<16x16xf32>
      %342 = arith.mulf %341, %340 : vector<16x16xf32>
      %343 = arith.addf %338, %342 : vector<16x16xf32>
      %c85 = arith.constant 85 : index
      %344 = memref.load %arg2[%c85] : memref<98xf32, #tpu.memory_space<smem>>
      %345 = vector.extract_strided_slice %318 {offsets = [5, 0], sizes = [16, 16], strides = [1, 1]} : vector<22x16xf32> to vector<16x16xf32>
      %346 = vector.broadcast %344 : f32 to vector<16x16xf32>
      %347 = arith.mulf %346, %345 : vector<16x16xf32>
      %348 = arith.addf %343, %347 : vector<16x16xf32>
      %c92 = arith.constant 92 : index
      %349 = memref.load %arg2[%c92] : memref<98xf32, #tpu.memory_space<smem>>
      %350 = vector.extract_strided_slice %318 {offsets = [6, 0], sizes = [16, 16], strides = [1, 1]} : vector<22x16xf32> to vector<16x16xf32>
      %351 = vector.broadcast %349 : f32 to vector<16x16xf32>
      %352 = arith.mulf %351, %350 : vector<16x16xf32>
      %353 = arith.addf %348, %352 : vector<16x16xf32>
      %c1_39 = arith.constant 1 : index
      %c5_40 = arith.constant 5 : index
      %c127_41 = arith.constant 127 : index
      %354 = vector.load %arg5[%c1_39, %c5_40, %c127_41] : memref<2x32x256xf32, #tpu.memory_space<vmem>>, vector<1x22x16xf32>
      %355 = vector.shape_cast %354 : vector<1x22x16xf32> to vector<22x16xf32>
      %c51 = arith.constant 51 : index
      %356 = memref.load %arg2[%c51] : memref<98xf32, #tpu.memory_space<smem>>
      %357 = vector.extract_strided_slice %355 {offsets = [0, 0], sizes = [16, 16], strides = [1, 1]} : vector<22x16xf32> to vector<16x16xf32>
      %358 = vector.broadcast %356 : f32 to vector<16x16xf32>
      %359 = arith.mulf %358, %357 : vector<16x16xf32>
      %360 = arith.addf %353, %359 : vector<16x16xf32>
      %c58 = arith.constant 58 : index
      %361 = memref.load %arg2[%c58] : memref<98xf32, #tpu.memory_space<smem>>
      %362 = vector.extract_strided_slice %355 {offsets = [1, 0], sizes = [16, 16], strides = [1, 1]} : vector<22x16xf32> to vector<16x16xf32>
      %363 = vector.broadcast %361 : f32 to vector<16x16xf32>
      %364 = arith.mulf %363, %362 : vector<16x16xf32>
      %365 = arith.addf %360, %364 : vector<16x16xf32>
      %c65 = arith.constant 65 : index
      %366 = memref.load %arg2[%c65] : memref<98xf32, #tpu.memory_space<smem>>
      %367 = vector.extract_strided_slice %355 {offsets = [2, 0], sizes = [16, 16], strides = [1, 1]} : vector<22x16xf32> to vector<16x16xf32>
      %368 = vector.broadcast %366 : f32 to vector<16x16xf32>
      %369 = arith.mulf %368, %367 : vector<16x16xf32>
      %370 = arith.addf %365, %369 : vector<16x16xf32>
      %c72 = arith.constant 72 : index
      %371 = memref.load %arg2[%c72] : memref<98xf32, #tpu.memory_space<smem>>
      %372 = vector.extract_strided_slice %355 {offsets = [3, 0], sizes = [16, 16], strides = [1, 1]} : vector<22x16xf32> to vector<16x16xf32>
      %373 = vector.broadcast %371 : f32 to vector<16x16xf32>
      %374 = arith.mulf %373, %372 : vector<16x16xf32>
      %375 = arith.addf %370, %374 : vector<16x16xf32>
      %c79 = arith.constant 79 : index
      %376 = memref.load %arg2[%c79] : memref<98xf32, #tpu.memory_space<smem>>
      %377 = vector.extract_strided_slice %355 {offsets = [4, 0], sizes = [16, 16], strides = [1, 1]} : vector<22x16xf32> to vector<16x16xf32>
      %378 = vector.broadcast %376 : f32 to vector<16x16xf32>
      %379 = arith.mulf %378, %377 : vector<16x16xf32>
      %380 = arith.addf %375, %379 : vector<16x16xf32>
      %c86 = arith.constant 86 : index
      %381 = memref.load %arg2[%c86] : memref<98xf32, #tpu.memory_space<smem>>
      %382 = vector.extract_strided_slice %355 {offsets = [5, 0], sizes = [16, 16], strides = [1, 1]} : vector<22x16xf32> to vector<16x16xf32>
      %383 = vector.broadcast %381 : f32 to vector<16x16xf32>
      %384 = arith.mulf %383, %382 : vector<16x16xf32>
      %385 = arith.addf %380, %384 : vector<16x16xf32>
      %c93 = arith.constant 93 : index
      %386 = memref.load %arg2[%c93] : memref<98xf32, #tpu.memory_space<smem>>
      %387 = vector.extract_strided_slice %355 {offsets = [6, 0], sizes = [16, 16], strides = [1, 1]} : vector<22x16xf32> to vector<16x16xf32>
      %388 = vector.broadcast %386 : f32 to vector<16x16xf32>
      %389 = arith.mulf %388, %387 : vector<16x16xf32>
      %390 = arith.addf %385, %389 : vector<16x16xf32>
      %c1_42 = arith.constant 1 : index
      %c5_43 = arith.constant 5 : index
      %c128_44 = arith.constant 128 : index
      %391 = vector.load %arg5[%c1_42, %c5_43, %c128_44] : memref<2x32x256xf32, #tpu.memory_space<vmem>>, vector<1x22x16xf32>
      %392 = vector.shape_cast %391 : vector<1x22x16xf32> to vector<22x16xf32>
      %c52 = arith.constant 52 : index
      %393 = memref.load %arg2[%c52] : memref<98xf32, #tpu.memory_space<smem>>
      %394 = vector.extract_strided_slice %392 {offsets = [0, 0], sizes = [16, 16], strides = [1, 1]} : vector<22x16xf32> to vector<16x16xf32>
      %395 = vector.broadcast %393 : f32 to vector<16x16xf32>
      %396 = arith.mulf %395, %394 : vector<16x16xf32>
      %397 = arith.addf %390, %396 : vector<16x16xf32>
      %c59 = arith.constant 59 : index
      %398 = memref.load %arg2[%c59] : memref<98xf32, #tpu.memory_space<smem>>
      %399 = vector.extract_strided_slice %392 {offsets = [1, 0], sizes = [16, 16], strides = [1, 1]} : vector<22x16xf32> to vector<16x16xf32>
      %400 = vector.broadcast %398 : f32 to vector<16x16xf32>
      %401 = arith.mulf %400, %399 : vector<16x16xf32>
      %402 = arith.addf %397, %401 : vector<16x16xf32>
      %c66 = arith.constant 66 : index
      %403 = memref.load %arg2[%c66] : memref<98xf32, #tpu.memory_space<smem>>
      %404 = vector.extract_strided_slice %392 {offsets = [2, 0], sizes = [16, 16], strides = [1, 1]} : vector<22x16xf32> to vector<16x16xf32>
      %405 = vector.broadcast %403 : f32 to vector<16x16xf32>
      %406 = arith.mulf %405, %404 : vector<16x16xf32>
      %407 = arith.addf %402, %406 : vector<16x16xf32>
      %c73 = arith.constant 73 : index
      %408 = memref.load %arg2[%c73] : memref<98xf32, #tpu.memory_space<smem>>
      %409 = vector.extract_strided_slice %392 {offsets = [3, 0], sizes = [16, 16], strides = [1, 1]} : vector<22x16xf32> to vector<16x16xf32>
      %410 = vector.broadcast %408 : f32 to vector<16x16xf32>
      %411 = arith.mulf %410, %409 : vector<16x16xf32>
      %412 = arith.addf %407, %411 : vector<16x16xf32>
      %c80 = arith.constant 80 : index
      %413 = memref.load %arg2[%c80] : memref<98xf32, #tpu.memory_space<smem>>
      %414 = vector.extract_strided_slice %392 {offsets = [4, 0], sizes = [16, 16], strides = [1, 1]} : vector<22x16xf32> to vector<16x16xf32>
      %415 = vector.broadcast %413 : f32 to vector<16x16xf32>
      %416 = arith.mulf %415, %414 : vector<16x16xf32>
      %417 = arith.addf %412, %416 : vector<16x16xf32>
      %c87 = arith.constant 87 : index
      %418 = memref.load %arg2[%c87] : memref<98xf32, #tpu.memory_space<smem>>
      %419 = vector.extract_strided_slice %392 {offsets = [5, 0], sizes = [16, 16], strides = [1, 1]} : vector<22x16xf32> to vector<16x16xf32>
      %420 = vector.broadcast %418 : f32 to vector<16x16xf32>
      %421 = arith.mulf %420, %419 : vector<16x16xf32>
      %422 = arith.addf %417, %421 : vector<16x16xf32>
      %c94 = arith.constant 94 : index
      %423 = memref.load %arg2[%c94] : memref<98xf32, #tpu.memory_space<smem>>
      %424 = vector.extract_strided_slice %392 {offsets = [6, 0], sizes = [16, 16], strides = [1, 1]} : vector<22x16xf32> to vector<16x16xf32>
      %425 = vector.broadcast %423 : f32 to vector<16x16xf32>
      %426 = arith.mulf %425, %424 : vector<16x16xf32>
      %427 = arith.addf %422, %426 : vector<16x16xf32>
      %c1_45 = arith.constant 1 : index
      %c5_46 = arith.constant 5 : index
      %c129_47 = arith.constant 129 : index
      %428 = vector.load %arg5[%c1_45, %c5_46, %c129_47] : memref<2x32x256xf32, #tpu.memory_space<vmem>>, vector<1x22x16xf32>
      %429 = vector.shape_cast %428 : vector<1x22x16xf32> to vector<22x16xf32>
      %c53 = arith.constant 53 : index
      %430 = memref.load %arg2[%c53] : memref<98xf32, #tpu.memory_space<smem>>
      %431 = vector.extract_strided_slice %429 {offsets = [0, 0], sizes = [16, 16], strides = [1, 1]} : vector<22x16xf32> to vector<16x16xf32>
      %432 = vector.broadcast %430 : f32 to vector<16x16xf32>
      %433 = arith.mulf %432, %431 : vector<16x16xf32>
      %434 = arith.addf %427, %433 : vector<16x16xf32>
      %c60 = arith.constant 60 : index
      %435 = memref.load %arg2[%c60] : memref<98xf32, #tpu.memory_space<smem>>
      %436 = vector.extract_strided_slice %429 {offsets = [1, 0], sizes = [16, 16], strides = [1, 1]} : vector<22x16xf32> to vector<16x16xf32>
      %437 = vector.broadcast %435 : f32 to vector<16x16xf32>
      %438 = arith.mulf %437, %436 : vector<16x16xf32>
      %439 = arith.addf %434, %438 : vector<16x16xf32>
      %c67 = arith.constant 67 : index
      %440 = memref.load %arg2[%c67] : memref<98xf32, #tpu.memory_space<smem>>
      %441 = vector.extract_strided_slice %429 {offsets = [2, 0], sizes = [16, 16], strides = [1, 1]} : vector<22x16xf32> to vector<16x16xf32>
      %442 = vector.broadcast %440 : f32 to vector<16x16xf32>
      %443 = arith.mulf %442, %441 : vector<16x16xf32>
      %444 = arith.addf %439, %443 : vector<16x16xf32>
      %c74 = arith.constant 74 : index
      %445 = memref.load %arg2[%c74] : memref<98xf32, #tpu.memory_space<smem>>
      %446 = vector.extract_strided_slice %429 {offsets = [3, 0], sizes = [16, 16], strides = [1, 1]} : vector<22x16xf32> to vector<16x16xf32>
      %447 = vector.broadcast %445 : f32 to vector<16x16xf32>
      %448 = arith.mulf %447, %446 : vector<16x16xf32>
      %449 = arith.addf %444, %448 : vector<16x16xf32>
      %c81 = arith.constant 81 : index
      %450 = memref.load %arg2[%c81] : memref<98xf32, #tpu.memory_space<smem>>
      %451 = vector.extract_strided_slice %429 {offsets = [4, 0], sizes = [16, 16], strides = [1, 1]} : vector<22x16xf32> to vector<16x16xf32>
      %452 = vector.broadcast %450 : f32 to vector<16x16xf32>
      %453 = arith.mulf %452, %451 : vector<16x16xf32>
      %454 = arith.addf %449, %453 : vector<16x16xf32>
      %c88 = arith.constant 88 : index
      %455 = memref.load %arg2[%c88] : memref<98xf32, #tpu.memory_space<smem>>
      %456 = vector.extract_strided_slice %429 {offsets = [5, 0], sizes = [16, 16], strides = [1, 1]} : vector<22x16xf32> to vector<16x16xf32>
      %457 = vector.broadcast %455 : f32 to vector<16x16xf32>
      %458 = arith.mulf %457, %456 : vector<16x16xf32>
      %459 = arith.addf %454, %458 : vector<16x16xf32>
      %c95 = arith.constant 95 : index
      %460 = memref.load %arg2[%c95] : memref<98xf32, #tpu.memory_space<smem>>
      %461 = vector.extract_strided_slice %429 {offsets = [6, 0], sizes = [16, 16], strides = [1, 1]} : vector<22x16xf32> to vector<16x16xf32>
      %462 = vector.broadcast %460 : f32 to vector<16x16xf32>
      %463 = arith.mulf %462, %461 : vector<16x16xf32>
      %464 = arith.addf %459, %463 : vector<16x16xf32>
      %c1_48 = arith.constant 1 : index
      %c5_49 = arith.constant 5 : index
      %c130_50 = arith.constant 130 : index
      %465 = vector.load %arg5[%c1_48, %c5_49, %c130_50] : memref<2x32x256xf32, #tpu.memory_space<vmem>>, vector<1x22x16xf32>
      %466 = vector.shape_cast %465 : vector<1x22x16xf32> to vector<22x16xf32>
      %c54 = arith.constant 54 : index
      %467 = memref.load %arg2[%c54] : memref<98xf32, #tpu.memory_space<smem>>
      %468 = vector.extract_strided_slice %466 {offsets = [0, 0], sizes = [16, 16], strides = [1, 1]} : vector<22x16xf32> to vector<16x16xf32>
      %469 = vector.broadcast %467 : f32 to vector<16x16xf32>
      %470 = arith.mulf %469, %468 : vector<16x16xf32>
      %471 = arith.addf %464, %470 : vector<16x16xf32>
      %c61 = arith.constant 61 : index
      %472 = memref.load %arg2[%c61] : memref<98xf32, #tpu.memory_space<smem>>
      %473 = vector.extract_strided_slice %466 {offsets = [1, 0], sizes = [16, 16], strides = [1, 1]} : vector<22x16xf32> to vector<16x16xf32>
      %474 = vector.broadcast %472 : f32 to vector<16x16xf32>
      %475 = arith.mulf %474, %473 : vector<16x16xf32>
      %476 = arith.addf %471, %475 : vector<16x16xf32>
      %c68 = arith.constant 68 : index
      %477 = memref.load %arg2[%c68] : memref<98xf32, #tpu.memory_space<smem>>
      %478 = vector.extract_strided_slice %466 {offsets = [2, 0], sizes = [16, 16], strides = [1, 1]} : vector<22x16xf32> to vector<16x16xf32>
      %479 = vector.broadcast %477 : f32 to vector<16x16xf32>
      %480 = arith.mulf %479, %478 : vector<16x16xf32>
      %481 = arith.addf %476, %480 : vector<16x16xf32>
      %c75 = arith.constant 75 : index
      %482 = memref.load %arg2[%c75] : memref<98xf32, #tpu.memory_space<smem>>
      %483 = vector.extract_strided_slice %466 {offsets = [3, 0], sizes = [16, 16], strides = [1, 1]} : vector<22x16xf32> to vector<16x16xf32>
      %484 = vector.broadcast %482 : f32 to vector<16x16xf32>
      %485 = arith.mulf %484, %483 : vector<16x16xf32>
      %486 = arith.addf %481, %485 : vector<16x16xf32>
      %c82 = arith.constant 82 : index
      %487 = memref.load %arg2[%c82] : memref<98xf32, #tpu.memory_space<smem>>
      %488 = vector.extract_strided_slice %466 {offsets = [4, 0], sizes = [16, 16], strides = [1, 1]} : vector<22x16xf32> to vector<16x16xf32>
      %489 = vector.broadcast %487 : f32 to vector<16x16xf32>
      %490 = arith.mulf %489, %488 : vector<16x16xf32>
      %491 = arith.addf %486, %490 : vector<16x16xf32>
      %c89 = arith.constant 89 : index
      %492 = memref.load %arg2[%c89] : memref<98xf32, #tpu.memory_space<smem>>
      %493 = vector.extract_strided_slice %466 {offsets = [5, 0], sizes = [16, 16], strides = [1, 1]} : vector<22x16xf32> to vector<16x16xf32>
      %494 = vector.broadcast %492 : f32 to vector<16x16xf32>
      %495 = arith.mulf %494, %493 : vector<16x16xf32>
      %496 = arith.addf %491, %495 : vector<16x16xf32>
      %c96 = arith.constant 96 : index
      %497 = memref.load %arg2[%c96] : memref<98xf32, #tpu.memory_space<smem>>
      %498 = vector.extract_strided_slice %466 {offsets = [6, 0], sizes = [16, 16], strides = [1, 1]} : vector<22x16xf32> to vector<16x16xf32>
      %499 = vector.broadcast %497 : f32 to vector<16x16xf32>
      %500 = arith.mulf %499, %498 : vector<16x16xf32>
      %501 = arith.addf %496, %500 : vector<16x16xf32>
      %c1_51 = arith.constant 1 : index
      %c5_52 = arith.constant 5 : index
      %c131_53 = arith.constant 131 : index
      %502 = vector.load %arg5[%c1_51, %c5_52, %c131_53] : memref<2x32x256xf32, #tpu.memory_space<vmem>>, vector<1x22x16xf32>
      %503 = vector.shape_cast %502 : vector<1x22x16xf32> to vector<22x16xf32>
      %c55 = arith.constant 55 : index
      %504 = memref.load %arg2[%c55] : memref<98xf32, #tpu.memory_space<smem>>
      %505 = vector.extract_strided_slice %503 {offsets = [0, 0], sizes = [16, 16], strides = [1, 1]} : vector<22x16xf32> to vector<16x16xf32>
      %506 = vector.broadcast %504 : f32 to vector<16x16xf32>
      %507 = arith.mulf %506, %505 : vector<16x16xf32>
      %508 = arith.addf %501, %507 : vector<16x16xf32>
      %c62 = arith.constant 62 : index
      %509 = memref.load %arg2[%c62] : memref<98xf32, #tpu.memory_space<smem>>
      %510 = vector.extract_strided_slice %503 {offsets = [1, 0], sizes = [16, 16], strides = [1, 1]} : vector<22x16xf32> to vector<16x16xf32>
      %511 = vector.broadcast %509 : f32 to vector<16x16xf32>
      %512 = arith.mulf %511, %510 : vector<16x16xf32>
      %513 = arith.addf %508, %512 : vector<16x16xf32>
      %c69 = arith.constant 69 : index
      %514 = memref.load %arg2[%c69] : memref<98xf32, #tpu.memory_space<smem>>
      %515 = vector.extract_strided_slice %503 {offsets = [2, 0], sizes = [16, 16], strides = [1, 1]} : vector<22x16xf32> to vector<16x16xf32>
      %516 = vector.broadcast %514 : f32 to vector<16x16xf32>
      %517 = arith.mulf %516, %515 : vector<16x16xf32>
      %518 = arith.addf %513, %517 : vector<16x16xf32>
      %c76 = arith.constant 76 : index
      %519 = memref.load %arg2[%c76] : memref<98xf32, #tpu.memory_space<smem>>
      %520 = vector.extract_strided_slice %503 {offsets = [3, 0], sizes = [16, 16], strides = [1, 1]} : vector<22x16xf32> to vector<16x16xf32>
      %521 = vector.broadcast %519 : f32 to vector<16x16xf32>
      %522 = arith.mulf %521, %520 : vector<16x16xf32>
      %523 = arith.addf %518, %522 : vector<16x16xf32>
      %c83 = arith.constant 83 : index
      %524 = memref.load %arg2[%c83] : memref<98xf32, #tpu.memory_space<smem>>
      %525 = vector.extract_strided_slice %503 {offsets = [4, 0], sizes = [16, 16], strides = [1, 1]} : vector<22x16xf32> to vector<16x16xf32>
      %526 = vector.broadcast %524 : f32 to vector<16x16xf32>
      %527 = arith.mulf %526, %525 : vector<16x16xf32>
      %528 = arith.addf %523, %527 : vector<16x16xf32>
      %c90 = arith.constant 90 : index
      %529 = memref.load %arg2[%c90] : memref<98xf32, #tpu.memory_space<smem>>
      %530 = vector.extract_strided_slice %503 {offsets = [5, 0], sizes = [16, 16], strides = [1, 1]} : vector<22x16xf32> to vector<16x16xf32>
      %531 = vector.broadcast %529 : f32 to vector<16x16xf32>
      %532 = arith.mulf %531, %530 : vector<16x16xf32>
      %533 = arith.addf %528, %532 : vector<16x16xf32>
      %c97 = arith.constant 97 : index
      %534 = memref.load %arg2[%c97] : memref<98xf32, #tpu.memory_space<smem>>
      %535 = vector.extract_strided_slice %503 {offsets = [6, 0], sizes = [16, 16], strides = [1, 1]} : vector<22x16xf32> to vector<16x16xf32>
      %536 = vector.broadcast %534 : f32 to vector<16x16xf32>
      %537 = arith.mulf %536, %535 : vector<16x16xf32>
      %538 = arith.addf %533, %537 : vector<16x16xf32>
      %c0_54 = arith.constant 0 : index
      %c0_55 = arith.constant 0 : index
      %c0_56 = arith.constant 0 : index
      %c0_57 = arith.constant 0 : index
      %539 = vector.load %arg4[%c0_54, %c0_55, %c0_56, %c0_57] : memref<1x1x16x16xf32, #tpu.memory_space<vmem>>, vector<1x1x16x16xf32>
      %540 = vector.shape_cast %539 : vector<1x1x16x16xf32> to vector<16x16xf32>
      %541 = vector.shape_cast %538 : vector<16x16xf32> to vector<1x1x16x16xf32>
      tpu.vector_store %arg4[%c0_54, %c0_55, %c0_56, %c0_57], %541 {strides = array<i32>} : memref<1x1x16x16xf32, #tpu.memory_space<vmem>>, vector<1x1x16x16xf32>,
    } else {
    }
    return
  }
  func.func @transform_0(%arg0: i32, %arg1: i32) -> i32 {
    %c0_i32 = arith.constant 0 : i32
    %c0_i32_0 = arith.constant 0 : i32
    return %c0_i32 : i32
  }
  func.func @transform_1(%arg0: i32, %arg1: i32) -> (i32, i32, i32, i32) {
    %c0_i32 = arith.constant 0 : i32
    %c0_i32_0 = arith.constant 0 : i32
    %c0_i32_1 = arith.constant 0 : i32
    return %arg0, %arg1, %c0_i32, %c0_i32_0 : i32, i32, i32, i32
  }
  func.func @transform_2(%arg0: i32, %arg1: i32) -> (i32, i32, i32, i32) {
    %c0_i32 = arith.constant 0 : i32
    %c0_i32_0 = arith.constant 0 : i32
    %c0_i32_1 = arith.constant 0 : i32
    %c0_i32_2 = arith.constant 0 : i32
    return %arg0, %c0_i32, %c0_i32_0, %c0_i32_1 : i32, i32, i32, i32
  }
}

</mosaic_0001>

<bundles_post_ra>
// kernel: tpu_custom_call.1
= control target key start
LH: loop header
LB: loop body
LE: loop exit
PB: predicated region body
PF: predicated region fallthrough
CT: control target
= control target key end

     0   :  { %7 = vsyncpa [#allocation6], 0  ;;  %s6839_s0 = inlined_call_operand.hbm [shape: f32[98], index: 0, kind: input, shape index: {}]   ;;  %s6840_s1 = inlined_call_operand.hbm [shape: f32[2,4,16,16], index: 1, kind: input, shape index: {}]   ;;  %s6841_s2 = inlined_call_operand.hbm [shape: f32[2,1,16,16], index: 2, kind: output, shape index: {}]  }
   0x1   :  { %8 = vsyncpa [#allocation4], 0 }
   0x2   :  { %10 = vsyncpa [#allocation4 + $0x1], 0 }
   0x3   :  { %11 = vsyncpa [#allocation5], 0 }
   0x4   :  { %13 = vsyncpa [#allocation5 + $0x1], 0  ;;  %s4088_s9 = smov 0   ;;  %s4090_s10 = smov 0  }
   0x5   :  { %s4092_s11 = smov 0   ;;  %s4094_s12 = smov 0  }
   0x6   :  { %s4096_s13 = smov 0   ;;  %s4098_s14 = smov 0  }
   0x7 LB: > { %s3702_s15 = sadd.s32 4294967295, %s4056_s14   ;;  %s3703_s16 = sadd.s32 4294967294, %s4056_s14   ;;  %s4056_s14 = sphi %s4098_s14, %s19_s14   ;;  %s4052_s13 = sphi %s4096_s13, %s7461_s13   ;;  %s4048_s12 = sphi %s4094_s12, %s7460_s12   ;;  %s4044_s11 = sphi %s4092_s11, %s7459_s11   ;;  %s4040_s10 = sphi %s4090_s10, %s7458_s10   ;;  %s4036_s9 = sphi %s4088_s9, %s7457_s9  }
   0x8   : > { %s61_s17 = sadd.s32 1, %s4044_s11  ;;  %p68_p0 = scmp.ne.s32.totalorder %s4044_s11, %s4040_s10 }
   0x9   : > { %p69_p1 = scmp.eq.s32.totalorder %s4056_s14, 0  ;;  %p74_p2 = scmp.ne.s32.totalorder %s4040_s10, %s4036_s9 }
   0xa   : > { %p4126_p3 = scmp.eq.s32.totalorder %s3702_s15, 0  ;;  %p98_p4 = scmp.eq.s32.totalorder %s3702_s15, 1 }
   0xb   : > { %p70_p5 = por %p69_p1, %p68_p0  ;;  %p104_p6 = scmp.eq.s32.totalorder %s3703_s16, 1 }
   0xc   : > { %s6993_s18 = scalar_select %p4126_p3, 1, 0 }
   0xd   : > { %p4132_p7 = por %p4126_p3, %p74_p2  ;;  %p4136_p8 = por %p98_p4, %p68_p0 }
   0xe   : > { %p4140_p9 = por %p104_p6, %p74_p2  ;;  %p3704_p10 = scmp.ge.s32.totalorder %s4056_s14, 1 }
   0xf   : > { %s6994_s19 = scalar_select %p4132_p7, 1, 0 }
  0x10   : > { %s6995_s20 = scalar_select %p4136_p8, 1, 0 }
  0x11   : > { %s6996_s21 = scalar_select %p4140_p9, 1, 0 }
  0x12   : > { %p111_p11 = scmp.lt.s32.totalorder %s4056_s14, 3  ;;  %p3845_p1 = scmp.lt.s32.totalorder %s4056_s14, 2 }
  0x13   : > { %s133_s23 = sand.u32 1, %s4044_s11   ;;  %s31_s25 = sadd.s32 1, %s4052_s13 }
  0x14   : > { %p4147_p13 = pnand %p3704_p10, %p111_p11  ;;  %p4155_p0 = pnand %p3845_p1, %p70_p5 }
  0x15   : > { %s3707_s26 = sshll.u32 %s133_s23, 6  ;;  %p33_p4 = scmp.ge.s32.totalorder %s31_s25, 2 }
  0x16   : > { %p3832_p7 = pneg %p4147_p13  ;;  %s3927_s29 = scalar_lea.hbm %s6839_s0, 16 }
  0x17   : > { %p3928_p6 = scmp.ne.s32.totalorder %s6839_s0, %s3927_s29  ;;  %p3934_p5 = scmp.lt.u32.totalorder %s3927_s29, %s6839_s0 }
  0x18   : > { %p3833_p2 = pnand %p3832_p7, %p4126_p3 }
  0x1a   : > { %p3929_p10 = pneg %p3833_p2 }
  0x1c   : > { %p3930_p11 = pnand %p3929_p10, %p3928_p6 }
  0x1e   : > { %p3931_p12 = pneg %p3930_p11 }
  0x20   : > { %p3936_p1 = pnand %p3934_p5, %p3931_p12 }
  0x22   : > { %3939 = shalt.err (!%p3936_p1)
}
  0x23   : > { %s4058_s6 = smov [#allocation3]   ;;  %s7463_s25 = smov (%p33_p4, %s31_s25), 0 }
  0x24   : > { %3835 = dma.hbm_to_smem (!%p3833_p2), %s6839_s0, 16, %s4058_s6, [#allocation6]  }
  0x25   : > { %s3822_s15 = sshll.u32 %s4052_s13, 10  ;;  %s56_s16 = ssub.s32 %s4052_s13, %s7463_s25 }
  0x26   : > { %s4182_s29 = scalar_lea.hbm %s6840_s1, %s3822_s15  ;;  %p59_p7 = scmp.eq.s32.totalorder %s56_s16, 0 }
  0x27   : > { %s137_s30 = scalar_lea.vmem [#allocation7], %s3707_s26  ;;  %s4191_s5 = scalar_lea.sflag [#allocation4], %s133_s23 }
  0x28   : > { %s147_s3 = sshll.u32 %s137_s30, 4  ;;  %s3940_s6 = scalar_lea.hbm %s4182_s29, 1024  ;;  %s4184_s3 = int_to_ptr.vmem [resolvable:$true] %s147_s3 }
  0x29   : > { %s4189_s4 = scalar_select %p59_p7, %s4044_s11, %s61_s17  }
  0x2a   : > { %p3941_p12 = scmp.ne.s32.totalorder %s4182_s29, %s3940_s6  ;;  %p3942_p2 = pneg %p4155_p0 }
  0x2b   : > { %s3945_s26 = scalar_lea.hbm %s6840_s1, 2048  ;;  %p3946_p10 = scmp.lt.u32.totalorder %s4182_s29, %s6840_s1 }
  0x2c   : > { %p3943_p4 = pnand %p3942_p2, %p3941_p12  ;;  %p3947_p11 = scmp.lt.u32.totalorder %s3945_s26, %s3940_s6 }
  0x2d   : > { %p3949_p1 = scmp.lt.u32.totalorder %s3940_s6, %s4182_s29 }
  0x2e   : > { %p3944_p6 = pneg %p3943_p4  ;;  %p3948_p5 = por %p3947_p11, %p3946_p10 }
  0x30   : > { %p3950_p7 = por %p3949_p1, %p3948_p5 }
  0x32   : > { %p3951_p9 = pnand %p3950_p7, %p3944_p6 }
  0x34   : > { %3954 = shalt.err (!%p3951_p9)
}
  0x35   : > { %s3955_s17 = scalar_lea.vmem %s4184_s3, 1024  ;;  %s4059_s23 = smov [#allocation7]  }
  0x36   : > { %p3956_p12 = scmp.ne.s32.totalorder %s4184_s3, %s3955_s17  ;;  %s3960_s27 = sshll.u32 %s4059_s23, 4  ;;  %s3961_s27 = int_to_ptr.vmem [resolvable:$false] %s3960_s27 }
  0x37   : > { %s3962_s28 = scalar_lea.vmem %s3961_s27, 2048  ;;  %p3963_p3 = scmp.lt.s32.totalorder %s4184_s3, %s3961_s27 }
  0x38   : > { %p3958_p4 = pnand %p3956_p12, %p3942_p2  ;;  %p3964_p10 = scmp.lt.s32.totalorder %s3962_s28, %s3955_s17 }
  0x3a   : > { %p3959_p8 = pneg %p3958_p4  ;;  %p3965_p11 = por %p3964_p10, %p3963_p3 }
  0x3c   : > { %p3966_p5 = pnand %p3965_p11, %p3959_p8 }
  0x3e   : > { %3969 = shalt.err (!%p3966_p5)
}
  0x3f   : > { %s4060_s30 = smov 128   ;;  %s4061_s6 = smov 8  }
  0x40   : > { %3839 = dma.hbm_to_vmem [thread:$0]  (!%p4155_p0), %s4182_s29, 1024, %s4184_s3, %s4191_s5, %s4060_s30, %s4060_s30, %s4061_s6  }
  0x41   : > { %159 = sbr.rel (%p4147_p13) target bundleno = 1018 (0x3fa), region = 28 }
  0x48   : > { %p6999_p9 = scmp.ne.s32.totalorder %s6993_s18, 0 }
  0x4a   : > { %4023 = dma.done.wait (%p6999_p9), [#allocation6], 16  }
  0x4b   : > { %4025 = vsyncadd (%p6999_p9), [#allocation6], 4294967280  ;;  %s4226_s7 = sand.u32 1, %s4040_s10   ;;  %p7000_p3 = scmp.ne.s32.totalorder %s6994_s19, 0 }
  0x4c   : > { %s3712_s8 = sshll.u32 %s4226_s7, 6  ;;  %s166_s26 = scalar_lea.sflag [#allocation4], %s4226_s7 }
  0x4d   : > { %s4230_s15 = scalar_lea.vmem [#allocation7], %s3712_s8 }
  0x4e   : > { %4027 = dma.done.wait (%p7000_p3), %s166_s26, 1024  }
  0x4f   : > { %4029 = vsyncadd (%p7000_p3), %s166_s26, 4294966272 }
  0x50   : > { %174 = sfence }
  0x51   : > { %vm225_vm0 = vcmask 1047680   ;;  %s4236_s18 = sld [smem:[#allocation3 + $0x1]]  ;;  %v4062_v0 = vmov 0.0   ;;  %v192_v1 = vld [vmem:[%s4230_s15] sm:$0xff]  ;;  %v193_v2 = vld [vmem:[%s4230_s15 + $0x8] sm:$0xff]  ;;  %v3714_v3 = vld [vmem:[%s4230_s15 + $0x10] sm:$0xff] }
  0x52   : > { %219 = vst [vmem:[#allocation2] sm:$0xff] %v4062_v0  ;;  %226 = vst.msk [vmem:[#allocation2 + $0x18] sm:$0xff] %vm225_vm0, %v4062_v0  ;;  %s4241_s19 = sld [smem:[#allocation3 + $0x8]]  ;;  %v3715_v4 = vld [vmem:[%s4230_s15 + $0x18] sm:$0xff]  ;;  %v197_v5 = vadd.f32 %v3714_v3, %v192_v1  ;;  %v199_v6 = vmax.f32 %v192_v1, %v3714_v3  ;;  %v3716_v7 = vld [vmem:[%s4230_s15 + $0x20] sm:$0xff]  ;;  %vm237_vm1 = vcmask 130048  }
  0x53   : > { %227 = vst.msk [vmem:[#allocation2 + $0x28] sm:$0xff] %vm225_vm0, %v4062_v0  ;;  %235 = vst.msk [vmem:[#allocation2 + $0x58] sm:$0xff] %vm225_vm0, %v4062_v0  ;;  %v3717_v8 = vld [vmem:[%s4230_s15 + $0x28] sm:$0xff]  ;;  %v198_v9 = vadd.f32 %v3715_v4, %v193_v2  ;;  %v200_v10 = vmax.f32 %v193_v2, %v3715_v4  ;;  %v3718_v11 = vld [vmem:[%s4230_s15 + $0x30] sm:$0xff]  ;;  %s4063_s22 = smov 127   ;;  %s3728_s24 = sld [smem:[#allocation3 + $0xf]] }
  0x54   : > { %236 = vst.msk [vmem:[#allocation2 + $0x68] sm:$0xff] %vm225_vm0, %v4062_v0  ;;  %220 = vst [vmem:[#allocation2 + $0x8] sm:$0xff] %v4062_v0  ;;  %v204_v12 = vadd.f32 %v3716_v7, %v197_v5  ;;  %v206_v13 = vmax.f32 %v199_v6, %v3716_v7  ;;  %v3719_v14 = vld [vmem:[%s4230_s15 + $0x38] sm:$0xff]  ;;  %vm278_vm2 = vcmask 1046528   ;;  %s3729_s29 = sld [smem:[#allocation3 + $0x16]]  ;;  %vm315_vm3 = vcmask 1045504  }
  0x55   : > { %221 = vst [vmem:[#allocation2 + $0x30] sm:$0xff] %v4062_v0  ;;  %222 = vst [vmem:[#allocation2 + $0x38] sm:$0xff] %v4062_v0  ;;  %v205_v15 = vadd.f32 %v3717_v8, %v198_v9  ;;  %v207_v16 = vmax.f32 %v200_v10, %v3717_v8  ;;  %s3730_s3 = sld [smem:[#allocation3 + $0x1d]]  ;;  %vm348_vm4 = vcmask 1044480   ;;  %s3731_s5 = sld [smem:[#allocation3 + $0x24]]  ;;  %vm381_vm5 = vcmask 1043456  }
  0x56   : > { %229 = vst [vmem:[#allocation2 + $0x40] sm:$0xff] %v4062_v0  ;;  %230 = vst [vmem:[#allocation2 + $0x48] sm:$0xff] %v4062_v0  ;;  %v211_v18 = vadd.f32 %v3718_v11, %v204_v12  ;;  %v213_v19 = vmax.f32 %v206_v13, %v3718_v11  ;;  %s3732_s16 = sld [smem:[#allocation3 + $0x2b]]  ;;  %vm418_vm6 = vcmask 1042432   ;;  %s3733_s17 = sld [smem:[#allocation3 + $0x2]]  ;;  %vm455_vm7 = vcmask 1041408  }
  0x57   : > { %231 = vst [vmem:[#allocation2 + $0x70] sm:$0xff] %v4062_v0  ;;  %232 = vst [vmem:[#allocation2 + $0x78] sm:$0xff] %v4062_v0  ;;  %v479_v17 = vstv %s4236_s18  ;;  %v212_v20 = vadd.f32 %v3719_v14, %v205_v15  ;;  %v214_v21 = vmax.f32 %v207_v16, %v3719_v14  ;;  %s3734_s23 = sld [smem:[#allocation3 + $0x9]]  ;;  %s4064_s27 = smov 126   ;;  %vm504_vm8 = vcmask 1039360  }
  0x58   : > { %v482_v22 = vmul.f32 0.0, %v479_v17  ;;  %238 = vst.msk [vmem:[#allocation2 + $0x18] sm:$0xff] %vm237_vm1, %v211_v18  ;;  %240 = vst.msk [vmem:[#allocation2 + $0x58] sm:$0xff] %vm237_vm1, %v213_v19  ;;  %v521_v26 = vstv %s4241_s19  ;;  %s3735_s28 = sld [smem:[#allocation3 + $0x10]]  ;;  %s3736_s30 = sld [smem:[#allocation3 + $0x17]]  ;;  %vm844_vm9 = vcmask 1031168  }
  0x59   : > { %v4249_v23 = vld [vmem:[#allocation2] sm:$0xe0]  ;;  %239 = vst.msk [vmem:[#allocation2 + $0x28] sm:$0xff] %vm237_vm1, %v212_v20  ;;  %241 = vst.msk [vmem:[#allocation2 + $0x68] sm:$0xff] %vm237_vm1, %v214_v21  ;;  %v524_v29 = vmul.f32 0.0, %v521_v26  ;;  %v572_v40 = vstv %s3728_s24  ;;  %s3737_s6 = sld [smem:[#allocation3 + $0x1e]] }
  0x5a   : > { %v480_v25 = vmul.f32 %v479_v17, %v4249_v23  ;;  %496 = vrot.lane.b32.xlu1 %v482_v22, %s4063_s22  ;;  %v522_v28 = vmul.f32 %v521_v26, %v4249_v23  ;;  %v573_v44 = vmul.f32 %v572_v40, %v4249_v23  ;;  %v575_v45 = vmul.f32 0.0, %v572_v40  ;;  %s3738_s8 = sld [smem:[#allocation3 + $0x25]]  ;;  %s3739_s26 = sld [smem:[#allocation3 + $0x2c]] }
  0x5b   : > { %v4253_v24 = vld [vmem:[#allocation2 + $0x8] sm:$0xe0]  ;;  %v535_v34 = vrot.slane %v524_v29, 1  ;;  %v623_v58 = vstv %s3729_s29  ;;  %v666_v2 = vstv %s3730_s3  ;;  %v717_v15 = vstv %s3731_s5  ;;  %s3740_s15 = sld [smem:[#allocation3 + $0x3]]  ;;  %s3741_s18 = sld [smem:[#allocation3 + $0xa]] }
  0x5c   : > { %492 = vrot.lane.b32.xlu0 %v480_v25, %s4063_s22  ;;  %v481_v27 = vmul.f32 %v479_v17, %v4253_v24  ;;  %v534_v33 = vrot.slane %v522_v28, 1  ;;  %v523_v37 = vmul.f32 %v521_v26, %v4253_v24  ;;  %v574_v47 = vmul.f32 %v572_v40, %v4253_v24  ;;  %v4304_v5 = vld [vmem:[#allocation2 + $0x30] sm:$0x7]  ;;  %v4311_v10 = vld [vmem:[#allocation2 + $0x38] sm:$0x7]  ;;  %s3742_s19 = sld [smem:[#allocation3 + $0x11]] }
  0x5d   : > { %v585_v49 = vrot.slane %v573_v44, 2  ;;  %v586_v50 = vrot.slane %v575_v45, 2  ;;  %v624_v60 = vmul.f32 0.0, %v623_v58  ;;  %v667_v4 = vmul.f32 0.0, %v666_v2  ;;  %s3743_s24 = sld [smem:[#allocation3 + $0x18]]  ;;  %s4065_s29 = smov 125  }
  0x5e   : > { %v536_v39 = vsel %vm278_vm2, %v534_v33, %v535_v34  ;;  %v537_v42 = vrot.slane %v523_v37, 1  ;;  %v588_v52 = vrot.slane %v574_v47, 2  ;;  %v671_v9 = vmul.f32 %v666_v2, %v4304_v5  ;;  %s3744_s3 = sld [smem:[#allocation3 + $0x1f]]  ;;  %s3745_s5 = sld [smem:[#allocation3 + $0x26]] }
  0x5f   : > { %v4263_v30 = vld [vmem:[#allocation2 + $0x18] sm:$0xff]  ;;  %v587_v55 = vsel %vm315_vm3, %v585_v49, %v586_v50  ;;  %v632_v62 = vrot.slane %v624_v60, 3  ;;  %v679_v7 = vrot.slane %v667_v4, 4  ;;  %v672_v13 = vmul.f32 %v666_v2, %v4311_v10  ;;  %p7454_p13 = scmp.ne.s32.totalorder %s6995_s20, 0 }
  0x60   : > { %494 = vrot.lane.b32.xlu0 %v481_v27, %s4063_s22  ;;  %v4266_v31 = vld [vmem:[#allocation2 + $0x28] sm:$0xff]  ;;  %v483_v32 = vmul.f32 %v479_v17, %v4263_v30  ;;  %v525_v38 = vmul.f32 %v521_v26, %v4263_v30  ;;  %v576_v48 = vmul.f32 %v572_v40, %v4263_v30  ;;  %v625_v61 = vmul.f32 %v623_v58, %v4263_v30 }
  0x61   : > { %v485_v35 = vmul.f32 %v479_v17, %v4266_v31  ;;  %v527_v36 = vmul.f32 %v521_v26, %v4266_v31  ;;  %v578_v54 = vmul.f32 %v572_v40, %v4266_v31  ;;  %v627_v63 = vmul.f32 %v623_v58, %v4266_v31 }
  0x62   : > { %498 = vrot.lane.b32.xlu1 %v483_v32, %s4063_s22  ;;  %v538_v43 = vrot.slane %v525_v38, 1  ;;  %v589_v53 = vrot.slane %v576_v48, 2  ;;  %v633_v0 = vrot.slane %v625_v61, 3  ;;  %v668_v6 = vmul.f32 %v666_v2, %v4263_v30 }
  0x63   : > { %v542_v41 = vrot.slane %v527_v36, 1  ;;  %v593_v57 = vrot.slane %v578_v54, 2  ;;  %v636_v1 = vrot.slane %v627_v63, 3  ;;  %v670_v8 = vmul.f32 %v666_v2, %v4266_v31 }
  0x64   : > { %500 = vrot.lane.b32.xlu0 %v482_v22, %s4063_s22  ;;  %v539_v46 = vsel %vm278_vm2, %v537_v42, %v538_v43  ;;  %v590_v56 = vsel %vm315_vm3, %v588_v52, %v589_v53  ;;  %v680_v11 = vrot.slane %v668_v6, 4  ;;  %v685_v14 = vrot.slane %v671_v9, 4 }
  0x65   : > { %v543_v51 = vsel %vm278_vm2, %v538_v43, %v542_v41  ;;  %v594_v59 = vsel %vm315_vm3, %v589_v53, %v593_v57  ;;  %v637_v3 = vsel %vm348_vm4, %v633_v0, %v636_v1  ;;  %v683_v12 = vrot.slane %v670_v8, 4 }
  0x66   : > { %502 = vrot.lane.b32.xlu1 %v485_v35, %s4063_s22  ;;  %v687_v17 = vrot.slane %v672_v13, 4  ;;  %v718_v18 = vmul.f32 0.0, %v717_v15  ;;  %v686_v19 = vsel %vm381_vm5, %v679_v7, %v685_v14  ;;  %v719_v20 = vmul.f32 %v717_v15, %v4263_v30 }
  0x67   : > { %v684_v16 = vsel %vm381_vm5, %v680_v11, %v683_v12  ;;  %v721_v25 = vmul.f32 %v717_v15, %v4266_v31  ;;  %v722_v26 = vmul.f32 %v717_v15, %v4304_v5  ;;  %v723_v29 = vmul.f32 %v717_v15, %v4311_v10 }
  0x68   : > { %544 = vrot.lane.b32.xlu0 %v536_v39, %s4063_s22  ;;  %v688_v21 = vsel %vm381_vm5, %v683_v12, %v687_v17  ;;  %v730_v22 = vrot.slane %v718_v18, 5  ;;  %v731_v27 = vrot.slane %v719_v20, 5  ;;  %v768_v33 = vstv %s3732_s16  ;;  %s3746_s16 = sld [smem:[#allocation3 + $0x2d]] }
  0x69   : > { %v734_v28 = vrot.slane %v721_v25, 5  ;;  %v736_v32 = vrot.slane %v722_v26, 5  ;;  %v738_v35 = vrot.slane %v723_v29, 5  ;;  %v769_v36 = vmul.f32 0.0, %v768_v33 }
  0x6a   : > { %554 = vrot.lane.b32.xlu1 %v542_v41, %s4063_s22  ;;  %v770_v38 = vmul.f32 %v768_v33, %v4263_v30  ;;  %v772_v41 = vmul.f32 %v768_v33, %v4266_v31  ;;  %v773_v42 = vmul.f32 %v768_v33, %v4304_v5  ;;  %v774_v45 = vmul.f32 %v768_v33, %v4311_v10 }
  0x6b   : > { %v737_v37 = vsel %vm418_vm6, %v730_v22, %v736_v32  ;;  %v739_v39 = vsel %vm418_vm6, %v734_v28, %v738_v35  ;;  %v781_v40 = vrot.slane %v769_v36, 6  ;;  %v861_v53 = vstv %s3734_s23  ;;  %s3747_s23 = sld [smem:[#allocation3 + $0x4]] }
  0x6c   : > { %548 = vrot.lane.b32.xlu0 %v535_v34, %s4063_s22  ;;  %v782_v43 = vrot.slane %v770_v38, 6  ;;  %v785_v44 = vrot.slane %v772_v41, 6  ;;  %v789_v48 = vrot.slane %v774_v45, 6  ;;  %v865_v60 = vmul.f32 %v861_v53, %v4263_v30 }
  0x6d   : > { %v867_v2 = vmul.f32 %v861_v53, %v4266_v31  ;;  %v912_v4 = vstv %s3735_s28  ;;  %s3749_s28 = sld [smem:[#allocation3 + $0x12]]  ;;  %vm3580_vm10 = vcmask 23552   ;;  %vm3587_vm11 = vcmask 130053  }
  0x6e   : > { %546 = vrot.lane.b32.xlu1 %v539_v46, %s4063_s22  ;;  %v787_v46 = vrot.slane %v773_v42, 6  ;;  %v786_v47 = vsel %vm455_vm7, %v782_v43, %v785_v44  ;;  %v913_v8 = vmul.f32 %v912_v4, %v4249_v23  ;;  %v915_v9 = vmul.f32 0.0, %v912_v4 }
  0x6f   : > { %v914_v12 = vmul.f32 %v912_v4, %v4253_v24  ;;  %v916_v13 = vmul.f32 %v912_v4, %v4263_v30  ;;  %v918_v17 = vmul.f32 %v912_v4, %v4266_v31  ;;  %vm3590_vm12 = vcmask 126976  }
  0x70   : > { %552 = vrot.lane.b32.xlu0 %v535_v34, %s4063_s22  ;;  %v735_v34 = vsel %vm418_vm6, %v731_v27, %v734_v28  ;;  %v788_v49 = vsel %vm455_vm7, %v781_v40, %v787_v46  ;;  %v925_v14 = vrot.slane %v913_v8, 2  ;;  %v926_v15 = vrot.slane %v915_v9, 2 }
  0x71   : > { %v933_v20 = vrot.slane %v918_v17, 2 }
  0x72   : > { %550 = vrot.lane.b32.xlu1 %v543_v51, %s4063_s22  ;;  %v790_v51 = vsel %vm455_vm7, %v785_v44, %v789_v48  ;;  %v927_v18 = vsel %vm315_vm3, %v925_v14, %v926_v15 }
  0x74   : > { %595 = vrot.lane.b32.xlu0 %v587_v55, %s4063_s22 }
  0x76   : > { %597 = vrot.lane.b32.xlu1 %v590_v56, %s4063_s22  ;;  %v862_v56 = vmul.f32 %v861_v53, %v4249_v23 }
  0x78   : > { %599 = vrot.lane.b32.xlu0 %v586_v50, %s4063_s22  ;;  %v874_v61 = vrot.slane %v862_v56, 1 }
  0x7a   : > { %601 = vrot.lane.b32.xlu1 %v594_v59, %s4063_s22  ;;  %v863_v59 = vmul.f32 %v861_v53, %v4253_v24 }
  0x7c   : > { %603 = vrot.lane.b32.xlu0 %v586_v50, %s4063_s22  ;;  %v819_v50 = vstv %s3733_s17  ;;  %s3748_s17 = sld [smem:[#allocation3 + $0xb]] }
  0x7d   : > { %v820_v52 = vmul.f32 %v819_v50, %v4249_v23  ;;  %v821_v54 = vmul.f32 %v819_v50, %v4253_v24  ;;  %v822_v55 = vmul.f32 0.0, %v819_v50  ;;  %v823_v58 = vmul.f32 %v819_v50, %v4263_v30 }
  0x7e   : > { %605 = vrot.lane.b32.xlu1 %v593_v57, %s4063_s22  ;;  %v864_v57 = vmul.f32 0.0, %v861_v53  ;;  %v825_v63 = vmul.f32 %v819_v50, %v4266_v31  ;;  %v929_v23 = vrot.slane %v916_v13, 2 }
  0x80   : > { %638 = vrot.lane.b32.xlu0 %v632_v62, %s4063_s22 }
  0x82   : > { %640 = vrot.lane.b32.xlu1 %v633_v0, %s4063_s22  ;;  %v877_v0 = vrot.slane %v863_v59, 1 }
  0x84   : > { %642 = vrot.lane.b32.xlu0 %v632_v62, %s4063_s22 }
  0x86   : > { %644 = vrot.lane.b32.xlu1 %v637_v3, %s4063_s22 }
  0x88   : > { %646 = vrot.lane.b32.xlu0 %v632_v62, %s4063_s22  ;;  %v875_v62 = vrot.slane %v864_v57, 1 }
  0x8a   : > { %648 = vrot.lane.b32.xlu1 %v636_v1, %s4063_s22  ;;  %v878_v1 = vrot.slane %v865_v60, 1  ;;  %v876_v3 = vsel %vm278_vm2, %v874_v61, %v875_v62 }
  0x8c   : > { %689 = vrot.lane.b32.xlu0 %v679_v7, %s4063_s22  ;;  %v879_v6 = vsel %vm278_vm2, %v877_v0, %v878_v1 }
  0x8e   : > { %691 = vrot.lane.b32.xlu1 %v680_v11, %s4063_s22 }
  0x90   : > { %693 = vrot.lane.b32.xlu0 %v679_v7, %s4063_s22  ;;  %v882_v7 = vrot.slane %v867_v2, 1 }
  0x92   : > { %695 = vrot.lane.b32.xlu1 %v684_v16, %s4063_s22  ;;  %v883_v11 = vsel %vm278_vm2, %v878_v1, %v882_v7  ;;  %v928_v16 = vrot.slane %v914_v12, 2  ;;  %v1108_v12 = vstv %s3739_s26  ;;  %s3752_s26 = sld [smem:[#allocation3 + $0x27]] }
  0x94   : > { %697 = vrot.lane.b32.xlu0 %v686_v19, %s4063_s22  ;;  %v930_v19 = vsel %vm315_vm3, %v928_v16, %v929_v23  ;;  %v1109_v16 = vmul.f32 0.0, %v1108_v12 }
  0x96   : > { %699 = vrot.lane.b32.xlu1 %v688_v21, %s4063_s22  ;;  %v963_v21 = vstv %s3736_s30  ;;  %s3750_s30 = sld [smem:[#allocation3 + $0x19]] }
  0x97   : > { %v964_v25 = vmul.f32 0.0, %v963_v21  ;;  %v965_v28 = vmul.f32 %v963_v21, %v4263_v30  ;;  %v967_v32 = vmul.f32 %v963_v21, %v4266_v31  ;;  %v1121_v21 = vrot.slane %v1109_v16, 6 }
  0x98   : > { %740 = vrot.lane.b32.xlu0 %v730_v22, %s4063_s22 }
  0x99   : > { %v972_v29 = vrot.slane %v964_v25, 3  ;;  %v976_v35 = vrot.slane %v967_v32, 3 }
  0x9a   : > { %742 = vrot.lane.b32.xlu1 %v731_v27, %s4063_s22 }
  0x9c   : > { %744 = vrot.lane.b32.xlu0 %v730_v22, %s4063_s22  ;;  %v934_v22 = vsel %vm315_vm3, %v929_v23, %v933_v20 }
  0x9e   : > { %746 = vrot.lane.b32.xlu1 %v735_v34, %s4063_s22  ;;  %v973_v34 = vrot.slane %v965_v28, 3  ;;  %v1113_v28 = vmul.f32 %v1108_v12, %v4304_v5 }
  0xa0   : > { %748 = vrot.lane.b32.xlu0 %v737_v37, %s4063_s22  ;;  %v1006_v37 = vstv %s3737_s6  ;;  %s4066_s6 = smov 124  }
  0xa1   : > { %v1010_v45 = vmul.f32 %v1006_v37, %v4266_v31 }
  0xa2   : > { %750 = vrot.lane.b32.xlu1 %v739_v39, %s4063_s22  ;;  %v977_v39 = vsel %vm348_vm4, %v973_v34, %v976_v35 }
  0xa3   : > { %v1023_v50 = vrot.slane %v1010_v45, 4 }
  0xa4   : > { %791 = vrot.lane.b32.xlu0 %v781_v40, %s4063_s22 }
  0xa6   : > { %793 = vrot.lane.b32.xlu1 %v782_v43, %s4063_s22  ;;  %v1008_v43 = vmul.f32 %v1006_v37, %v4263_v30 }
  0xa8   : > { %795 = vrot.lane.b32.xlu0 %v781_v40, %s4063_s22  ;;  %v1007_v40 = vmul.f32 0.0, %v1006_v37 }
  0xaa   : > { %797 = vrot.lane.b32.xlu1 %v786_v47, %s4063_s22  ;;  %v1019_v44 = vrot.slane %v1007_v40, 4  ;;  %v1011_v47 = vmul.f32 %v1006_v37, %v4304_v5 }
  0xac   : > { %799 = vrot.lane.b32.xlu0 %v788_v49, %s4063_s22  ;;  %v1020_v49 = vrot.slane %v1008_v43, 4  ;;  %v1025_v53 = vrot.slane %v1011_v47, 4  ;;  %v1159_v47 = vstv %s3740_s15  ;;  %s3753_s15 = sld [smem:[#allocation3 + $0x2e]] }
  0xae   : > { %801 = vrot.lane.b32.xlu1 %v790_v51, %s4063_s22  ;;  %v1012_v51 = vmul.f32 %v1006_v37, %v4311_v10  ;;  %v1024_v56 = vsel %vm381_vm5, %v1020_v49, %v1023_v50  ;;  %v1026_v60 = vsel %vm381_vm5, %v1019_v44, %v1025_v53  ;;  %v1160_v53 = vmul.f32 %v1159_v47, %v4253_v24 }
  0xb0   : > { %832 = vrot.lane.b32.xlu0 %v820_v52, %s4064_s27  ;;  %v1027_v57 = vrot.slane %v1012_v51, 4 }
  0xb2   : > { %834 = vrot.lane.b32.xlu1 %v821_v54, %s4064_s27  ;;  %v1057_v54 = vstv %s3738_s8  ;;  %s3751_s8 = sld [smem:[#allocation3 + $0x20]] }
  0xb3   : > { %v1061_v1 = vmul.f32 %v1057_v54, %v4266_v31  ;;  %v1063_v8 = vmul.f32 %v1057_v54, %v4311_v10 }
  0xb4   : > { %836 = vrot.lane.b32.xlu0 %v822_v55, %s4064_s27 }
  0xb6   : > { %838 = vrot.lane.b32.xlu1 %v823_v58, %s4064_s27  ;;  %v1058_v58 = vmul.f32 0.0, %v1057_v54 }
  0xb8   : > { %840 = vrot.lane.b32.xlu0 %v822_v55, %s4064_s27  ;;  %v1070_v0 = vrot.slane %v1058_v58, 5 }
  0xba   : > { %842 = vrot.lane.b32.xlu1 %v825_v63, %s4064_s27  ;;  %v1028_v63 = vsel %vm381_vm5, %v1023_v50, %v1027_v57 }
  0xbc   : > { %884 = vrot.lane.b32.xlu0 %v876_v3, %s4064_s27  ;;  %v1062_v3 = vmul.f32 %v1057_v54, %v4304_v5 }
  0xbe   : > { %886 = vrot.lane.b32.xlu1 %v879_v6, %s4064_s27 }
  0xc0   : > { %888 = vrot.lane.b32.xlu0 %v875_v62, %s4064_s27 }
  0xc2   : > { %890 = vrot.lane.b32.xlu1 %v883_v11, %s4064_s27  ;;  %v1076_v11 = vrot.slane %v1062_v3, 5 }
  0xc4   : > { %892 = vrot.lane.b32.xlu0 %v875_v62, %s4064_s27  ;;  %v1059_v62 = vmul.f32 %v1057_v54, %v4263_v30  ;;  %v1077_v17 = vsel %vm418_vm6, %v1070_v0, %v1076_v11 }
  0xc6   : > { %894 = vrot.lane.b32.xlu1 %v882_v7, %s4064_s27  ;;  %v1071_v6 = vrot.slane %v1059_v62, 5  ;;  %v1074_v7 = vrot.slane %v1061_v1, 5  ;;  %v1210_v62 = vstv %s3742_s19  ;;  %s3755_s19 = sld [smem:[#allocation3 + $0xc]] }
  0xc7   : > { %v1212_v11 = vmul.f32 %v1210_v62, %v4263_v30 }
  0xc8   : > { %935 = vrot.lane.b32.xlu0 %v927_v18, %s4064_s27  ;;  %v1075_v14 = vsel %vm418_vm6, %v1071_v6, %v1074_v7 }
  0xca   : > { %937 = vrot.lane.b32.xlu1 %v930_v19, %s4064_s27  ;;  %v1110_v19 = vmul.f32 %v1108_v12, %v4263_v30 }
  0xcc   : > { %939 = vrot.lane.b32.xlu0 %v926_v15, %s4064_s27  ;;  %v4386_v27 = vpop.permute.xlu1 %496  ;;  %v1122_v32 = vrot.slane %v1110_v19, 6 }
  0xce   : > { %v4383_v26 = vpop.permute.xlu0 %492  ;;  %941 = vrot.lane.b32.xlu1 %v934_v22, %s4064_s27  ;;  %v1112_v22 = vmul.f32 %v1108_v12, %v4266_v31 }
  0xd0   : > { %943 = vrot.lane.b32.xlu0 %v926_v15, %s4064_s27  ;;  %v1078_v15 = vrot.slane %v1063_v8, 5  ;;  %v1211_v8 = vmul.f32 %v1210_v62, %v4253_v24 }
  0xd2   : > { %v4391_v33 = vpop.permute.xlu0 %494  ;;  %945 = vrot.lane.b32.xlu1 %v933_v20, %s4064_s27  ;;  %v1079_v20 = vsel %vm418_vm6, %v1074_v7, %v1078_v15  ;;  %v1213_v15 = vmul.f32 %v1210_v62, %v4266_v31  ;;  %v1217_v19 = vrot.slane %v1211_v8, 2 }
  0xd4   : > { %978 = vrot.lane.b32.xlu0 %v972_v29, %s4064_s27  ;;  %v4395_v36 = vpop.permute.xlu1 %498 }
  0xd6   : > { %v4397_v38 = vpop.permute.xlu0 %500  ;;  %980 = vrot.lane.b32.xlu1 %v973_v34, %s4064_s27  ;;  %v1125_v34 = vrot.slane %v1112_v22, 6  ;;  %v1238_v22 = vstv %s3743_s24  ;;  %s3756_s24 = sld [smem:[#allocation3 + $0x13]] }
  0xd8   : > { %982 = vrot.lane.b32.xlu0 %v972_v29, %s4064_s27  ;;  %v4402_v41 = vpop.permute.xlu1 %502  ;;  %v1126_v5 = vsel %vm455_vm7, %v1122_v32, %v1125_v34 }
  0xda   : > { %v4404_v42 = vpop.permute.xlu0 %544  ;;  %984 = vrot.lane.b32.xlu1 %v977_v39, %s4064_s27  ;;  %v1127_v39 = vrot.slane %v1113_v28, 6  ;;  %v1220_v28 = vrot.slane %v1213_v15, 2 }
  0xdc   : > { %986 = vrot.lane.b32.xlu0 %v972_v29, %s4064_s27  ;;  %v4410_v46 = vpop.permute.xlu1 %554  ;;  %v1128_v45 = vsel %vm455_vm7, %v1121_v21, %v1127_v39  ;;  %v1240_v39 = vmul.f32 %v1238_v22, %v4266_v31 }
  0xde   : > { %v4413_v48 = vpop.permute.xlu0 %548  ;;  %988 = vrot.lane.b32.xlu1 %v976_v35, %s4064_s27  ;;  %v1114_v35 = vmul.f32 %v1108_v12, %v4311_v10 }
  0xe0   : > { %1029 = vrot.lane.b32.xlu0 %v1019_v44, %s4064_s27  ;;  %v4418_v52 = vpop.permute.xlu1 %546  ;;  %v1129_v43 = vrot.slane %v1114_v35, 6  ;;  %v1239_v35 = vmul.f32 %v1238_v22, %v4263_v30 }
  0xe2   : > { %v4420_v55 = vpop.permute.xlu0 %552  ;;  %1031 = vrot.lane.b32.xlu1 %v1020_v49, %s4064_s27  ;;  %v1182_v49 = vstv %s3741_s18  ;;  %v1130_v51 = vsel %vm455_vm7, %v1125_v34, %v1129_v43  ;;  %s3754_s18 = sld [smem:[#allocation3 + $0x5]] }
  0xe3   : > { %v1183_v54 = vmul.f32 %v1182_v49, %v4253_v24  ;;  %v1185_v58 = vmul.f32 %v1182_v49, %v4266_v31 }
  0xe4   : > { %1033 = vrot.lane.b32.xlu0 %v1019_v44, %s4064_s27  ;;  %v4425_v59 = vpop.permute.xlu1 %550 }
  0xe5   : > { %v1189_v1 = vrot.slane %v1183_v54, 1  ;;  %v1192_v7 = vrot.slane %v1185_v58, 1 }
  0xe6   : > { %v4428_v61 = vpop.permute.xlu0 %595  ;;  %1035 = vrot.lane.b32.xlu1 %v1024_v56, %s4064_s27  ;;  %v1184_v56 = vmul.f32 %v1182_v49, %v4263_v30  ;;  %v1244_v49 = vrot.slane %v1240_v39, 3  ;;  %v1318_v39 = vstv %s3746_s16  ;;  %s3758_s16 = sld [smem:[#allocation3 + $0x21]] }
  0xe8   : > { %1037 = vrot.lane.b32.xlu0 %v1026_v60, %s4064_s27  ;;  %v4435_v2 = vpop.permute.xlu1 %597  ;;  %v1190_v3 = vrot.slane %v1184_v56, 1 }
  0xea   : > { %v4438_v4 = vpop.permute.xlu0 %599  ;;  %1039 = vrot.lane.b32.xlu1 %v1028_v63, %s4064_s27  ;;  %v1161_v63 = vmul.f32 %v1159_v47, %v4263_v30 }
  0xeb   : > { %7001 = vst [vmem:[#allocation12_spill] sm:$0xff] %v4438_v4 }
  0xec   : > { %1080 = vrot.lane.b32.xlu0 %v1070_v0, %s4064_s27  ;;  %v4443_v9 = vpop.permute.xlu1 %601 }
  0xed   : > { %7002 = vst [vmem:[#allocation13_spill] sm:$0xff] %v4443_v9 }
  0xee   : > { %v4445_v13 = vpop.permute.xlu0 %603  ;;  %1082 = vrot.lane.b32.xlu1 %v1071_v6, %s4064_s27 }
  0xef   : > { %7003 = vst [vmem:[#allocation14_spill] sm:$0xff] %v4445_v13 }
  0xf0   : > { %1084 = vrot.lane.b32.xlu0 %v1070_v0, %s4064_s27  ;;  %v4450_v23 = vpop.permute.xlu1 %605  ;;  %v1162_v0 = vmul.f32 %v1159_v47, %v4266_v31  ;;  %v1243_v47 = vrot.slane %v1239_v35, 3 }
  0xf1   : > { %7004 = vst [vmem:[#allocation15_spill] sm:$0xff] %v4450_v23 }
  0xf2   : > { %v4453_v18 = vpop.permute.xlu0 %638  ;;  %1086 = vrot.lane.b32.xlu1 %v1075_v14, %s4064_s27  ;;  %v1191_v14 = vsel %vm278_vm2, %v1189_v1, %v1190_v3  ;;  %v1245_v62 = vsel %vm348_vm4, %v1243_v47, %v1244_v49  ;;  %v1290_v1 = vstv %s3745_s5  ;;  %s4067_s5 = smov 123  }
  0xf3   : > { %7005 = vst [vmem:[#allocation16_spill] sm:$0xff] %v4453_v18  ;;  %v1292_v15 = vmul.f32 %v1290_v1, %v4266_v31  ;;  %v5047_v18 = vld [vmem:[#allocation2 + $0x78] sm:$0x7] }
  0xf4   : > { %1088 = vrot.lane.b32.xlu0 %v1077_v17, %s4064_s27  ;;  %v4460_v25 = vpop.permute.xlu1 %640  ;;  %v1193_v17 = vsel %vm278_vm2, %v1190_v3, %v1192_v7 }
  0xf5   : > { %7006 = vst [vmem:[#allocation17_spill] sm:$0xff] %v4460_v25  ;;  %v1298_v35 = vrot.slane %v1292_v15, 5 }
  0xf6   : > { %v4463_v29 = vpop.permute.xlu0 %642  ;;  %1090 = vrot.lane.b32.xlu1 %v1079_v20, %s4064_s27  ;;  %v1218_v20 = vrot.slane %v1212_v11, 2 }
  0xf7   : > { %7007 = vst [vmem:[#allocation18_spill] sm:$0xff] %v4463_v29 }
  0xf8   : > { %1131 = vrot.lane.b32.xlu0 %v1121_v21, %s4064_s27  ;;  %v4468_v37 = vpop.permute.xlu1 %644  ;;  %v1219_v34 = vsel %vm315_vm3, %v1217_v19, %v1218_v20  ;;  %v1221_v43 = vsel %vm315_vm3, %v1218_v20, %v1220_v28  ;;  %v1293_v20 = vmul.f32 %v1290_v1, %v4311_v10 }
  0xf9   : > { %7008 = vst [vmem:[#allocation19_spill] sm:$0xff] %v4468_v37 }
  0xfa   : > { %v4470_v40 = vpop.permute.xlu0 %646  ;;  %1133 = vrot.lane.b32.xlu1 %v1122_v32, %s4064_s27 }
  0xfb   : > { %7009 = vst [vmem:[#allocation20_spill] sm:$0xff] %v4470_v40 }
  0xfc   : > { %1135 = vrot.lane.b32.xlu0 %v1121_v21, %s4064_s27  ;;  %v4475_v44 = vpop.permute.xlu1 %648 }
  0xfd   : > { %7010 = vst [vmem:[#allocation21_spill] sm:$0xff] %v4475_v44 }
  0xfe   : > { %v4478_v50 = vpop.permute.xlu0 %689  ;;  %1137 = vrot.lane.b32.xlu1 %v1126_v5, %s4064_s27 }
  0xff   : > { %7011 = vst [vmem:[#allocation22_spill] sm:$0xff] %v4478_v50 }
 0x100   : > { %1139 = vrot.lane.b32.xlu0 %v1128_v45, %s4064_s27  ;;  %v4486_v57 = vpop.permute.xlu1 %691 }
 0x101   : > { %7012 = vst [vmem:[#allocation23_spill] sm:$0xff] %v4486_v57 }
 0x102   : > { %v4489_v60 = vpop.permute.xlu0 %693  ;;  %1141 = vrot.lane.b32.xlu1 %v1130_v51, %s4064_s27  ;;  %v1262_v51 = vstv %s3744_s3  ;;  %s3757_s3 = sld [smem:[#allocation3 + $0x1a]] }
 0x103   : > { %7013 = vst [vmem:[#allocation24_spill] sm:$0xff] %v4489_v60  ;;  %v1263_v54 = vmul.f32 %v1262_v51, %v4263_v30  ;;  %v1264_v56 = vmul.f32 %v1262_v51, %v4266_v31 }
 0x104   : > { %1166 = vrot.lane.b32.xlu0 %v1160_v53, %s4065_s29  ;;  %v4495_v6 = vpop.permute.xlu1 %695 }
 0x105   : > { %7014 = vst [vmem:[#allocation25_spill] sm:$0xff] %v4495_v6  ;;  %v1269_v3 = vrot.slane %v1263_v54, 4 }
 0x106   : > { %v4499_v12 = vpop.permute.xlu0 %697  ;;  %1168 = vrot.lane.b32.xlu1 %v1161_v63, %s4065_s29  ;;  %v1265_v63 = vmul.f32 %v1262_v51, %v4311_v10  ;;  %v1320_v51 = vmul.f32 %v1318_v39, %v4266_v31 }
 0x107   : > { %7015 = vst [vmem:[#allocation26_spill] sm:$0xff] %v4499_v12 }
 0x108   : > { %1170 = vrot.lane.b32.xlu0 %v1162_v0, %s4065_s29  ;;  %v4505_v16 = vpop.permute.xlu1 %699  ;;  %v1272_v11 = vrot.slane %v1265_v63, 4 }
 0x109   : > { %7016 = vst [vmem:[#allocation27_spill] sm:$0xff] %v4505_v16 }
 0x10a   : > { %v4508_v21 = vpop.permute.xlu0 %740  ;;  %1194 = vrot.lane.b32.xlu1 %v1191_v14, %s4065_s29  ;;  %v1291_v14 = vmul.f32 %v1290_v1, %v4263_v30 }
 0x10b   : > { %7017 = vst [vmem:[#allocation28_spill] sm:$0xff] %v4508_v21 }
 0x10c   : > { %1196 = vrot.lane.b32.xlu0 %v1193_v17, %s4065_s29  ;;  %v4512_v32 = vpop.permute.xlu1 %742 }
 0x10d   : > { %7018 = vst [vmem:[#allocation29_spill] sm:$0xff] %v4512_v32 }
 0x10e   : > { %v4517_v5 = vpop.permute.xlu0 %744  ;;  %1198 = vrot.lane.b32.xlu1 %v1192_v7, %s4065_s29  ;;  %v1270_v7 = vrot.slane %v1264_v56, 4 }
 0x10f   : > { %7019 = vst [vmem:[#allocation30_spill] sm:$0xff] %v4517_v5 }
 0x110   : > { %1222 = vrot.lane.b32.xlu0 %v1219_v34, %s4065_s29  ;;  %v4522_v45 = vpop.permute.xlu1 %746  ;;  %v1271_v19 = vsel %vm381_vm5, %v1269_v3, %v1270_v7  ;;  %v1297_v34 = vrot.slane %v1291_v14, 5 }
 0x111   : > { %7020 = vst [vmem:[#allocation31_spill] sm:$0xff] %v4522_v45 }
 0x112   : > { %v4524_v53 = vpop.permute.xlu0 %748  ;;  %1224 = vrot.lane.b32.xlu1 %v1221_v43, %s4065_s29  ;;  %v1299_v56 = vsel %vm418_vm6, %v1297_v34, %v1298_v35 }
 0x113   : > { %7021 = vst [vmem:[#allocation32_spill] sm:$0xff] %v4524_v53 }
 0x114   : > { %1226 = vrot.lane.b32.xlu0 %v1220_v28, %s4065_s29  ;;  %v4530_v58 = vpop.permute.xlu1 %750  ;;  %v1273_v28 = vsel %vm381_vm5, %v1270_v7, %v1272_v11  ;;  %v1326_v7 = vrot.slane %v1320_v51, 6 }
 0x115   : > { %7022 = vst [vmem:[#allocation33_spill] sm:$0xff] %v4530_v58 }
 0x116   : > { %v4534_v0 = vpop.permute.xlu0 %791  ;;  %1246 = vrot.lane.b32.xlu1 %v1243_v47, %s4065_s29  ;;  %v1300_v47 = vrot.slane %v1293_v20, 5 }
 0x117   : > { %7023 = vst [vmem:[#allocation34_spill] sm:$0xff] %v4534_v0 }
 0x118   : > { %1248 = vrot.lane.b32.xlu0 %v1245_v62, %s4065_s29  ;;  %v4538_v8 = vpop.permute.xlu1 %793  ;;  %v1321_v62 = vmul.f32 %v1318_v39, %v4311_v10  ;;  %v1301_v1 = vsel %vm418_vm6, %v1298_v35, %v1300_v47 }
 0x119   : > { %7024 = vst [vmem:[#allocation35_spill] sm:$0xff] %v4538_v8 }
 0x11a   : > { %v4542_v17 = vpop.permute.xlu0 %795  ;;  %1250 = vrot.lane.b32.xlu1 %v1244_v49, %s4065_s29  ;;  %v1319_v49 = vmul.f32 %v1318_v39, %v4263_v30  ;;  %v1328_v14 = vrot.slane %v1321_v62, 6 }
 0x11b   : > { %7025 = vst [vmem:[#allocation36_spill] sm:$0xff] %v4542_v17 }
 0x11c   : > { %1274 = vrot.lane.b32.xlu0 %v1269_v3, %s4065_s29  ;;  %v4548_v22 = vpop.permute.xlu1 %797  ;;  %v1325_v3 = vrot.slane %v1319_v49, 6  ;;  %v1329_v35 = vsel %vm455_vm7, %v1326_v7, %v1328_v14  ;;  %v1397_v14 = vstv %s3749_s28  ;;  %s3762_s28 = sld [smem:[#allocation3 + $0xd]] }
 0x11d   : > { %7026 = vst [vmem:[#allocation37_spill] sm:$0xff] %v4548_v22 }
 0x11e   : > { %v4551_v43 = vpop.permute.xlu0 %799  ;;  %1276 = vrot.lane.b32.xlu1 %v1271_v19, %s4065_s29  ;;  %v1369_v19 = vstv %s3748_s17  ;;  %v1327_v20 = vsel %vm455_vm7, %v1325_v3, %v1326_v7  ;;  %s3759_s17 = sld [smem:[#allocation3 + $0x28]] }
 0x11f   : > { %7027 = vst [vmem:[#allocation38_spill] sm:$0xff] %v4551_v43  ;;  %v1370_v39 = vmul.f32 %v1369_v19, %v4253_v24  ;;  %v1371_v47 = vmul.f32 %v1369_v19, %v4263_v30  ;;  %v1372_v62 = vmul.f32 %v1369_v19, %v4266_v31  ;;  %v1399_v19 = vmul.f32 %v1397_v14, %v4263_v30 }
 0x120   : > { %1278 = vrot.lane.b32.xlu0 %v1273_v28, %s4065_s29  ;;  %v4557_v54 = vpop.permute.xlu1 %801  ;;  %v1346_v28 = vstv %s3747_s23  ;;  %s3760_s23 = sld [smem:[#allocation3 + $0x2f]] }
 0x121   : > { %7028 = vst [vmem:[#allocation39_spill] sm:$0xff] %v4557_v54  ;;  %v1347_v51 = vmul.f32 %v1346_v28, %v4253_v24  ;;  %v1377_v7 = vrot.slane %v1371_v47, 1  ;;  %v1400_v47 = vmul.f32 %v1397_v14, %v4266_v31 }
 0x122   : > { %v4561_v63 = vpop.permute.xlu0 %832  ;;  %1302 = vrot.lane.b32.xlu1 %v1297_v34, %s4065_s29 }
 0x123   : > { %7029 = vst [vmem:[#allocation40_spill] sm:$0xff] %v4561_v63  ;;  %v1612_v63 = vstv %s3757_s3  ;;  %s3775_s3 = sld [smem:[#allocation3 + $0x32]] }
 0x124   : > { %1304 = vrot.lane.b32.xlu0 %v1299_v56, %s4065_s29  ;;  %v4566_v11 = vpop.permute.xlu1 %834  ;;  %v1348_v56 = vmul.f32 %v1346_v28, %v4263_v30 }
 0x125   : > { %7030 = vst [vmem:[#allocation41_spill] sm:$0xff] %v4566_v11 }
 0x126   : > { %v4568_v15 = vpop.permute.xlu0 %836  ;;  %1306 = vrot.lane.b32.xlu1 %v1301_v1, %s4065_s29 }
 0x127   : > { %7031 = vst [vmem:[#allocation42_spill] sm:$0xff] %v4568_v15 }
 0x128   : > { %1330 = vrot.lane.b32.xlu0 %v1325_v3, %s4065_s29  ;;  %v4573_v34 = vpop.permute.xlu1 %838  ;;  %v1376_v3 = vrot.slane %v1370_v39, 1 }
 0x129   : > { %7032 = vst [vmem:[#allocation43_spill] sm:$0xff] %v4573_v34 }
 0x12a   : > { %v4578_v49 = vpop.permute.xlu0 %840  ;;  %1332 = vrot.lane.b32.xlu1 %v1327_v20, %s4065_s29  ;;  %v1349_v20 = vmul.f32 %v1346_v28, %v4266_v31  ;;  %v1378_v39 = vsel %vm278_vm2, %v1376_v3, %v1377_v7 }
 0x12b   : > { %7033 = vst [vmem:[#allocation44_spill] sm:$0xff] %v4578_v49  ;;  %v1398_v49 = vmul.f32 %v1397_v14, %v4253_v24 }
 0x12c   : > { %1334 = vrot.lane.b32.xlu0 %v1329_v35, %s4065_s29  ;;  %v4585_v1 = vpop.permute.xlu1 %842  ;;  %v1379_v35 = vrot.slane %v1372_v62, 1  ;;  %v1407_v62 = vrot.slane %v1400_v47, 2 }
 0x12d   : > { %7034 = vst [vmem:[#allocation45_spill] sm:$0xff] %v4585_v1 }
 0x12e   : > { %v4587_v15 = vpop.permute.xlu0 %884  ;;  %1353 = vrot.lane.b32.xlu1 %v1347_v51, %s4066_s6  ;;  %v1380_v28 = vsel %vm278_vm2, %v1377_v7, %v1379_v35  ;;  %v1404_v51 = vrot.slane %v1398_v49, 2 }
 0x12f   : > { %7035 = vst [vmem:[#allocation46_spill] sm:$0xff] %v4587_v15  ;;  %v1425_v15 = vstv %s3750_s30  ;;  %s3761_s30 = sld [smem:[#allocation3 + $0x6]] }
 0x130   : > { %1355 = vrot.lane.b32.xlu0 %v1348_v56, %s4066_s6  ;;  %v4594_v34 = vpop.permute.xlu1 %886  ;;  %v1405_v56 = vrot.slane %v1399_v19, 2  ;;  %v1426_v14 = vmul.f32 %v1425_v15, %v4263_v30  ;;  %v1449_v19 = vstv %s3751_s8  ;;  %s3763_s8 = sld [smem:[#allocation3 + $0x14]] }
 0x131   : > { %7036 = vst [vmem:[#allocation47_spill] sm:$0xff] %v4594_v34 }
 0x132   : > { %v4598_v1 = vpop.permute.xlu0 %888  ;;  %1357 = vrot.lane.b32.xlu1 %v1349_v20, %s4066_s6  ;;  %v1406_v3 = vsel %vm315_vm3, %v1404_v51, %v1405_v56  ;;  %v1427_v20 = vmul.f32 %v1425_v15, %v4266_v31  ;;  %v1408_v49 = vsel %vm315_vm3, %v1405_v56, %v1407_v62  ;;  %v1430_v47 = vrot.slane %v1426_v14, 3 }
 0x133   : > { %7037 = vst [vmem:[#allocation48_spill] sm:$0xff] %v4598_v1  ;;  %v1450_v51 = vmul.f32 %v1449_v19, %v4263_v30  ;;  %v1451_v15 = vmul.f32 %v1449_v19, %v4266_v31 }
 0x134   : > { %1381 = vrot.lane.b32.xlu0 %v1378_v39, %s4066_s6  ;;  %v4603_v24 = vpop.permute.xlu1 %890 }
 0x135   : > { %7038 = vst [vmem:[#allocation49_spill] sm:$0xff] %v4603_v24  ;;  %v1456_v14 = vrot.slane %v1450_v51, 4 }
 0x136   : > { %v4605_v34 = vpop.permute.xlu0 %892  ;;  %1383 = vrot.lane.b32.xlu1 %v1380_v28, %s4066_s6 }
 0x137   : > { %7039 = vst [vmem:[#allocation50_spill] sm:$0xff] %v4605_v34 }
 0x138   : > { %1385 = vrot.lane.b32.xlu0 %v1379_v35, %s4066_s6  ;;  %v4612_v39 = vpop.permute.xlu1 %894  ;;  %v1431_v35 = vrot.slane %v1427_v20, 3  ;;  %v1457_v20 = vrot.slane %v1451_v15, 4  ;;  %v1505_v15 = vstv %s3753_s15  ;;  %s4068_s15 = smov 122  }
 0x139   : > { %7040 = vst [vmem:[#allocation51_spill] sm:$0xff] %v4612_v39  ;;  %v1507_v24 = vmul.f32 %v1505_v15, %v4266_v31 }
 0x13a   : > { %v4615_v7 = vpop.permute.xlu0 %935  ;;  %1409 = vrot.lane.b32.xlu1 %v1406_v3, %s4066_s6  ;;  %v1432_v56 = vsel %vm348_vm4, %v1430_v47, %v1431_v35  ;;  %v1452_v3 = vmul.f32 %v1449_v19, %v4311_v10  ;;  %v1458_v19 = vsel %vm381_vm5, %v1456_v14, %v1457_v20 }
 0x13b   : > { %7041 = vst [vmem:[#allocation52_spill] sm:$0xff] %v4615_v7  ;;  %v1477_v7 = vstv %s3752_s26  ;;  %s3764_s26 = sld [smem:[#allocation3 + $0x1b]] }
 0x13c   : > { %1411 = vrot.lane.b32.xlu0 %v1408_v49, %s4066_s6  ;;  %v4619_v28 = vpop.permute.xlu1 %937  ;;  %v1479_v39 = vmul.f32 %v1477_v7, %v4266_v31 }
 0x13d   : > { %7042 = vst [vmem:[#allocation53_spill] sm:$0xff] %v4619_v28 }
 0x13e   : > { %v4623_v34 = vpop.permute.xlu0 %939  ;;  %1413 = vrot.lane.b32.xlu1 %v1407_v62, %s4066_s6  ;;  %v1478_v62 = vmul.f32 %v1477_v7, %v4263_v30 }
 0x13f   : > { %7043 = vst [vmem:[#allocation54_spill] sm:$0xff] %v4623_v34  ;;  %v1459_v34 = vrot.slane %v1452_v3, 4  ;;  %v1485_v3 = vrot.slane %v1479_v39, 5 }
 0x140   : > { %1433 = vrot.lane.b32.xlu0 %v1430_v47, %s4066_s6  ;;  %v4629_v49 = vpop.permute.xlu1 %941  ;;  %v1480_v47 = vmul.f32 %v1477_v7, %v4311_v10 }
 0x141   : > { %7044 = vst [vmem:[#allocation55_spill] sm:$0xff] %v4629_v49 }
 0x142   : > { %v4631_v28 = vpop.permute.xlu0 %943  ;;  %1435 = vrot.lane.b32.xlu1 %v1432_v56, %s4066_s6  ;;  %v1484_v56 = vrot.slane %v1478_v62, 5  ;;  %v1487_v49 = vrot.slane %v1480_v47, 5 }
 0x143   : > { %7045 = vst [vmem:[#allocation56_spill] sm:$0xff] %v4631_v28 }
 0x144   : > { %1437 = vrot.lane.b32.xlu0 %v1431_v35, %s4066_s6  ;;  %v4637_v1 = vpop.permute.xlu1 %945  ;;  %v1460_v35 = vsel %vm381_vm5, %v1457_v20, %v1459_v34  ;;  %v1508_v34 = vmul.f32 %v1505_v15, %v4311_v10  ;;  %v1488_v20 = vsel %vm418_vm6, %v1485_v3, %v1487_v49 }
 0x145   : > { %7046 = vst [vmem:[#allocation57_spill] sm:$0xff] %v4637_v1  ;;  %v1506_v1 = vmul.f32 %v1505_v15, %v4263_v30  ;;  %v1513_v30 = vrot.slane %v1507_v24, 6  ;;  %v1556_v15 = vstv %s3755_s19  ;;  %v4671_v24 = vld [vmem:[#allocation2 + $0x8] sm:$0xe0]  ;;  %s3766_s19 = sld [smem:[#allocation3 + $0x29]] }
 0x146   : > { %v4641_v51 = vpop.permute.xlu0 %978  ;;  %1461 = vrot.lane.b32.xlu1 %v1456_v14, %s4066_s6  ;;  %v1486_v14 = vsel %vm418_vm6, %v1484_v56, %v1485_v3  ;;  %v1515_v31 = vrot.slane %v1508_v34, 6  ;;  %v1557_v3 = vmul.f32 %v4671_v24, %v1556_v15 }
 0x147   : > { %7047 = vst [vmem:[#allocation58_spill] sm:$0xff] %v4641_v51  ;;  %v1512_v62 = vrot.slane %v1506_v1, 6 }
 0x148   : > { %1463 = vrot.lane.b32.xlu0 %v1458_v19, %s4066_s6  ;;  %v4646_v28 = vpop.permute.xlu1 %980  ;;  %v1516_v1 = vsel %vm455_vm7, %v1513_v30, %v1515_v31 }
 0x149   : > { %7048 = vst [vmem:[#allocation59_spill] sm:$0xff] %v4646_v28 }
 0x14a   : > { %v4650_v7 = vpop.permute.xlu0 %982  ;;  %1465 = vrot.lane.b32.xlu1 %v1460_v35, %s4066_s6  ;;  %v1514_v35 = vsel %vm455_vm7, %v1512_v62, %v1513_v30 }
 0x14b   : > { %7049 = vst [vmem:[#allocation60_spill] sm:$0xff] %v4650_v7 }
 0x14c   : > { %1489 = vrot.lane.b32.xlu0 %v1484_v56, %s4066_s6  ;;  %v4656_v39 = vpop.permute.xlu1 %984  ;;  %v1533_v56 = vstv %s3754_s18  ;;  %s3765_s18 = sld [smem:[#allocation3 + $0x22]] }
 0x14d   : > { %7050 = vst [vmem:[#allocation61_spill] sm:$0xff] %v4656_v39  ;;  %v1534_v49 = vmul.f32 %v4671_v24, %v1533_v56 }
 0x14e   : > { %v4659_v19 = vpop.permute.xlu0 %986  ;;  %1491 = vrot.lane.b32.xlu1 %v1486_v14, %s4066_s6  ;;  %v4675_v14 = vld [vmem:[#allocation2 + $0x18] sm:$0xff] }
 0x14f   : > { %7051 = vst [vmem:[#allocation62_spill] sm:$0xff] %v4659_v19  ;;  %v1558_v34 = vmul.f32 %v4675_v14, %v1556_v15  ;;  %v4680_v19 = vld [vmem:[#allocation2 + $0x28] sm:$0xff]  ;;  %v1535_v30 = vmul.f32 %v4675_v14, %v1533_v56 }
 0x150   : > { %1493 = vrot.lane.b32.xlu0 %v1488_v20, %s4066_s6  ;;  %v4663_v47 = vpop.permute.xlu1 %988  ;;  %v1536_v31 = vmul.f32 %v4680_v19, %v1533_v56 }
 0x151   : > { %7052 = vst [vmem:[#allocation63_spill] sm:$0xff] %v4663_v47  ;;  %v1563_v47 = vrot.slane %v1557_v3, 1  ;;  %v1564_v39 = vrot.slane %v1558_v34, 1 }
 0x152   : > { %v4666_v7 = vpop.permute.xlu0 %1029  ;;  %1517 = vrot.lane.b32.xlu1 %v1512_v62, %s4066_s6  ;;  %v1559_v62 = vmul.f32 %v4680_v19, %v1556_v15 }
 0x153   : > { %7053 = vst [vmem:[#allocation64_spill] sm:$0xff] %v4666_v7 }
 0x154   : > { %1519 = vrot.lane.b32.xlu0 %v1514_v35, %s4066_s6  ;;  %v4678_v20 = vpop.permute.xlu1 %1031  ;;  %v1584_v35 = vstv %s3756_s24  ;;  %v1566_v51 = vrot.slane %v1559_v62, 1  ;;  %s3767_s24 = sld [smem:[#allocation3 + $0x30]] }
 0x155   : > { %7054 = vst [vmem:[#allocation65_spill] sm:$0xff] %v4678_v20  ;;  %v1585_v15 = vmul.f32 %v4671_v24, %v1584_v35 }
 0x156   : > { %v4683_v7 = vpop.permute.xlu0 %1033  ;;  %1521 = vrot.lane.b32.xlu1 %v1516_v1, %s4066_s6  ;;  %v1565_v1 = vsel %vm278_vm2, %v1563_v47, %v1564_v39  ;;  %v1567_v3 = vsel %vm278_vm2, %v1564_v39, %v1566_v51 }
 0x157   : > { %7055 = vst [vmem:[#allocation66_spill] sm:$0xff] %v4683_v7  ;;  %v1586_v7 = vmul.f32 %v4675_v14, %v1584_v35  ;;  %v1591_v34 = vrot.slane %v1585_v15, 2 }
 0x158   : > { %1540 = vrot.lane.b32.xlu0 %v1534_v49, %s4067_s5  ;;  %v4689_v20 = vpop.permute.xlu1 %1035  ;;  %v1587_v49 = vmul.f32 %v4680_v19, %v1584_v35  ;;  %v1613_v35 = vmul.f32 %v4675_v14, %v1612_v63 }
 0x159   : > { %7056 = vst [vmem:[#allocation67_spill] sm:$0xff] %v4689_v20  ;;  %v1592_v62 = vrot.slane %v1586_v7, 2 }
 0x15a   : > { %v4693_v28 = vpop.permute.xlu0 %1037  ;;  %1542 = vrot.lane.b32.xlu1 %v1535_v30, %s4067_s5  ;;  %v1594_v30 = vrot.slane %v1587_v49, 2 }
 0x15b   : > { %7057 = vst [vmem:[#allocation68_spill] sm:$0xff] %v4693_v28  ;;  %v1593_v47 = vsel %vm315_vm3, %v1591_v34, %v1592_v62  ;;  %v1614_v28 = vmul.f32 %v4680_v19, %v1612_v63 }
 0x15c   : > { %1544 = vrot.lane.b32.xlu0 %v1536_v31, %s4067_s5  ;;  %v4699_v56 = vpop.permute.xlu1 %1039  ;;  %v1595_v7 = vsel %vm315_vm3, %v1592_v62, %v1594_v30 }
 0x15d   : > { %7058 = vst [vmem:[#allocation69_spill] sm:$0xff] %v4699_v56  ;;  %v1618_v49 = vrot.slane %v1614_v28, 3  ;;  %v1664_v28 = vstv %s3759_s17  ;;  %v1799_v56 = vstv %s3764_s26  ;;  %s3777_s17 = sld [smem:[#allocation3 + $0x40]]  ;;  %s3779_s26 = sld [smem:[#allocation3 + $0x4e]] }
 0x15e   : > { %v4702_v20 = vpop.permute.xlu0 %1080  ;;  %1568 = vrot.lane.b32.xlu1 %v1565_v1, %s4067_s5  ;;  %v1617_v1 = vrot.slane %v1613_v35, 3 }
 0x15f   : > { %7059 = vst [vmem:[#allocation70_spill] sm:$0xff] %v4702_v20 }
 0x160   : > { %1570 = vrot.lane.b32.xlu0 %v1567_v3, %s4067_s5  ;;  %v4706_v31 = vpop.permute.xlu1 %1082  ;;  %v1636_v3 = vstv %s3758_s16  ;;  %s3776_s16 = sld [smem:[#allocation3 + $0x39]] }
 0x161   : > { %7060 = vst [vmem:[#allocation71_spill] sm:$0xff] %v4706_v31  ;;  %v1637_v63 = vmul.f32 %v4675_v14, %v1636_v3  ;;  %v1638_v34 = vmul.f32 %v4680_v19, %v1636_v3  ;;  %v1639_v62 = vmul.f32 %v1636_v3, %v4311_v10 }
 0x162   : > { %v4711_v39 = vpop.permute.xlu0 %1084  ;;  %1572 = vrot.lane.b32.xlu1 %v1566_v51, %s4067_s5 }
 0x163   : > { %7061 = vst [vmem:[#allocation72_spill] sm:$0xff] %v4711_v39  ;;  %v1646_v39 = vrot.slane %v1639_v62, 4 }
 0x164   : > { %1596 = vrot.lane.b32.xlu0 %v1593_v47, %s4067_s5  ;;  %v4716_v15 = vpop.permute.xlu1 %1086  ;;  %v1619_v47 = vsel %vm348_vm4, %v1617_v1, %v1618_v49 }
 0x165   : > { %7062 = vst [vmem:[#allocation73_spill] sm:$0xff] %v4716_v15  ;;  %v1665_v15 = vmul.f32 %v4675_v14, %v1664_v28 }
 0x166   : > { %v4718_v20 = vpop.permute.xlu0 %1088  ;;  %1598 = vrot.lane.b32.xlu1 %v1595_v7, %s4067_s5  ;;  %v1643_v7 = vrot.slane %v1637_v63, 4 }
 0x167   : > { %7063 = vst [vmem:[#allocation74_spill] sm:$0xff] %v4718_v20 }
 0x168   : > { %1600 = vrot.lane.b32.xlu0 %v1594_v30, %s4067_s5  ;;  %v4724_v51 = vpop.permute.xlu1 %1090  ;;  %v1644_v30 = vrot.slane %v1638_v34, 4 }
 0x169   : > { %7064 = vst [vmem:[#allocation75_spill] sm:$0xff] %v4724_v51  ;;  %v1666_v51 = vmul.f32 %v4680_v19, %v1664_v28 }
 0x16a   : > { %v4728_v35 = vpop.permute.xlu0 %1131  ;;  %1620 = vrot.lane.b32.xlu1 %v1617_v1, %s4067_s5  ;;  %v1645_v10 = vsel %vm381_vm5, %v1643_v7, %v1644_v30  ;;  %v4741_v1 = vld [vmem:[#allocation2 + $0x38] sm:$0x7]  ;;  %v1647_v34 = vsel %vm381_vm5, %v1644_v30, %v1646_v39 }
 0x16b   : > { %7065 = vst [vmem:[#allocation76_spill] sm:$0xff] %v4728_v35  ;;  %v1667_v3 = vmul.f32 %v4741_v1, %v1664_v28  ;;  %v1672_v62 = vrot.slane %v1666_v51, 5  ;;  %v1692_v35 = vstv %s3760_s23  ;;  %s3778_s23 = sld [smem:[#allocation3 + $0x47]] }
 0x16c   : > { %1622 = vrot.lane.b32.xlu0 %v1619_v47, %s4067_s5  ;;  %v4732_v20 = vpop.permute.xlu1 %1133  ;;  %v1671_v47 = vrot.slane %v1665_v15, 5  ;;  %v1695_v15 = vmul.f32 %v4741_v1, %v1692_v35 }
 0x16d   : > { %7066 = vst [vmem:[#allocation77_spill] sm:$0xff] %v4732_v20 }
 0x16e   : > { %v4736_v31 = vpop.permute.xlu0 %1135  ;;  %1624 = vrot.lane.b32.xlu1 %v1618_v49, %s4067_s5  ;;  %v1674_v49 = vrot.slane %v1667_v3, 5  ;;  %v1673_v39 = vsel %vm418_vm6, %v1671_v47, %v1672_v62 }
 0x16f   : > { %7067 = vst [vmem:[#allocation78_spill] sm:$0xff] %v4736_v31  ;;  %v1694_v31 = vmul.f32 %v4680_v19, %v1692_v35 }
 0x170   : > { %1648 = vrot.lane.b32.xlu0 %v1643_v7, %s4067_s5  ;;  %v4744_v63 = vpop.permute.xlu1 %1137  ;;  %v1693_v7 = vmul.f32 %v4675_v14, %v1692_v35  ;;  %v1675_v30 = vsel %vm418_vm6, %v1672_v62, %v1674_v49 }
 0x171   : > { %7068 = vst [vmem:[#allocation79_spill] sm:$0xff] %v4744_v63  ;;  %v1700_v3 = vrot.slane %v1694_v31, 6 }
 0x172   : > { %v4747_v20 = vpop.permute.xlu0 %1139  ;;  %1650 = vrot.lane.b32.xlu1 %v1645_v10, %s4067_s5  ;;  %v1699_v10 = vrot.slane %v1693_v7, 6 }
 0x173   : > { %7069 = vst [vmem:[#allocation80_spill] sm:$0xff] %v4747_v20  ;;  %v1702_v20 = vrot.slane %v1695_v15, 6 }
 0x174   : > { %1652 = vrot.lane.b32.xlu0 %v1647_v34, %s4067_s5  ;;  %v4753_v28 = vpop.permute.xlu1 %1141  ;;  %v1701_v35 = vsel %vm455_vm7, %v1699_v10, %v1700_v3 }
 0x175   : > { %7070 = vst [vmem:[#allocation81_spill] sm:$0xff] %v4753_v28  ;;  %v1743_v28 = vstv %s3762_s28  ;;  %v1703_v62 = vsel %vm455_vm7, %v1700_v3, %v1702_v20  ;;  %v1771_v3 = vstv %s3763_s8  ;;  %s3720_s28 = sld [smem:[#allocation3 + $0x7]]  ;;  %s250_s8 = sld [smem:[#allocation3]] }
 0x176   : > { %v4757_v51 = vpop.permute.xlu0 %1166  ;;  %1676 = vrot.lane.b32.xlu1 %v1671_v47, %s4067_s5  ;;  %v1720_v47 = vstv %s3761_s30  ;;  %v1744_v31 = vmul.f32 %v4671_v24, %v1743_v28  ;;  %v1745_v49 = vmul.f32 %v4675_v14, %v1743_v28  ;;  %s3721_s30 = sld [smem:[#allocation3 + $0xe]] }
 0x177   : > { %7071 = vst [vmem:[#allocation82_spill] sm:$0xff] %v4757_v51  ;;  %v1722_v15 = vmul.f32 %v4675_v14, %v1720_v47 }
 0x178   : > { %1678 = vrot.lane.b32.xlu0 %v1673_v39, %s4067_s5  ;;  %v4762_v34 = vpop.permute.xlu1 %1168  ;;  %v1721_v39 = vmul.f32 %v4671_v24, %v1720_v47  ;;  %v1751_v20 = vrot.slane %v1745_v49, 1  ;;  %v1774_v49 = vmul.f32 %v4680_v19, %v1771_v3 }
 0x179   : > { %7072 = vst [vmem:[#allocation83_spill] sm:$0xff] %v4762_v34 }
 0x17a   : > { %v4764_v63 = vpop.permute.xlu0 %1170  ;;  %1680 = vrot.lane.b32.xlu1 %v1675_v30, %s4067_s5  ;;  %v1746_v30 = vmul.f32 %v4680_v19, %v1743_v28  ;;  %v1773_v28 = vmul.f32 %v4675_v14, %v1771_v3 }
 0x17b   : > { %7073 = vst [vmem:[#allocation84_spill] sm:$0xff] %v4764_v63 }
 0x17c   : > { %1704 = vrot.lane.b32.xlu0 %v1699_v10, %s4067_s5  ;;  %v4769_v51 = vpop.permute.xlu1 %1194 }
 0x17d   : > { %7074 = vst [vmem:[#allocation85_spill] sm:$0xff] %v4769_v51  ;;  %v1750_v51 = vrot.slane %v1744_v31, 1 }
 0x17e   : > { %v4774_v7 = vpop.permute.xlu0 %1196  ;;  %1706 = vrot.lane.b32.xlu1 %v1701_v35, %s4067_s5  ;;  %v1723_v35 = vmul.f32 %v4680_v19, %v1720_v47 }
 0x17f   : > { %7075 = vst [vmem:[#allocation86_spill] sm:$0xff] %v4774_v7  ;;  %v1772_v7 = vmul.f32 %v4671_v24, %v1771_v3  ;;  %v1752_v31 = vsel %vm278_vm2, %v1750_v51, %v1751_v20  ;;  %v1800_v3 = vmul.f32 %v4675_v14, %v1799_v56 }
 0x180   : > { %1708 = vrot.lane.b32.xlu0 %v1703_v62, %s4067_s5  ;;  %v4781_v10 = vpop.permute.xlu1 %1198  ;;  %v1753_v62 = vrot.slane %v1746_v30, 1 }
 0x181   : > { %7076 = vst [vmem:[#allocation87_spill] sm:$0xff] %v4781_v10 }
 0x182   : > { %v4783_v63 = vpop.permute.xlu0 %1222  ;;  %1727 = vrot.lane.b32.xlu1 %v1721_v39, %s4068_s15  ;;  %v1754_v47 = vsel %vm278_vm2, %v1751_v20, %v1753_v62  ;;  %v1778_v39 = vrot.slane %v1772_v7, 2 }
 0x183   : > { %7077 = vst [vmem:[#allocation88_spill] sm:$0xff] %v4783_v63  ;;  %v1781_v63 = vrot.slane %v1774_v49, 2  ;;  %v1804_v49 = vrot.slane %v1800_v3, 3 }
 0x184   : > { %1729 = vrot.lane.b32.xlu0 %v1722_v15, %s4068_s15  ;;  %v4790_v34 = vpop.permute.xlu1 %1224  ;;  %v1779_v15 = vrot.slane %v1773_v28, 2  ;;  %v1823_v28 = vstv %s3765_s18  ;;  %s3722_s18 = sld [smem:[#allocation3 + $0x15]] }
 0x185   : > { %7078 = vst [vmem:[#allocation89_spill] sm:$0xff] %v4790_v34 }
 0x186   : > { %v4794_v10 = vpop.permute.xlu0 %1226  ;;  %1731 = vrot.lane.b32.xlu1 %v1723_v35, %s4068_s15  ;;  %v1780_v51 = vsel %vm315_vm3, %v1778_v39, %v1779_v15  ;;  %v1801_v35 = vmul.f32 %v4680_v19, %v1799_v56  ;;  %v1782_v7 = vsel %vm315_vm3, %v1779_v15, %v1781_v63  ;;  %v1824_v39 = vmul.f32 %v4675_v14, %v1823_v28 }
 0x187   : > { %7079 = vst [vmem:[#allocation90_spill] sm:$0xff] %v4794_v10  ;;  %v1825_v56 = vmul.f32 %v4680_v19, %v1823_v28 }
 0x188   : > { %1755 = vrot.lane.b32.xlu0 %v1752_v31, %s4068_s15  ;;  %v4799_v30 = vpop.permute.xlu1 %1246  ;;  %v1830_v3 = vrot.slane %v1824_v39, 4 }
 0x189   : > { %7080 = vst [vmem:[#allocation91_spill] sm:$0xff] %v4799_v30 }
 0x18a   : > { %v4801_v34 = vpop.permute.xlu0 %1248  ;;  %1757 = vrot.lane.b32.xlu1 %v1754_v47, %s4068_s15 }
 0x18b   : > { %7081 = vst [vmem:[#allocation92_spill] sm:$0xff] %v4801_v34 }
 0x18c   : > { %1759 = vrot.lane.b32.xlu0 %v1753_v62, %s4068_s15  ;;  %v4808_v31 = vpop.permute.xlu1 %1250  ;;  %v1805_v62 = vrot.slane %v1801_v35, 3  ;;  %v1831_v35 = vrot.slane %v1825_v56, 4  ;;  %v1879_v56 = vstv %s3767_s24  ;;  %s3724_s24 = sld [smem:[#allocation3 + $0x23]] }
 0x18d   : > { %7082 = vst [vmem:[#allocation93_spill] sm:$0xff] %v4808_v31  ;;  %v1881_v10 = vmul.f32 %v4680_v19, %v1879_v56 }
 0x18e   : > { %v4811_v20 = vpop.permute.xlu0 %1274  ;;  %1783 = vrot.lane.b32.xlu1 %v1780_v51, %s4068_s15  ;;  %v1806_v15 = vsel %vm348_vm4, %v1804_v49, %v1805_v62  ;;  %v1826_v51 = vmul.f32 %v4741_v1, %v1823_v28  ;;  %v1832_v28 = vsel %vm381_vm5, %v1830_v3, %v1831_v35 }
 0x18f   : > { %7083 = vst [vmem:[#allocation94_spill] sm:$0xff] %v4811_v20 }
 0x190   : > { %1785 = vrot.lane.b32.xlu0 %v1782_v7, %s4068_s15  ;;  %v4815_v47 = vpop.permute.xlu1 %1276 }
 0x191   : > { %7084 = vst [vmem:[#allocation95_spill] sm:$0xff] %v4815_v47  ;;  %v1851_v47 = vstv %s3766_s19  ;;  %s3723_s19 = sld [smem:[#allocation3 + $0x1c]] }
 0x192   : > { %v4819_v34 = vpop.permute.xlu0 %1278  ;;  %1787 = vrot.lane.b32.xlu1 %v1781_v63, %s4068_s15  ;;  %v1852_v63 = vmul.f32 %v4675_v14, %v1851_v47  ;;  %v1853_v31 = vmul.f32 %v4680_v19, %v1851_v47  ;;  %v5000_v45 = vstv %s3724_s24  ;;  %s5582_s24 = sld [smem:[#allocation3 + $0x3f]] }
 0x193   : > { %7085 = vst [vmem:[#allocation96_spill] sm:$0xff] %v4819_v34  ;;  %v1833_v34 = vrot.slane %v1826_v51, 4 }
 0x194   : > { %1807 = vrot.lane.b32.xlu0 %v1804_v49, %s4068_s15  ;;  %v4825_v7 = vpop.permute.xlu1 %1302  ;;  %v1854_v49 = vmul.f32 %v4741_v1, %v1851_v47  ;;  %v1859_v51 = vrot.slane %v1853_v31, 5 }
 0x195   : > { %7086 = vst [vmem:[#allocation97_spill] sm:$0xff] %v4825_v7 }
 0x196   : > { %v4827_v20 = vpop.permute.xlu0 %1304  ;;  %1809 = vrot.lane.b32.xlu1 %v1806_v15, %s4068_s15  ;;  %v1858_v15 = vrot.slane %v1852_v63, 5  ;;  %v1861_v7 = vrot.slane %v1854_v49, 5 }
 0x197   : > { %7087 = vst [vmem:[#allocation98_spill] sm:$0xff] %v4827_v20  ;;  %v4997_v58 = vstv %s3723_s19  ;;  %s5577_s19 = sld [smem:[#allocation3 + $0x31]] }
 0x198   : > { %1811 = vrot.lane.b32.xlu0 %v1805_v62, %s4068_s15  ;;  %v4833_v30 = vpop.permute.xlu1 %1306  ;;  %v1834_v62 = vsel %vm381_vm5, %v1831_v35, %v1833_v34  ;;  %v1882_v34 = vmul.f32 %v4741_v1, %v1879_v56  ;;  %v1862_v31 = vsel %vm418_vm6, %v1859_v51, %v1861_v7  ;;  %v4870_v7 = vld [vmem:[#allocation2 + $0x48] sm:$0xe0] }
 0x199   : > { %7088 = vst [vmem:[#allocation99_spill] sm:$0xff] %v4833_v30  ;;  %v1880_v30 = vmul.f32 %v4675_v14, %v1879_v56  ;;  %v2137_v56 = vstv %s3775_s3  ;;  %s4970_s3 = sld [smem:[#allocation3 + $0x2a]] }
 0x19a   : > { %v4837_v39 = vpop.permute.xlu0 %1330  ;;  %1835 = vrot.lane.b32.xlu1 %v1830_v3, %s4068_s15  ;;  %v1860_v3 = vsel %vm418_vm6, %v1858_v15, %v1859_v51 }
 0x19b   : > { %7089 = vst [vmem:[#allocation100_spill] sm:$0xff] %v4837_v39  ;;  %v1886_v63 = vrot.slane %v1880_v30, 6 }
 0x19c   : > { %1837 = vrot.lane.b32.xlu0 %v1832_v28, %s4068_s15  ;;  %v4842_v20 = vpop.permute.xlu1 %1332  ;;  %v1887_v28 = vrot.slane %v1881_v10, 6 }
 0x19d   : > { %7090 = vst [vmem:[#allocation101_spill] sm:$0xff] %v4842_v20  ;;  %v4862_v20 = vld [vmem:[#allocation2 + $0x40] sm:$0xe0] }
 0x19e   : > { %v4846_v47 = vpop.permute.xlu0 %1334  ;;  %1839 = vrot.lane.b32.xlu1 %v1834_v62, %s4068_s15  ;;  %v1889_v62 = vrot.slane %v1882_v34, 6  ;;  %v2138_v30 = vmul.f32 %v2137_v56, %v4862_v20  ;;  %v2178_v34 = vstv %s3776_s16  ;;  %s5014_s16 = sld [smem:[#allocation3 + $0x55]] }
 0x19f   : > { %7091 = vst [vmem:[#allocation102_spill] sm:$0xff] %v4846_v47 }
 0x1a0   : > { %1863 = vrot.lane.b32.xlu0 %v1858_v15, %s4068_s15  ;;  %v4852_v35 = vpop.permute.xlu1 %1353  ;;  %v1888_v15 = vsel %vm455_vm7, %v1886_v63, %v1887_v28  ;;  %v1890_v10 = vsel %vm455_vm7, %v1887_v28, %v1889_v62 }
 0x1a1   : > { %7092 = vst [vmem:[#allocation103_spill] sm:$0xff] %v4852_v35 }
 0x1a2   : > { %v4855_v49 = vpop.permute.xlu0 %1355  ;;  %1865 = vrot.lane.b32.xlu1 %v1860_v3, %s4068_s15 }
 0x1a3   : > { %7093 = vst [vmem:[#allocation104_spill] sm:$0xff] %v4855_v49 }
 0x1a4   : > { %1867 = vrot.lane.b32.xlu0 %v1862_v31, %s4068_s15  ;;  %v4859_v47 = vpop.permute.xlu1 %1357  ;;  %v2139_v31 = vmul.f32 %v2137_v56, %v4870_v7  ;;  %v2374_v13 = vstv %s5014_s16  ;;  %s5624_s16 = sld [smem:[#allocation3 + $0x46]] }
 0x1a5   : > { %7094 = vst [vmem:[#allocation105_spill] sm:$0xff] %v4859_v47  ;;  %v4892_v47 = vld [vmem:[#allocation2 + $0x68] sm:$0xff] }
 0x1a6   : > { %v4864_v35 = vpop.permute.xlu0 %1381  ;;  %1891 = vrot.lane.b32.xlu1 %v1886_v63, %s4068_s15  ;;  %v4881_v63 = vld [vmem:[#allocation2] sm:$0xff]  ;;  %v2184_v17 = vmul.f32 %v2178_v34, %v4892_v47 }
 0x1a7   : > { %7095 = vst [vmem:[#allocation106_spill] sm:$0xff] %v4864_v35  ;;  %v4878_v35 = vld [vmem:[#allocation2 + $0x58] sm:$0xff]  ;;  %v2140_v28 = vmul.f32 %v4881_v63, %v2137_v56  ;;  %v369_v12 = vmul.f32 %v4881_v63, %v4997_v58  ;;  %v406_v32 = vmul.f32 %v4881_v63, %v5000_v45 }
 0x1a8   : > { %1893 = vrot.lane.b32.xlu0 %v1888_v15, %s4068_s15  ;;  %v4872_v51 = vpop.permute.xlu1 %1383  ;;  %v2179_v15 = vmul.f32 %v2178_v34, %v4862_v20  ;;  %v2182_v49 = vmul.f32 %v2178_v34, %v4878_v35 }
 0x1a9   : > { %7096 = vst [vmem:[#allocation107_spill] sm:$0xff] %v4872_v51  ;;  %v2181_v51 = vmul.f32 %v4881_v63, %v2178_v34 }
 0x1aa   : > { %v4874_v3 = vpop.permute.xlu0 %1385  ;;  %1895 = vrot.lane.b32.xlu1 %v1890_v10, %s4068_s15  ;;  %v2141_v10 = vmul.f32 %v2137_v56, %v4878_v35  ;;  %v2191_v39 = vrot.slane %v2179_v15, 1  ;;  %v2195_v54 = vrot.slane %v2182_v49, 1  ;;  %v2229_v15 = vstv %s3777_s17  ;;  %s5107_s17 = sld [smem:[#allocation3 + $0x5c]] }
 0x1ab   : > { %7097 = vst [vmem:[#allocation108_spill] sm:$0xff] %v4874_v3  ;;  %v2192_v11 = vrot.slane %v2181_v51, 1  ;;  %v2230_v49 = vmul.f32 %v2229_v15, %v4862_v20 }
 0x1ac   : > { %2150 = vrot.lane.b32.xlu0 %v2138_v30, %s4063_s22  ;;  %v4884_v62 = vpop.permute.xlu1 %1409  ;;  %v2180_v30 = vmul.f32 %v2178_v34, %v4870_v7  ;;  %v2232_v34 = vmul.f32 %v4881_v63, %v2229_v15 }
 0x1ad   : > { %7098 = vst [vmem:[#allocation109_spill] sm:$0xff] %v4884_v62  ;;  %v2193_v0 = vsel %vm278_vm2, %v2191_v39, %v2192_v11 }
 0x1ae   : > { %v4888_v3 = vpop.permute.xlu0 %1411  ;;  %2152 = vrot.lane.b32.xlu1 %v2139_v31, %s4063_s22  ;;  %v2143_v31 = vmul.f32 %v2137_v56, %v4892_v47  ;;  %v2199_v56 = vrot.slane %v2184_v17, 1  ;;  %v2242_v17 = vrot.slane %v2230_v49, 2 }
 0x1af   : > { %7099 = vst [vmem:[#allocation110_spill] sm:$0xff] %v4888_v3  ;;  %v2194_v3 = vrot.slane %v2180_v30, 1  ;;  %v2231_v30 = vmul.f32 %v2229_v15, %v4870_v7 }
 0x1b0   : > { %2154 = vrot.lane.b32.xlu0 %v2140_v28, %s4063_s22  ;;  %v4897_v62 = vpop.permute.xlu1 %1413  ;;  %v2200_v39 = vsel %vm278_vm2, %v2195_v54, %v2199_v56 }
 0x1b1   : > { %7100 = vst [vmem:[#allocation111_spill] sm:$0xff] %v4897_v62  ;;  %v2196_v51 = vsel %vm278_vm2, %v2194_v3, %v2195_v54 }
 0x1b2   : > { %v4899_v43 = vpop.permute.xlu0 %1433  ;;  %2156 = vrot.lane.b32.xlu1 %v2141_v10, %s4063_s22 }
 0x1b3   : > { %7101 = vst [vmem:[#allocation112_spill] sm:$0xff] %v4899_v43 }
 0x1b4   : > { %2158 = vrot.lane.b32.xlu0 %v2140_v28, %s4063_s22  ;;  %v4905_v22 = vpop.permute.xlu1 %1435 }
 0x1b5   : > { %7102 = vst [vmem:[#allocation113_spill] sm:$0xff] %v4905_v22 }
 0x1b6   : > { %v4908_v8 = vpop.permute.xlu0 %1437  ;;  %2160 = vrot.lane.b32.xlu1 %v2143_v31, %s4063_s22  ;;  %v2243_v31 = vrot.slane %v2232_v34, 2 }
 0x1b7   : > { %7103 = vst [vmem:[#allocation114_spill] sm:$0xff] %v4908_v8  ;;  %v2235_v8 = vmul.f32 %v2229_v15, %v4892_v47 }
 0x1b8   : > { %2201 = vrot.lane.b32.xlu0 %v2193_v0, %s4063_s22  ;;  %v4913_v10 = vpop.permute.xlu1 %1461  ;;  %v2233_v0 = vmul.f32 %v2229_v15, %v4878_v35  ;;  %v2244_v22 = vsel %vm315_vm3, %v2242_v17, %v2243_v31 }
 0x1b9   : > { %7104 = vst [vmem:[#allocation115_spill] sm:$0xff] %v4913_v10  ;;  %v2250_v34 = vrot.slane %v2235_v8, 2 }
 0x1ba   : > { %v4917_v28 = vpop.permute.xlu0 %1463  ;;  %2203 = vrot.lane.b32.xlu1 %v2196_v51, %s4063_s22  ;;  %v2245_v51 = vrot.slane %v2231_v30, 2 }
 0x1bb   : > { %7105 = vst [vmem:[#allocation116_spill] sm:$0xff] %v4917_v28  ;;  %v2246_v28 = vrot.slane %v2233_v0, 2 }
 0x1bc   : > { %2205 = vrot.lane.b32.xlu0 %v2192_v11, %s4063_s22  ;;  %v4924_v3 = vpop.permute.xlu1 %1465 }
 0x1bd   : > { %7106 = vst [vmem:[#allocation117_spill] sm:$0xff] %v4924_v3  ;;  %v2247_v49 = vsel %vm315_vm3, %v2245_v51, %v2246_v28  ;;  %v2251_v15 = vsel %vm315_vm3, %v2246_v28, %v2250_v34 }
 0x1be   : > { %v4926_v10 = vpop.permute.xlu0 %1489  ;;  %2207 = vrot.lane.b32.xlu1 %v2200_v39, %s4063_s22 }
 0x1bf   : > { %7107 = vst [vmem:[#allocation118_spill] sm:$0xff] %v4926_v10  ;;  %v4990_v10 = vstv %s3722_s18  ;;  %s5557_s18 = sld [smem:[#allocation3 + $0x38]] }
 0x1c0   : > { %2209 = vrot.lane.b32.xlu0 %v2192_v11, %s4063_s22  ;;  %v4931_v54 = vpop.permute.xlu1 %1491  ;;  %v2280_v11 = vstv %s3778_s23  ;;  %s5191_s23 = sld [smem:[#allocation3 + $0x33]] }
 0x1c1   : > { %7108 = vst [vmem:[#allocation119_spill] sm:$0xff] %v4931_v54  ;;  %v2282_v17 = vmul.f32 %v2280_v11, %v4878_v35  ;;  %v4957_v28 = vmul.f32 %v2280_v11, %v4892_v47 }
 0x1c2   : > { %v4934_v43 = vpop.permute.xlu0 %1493  ;;  %2211 = vrot.lane.b32.xlu1 %v2199_v56, %s4063_s22  ;;  %v2281_v56 = vmul.f32 %v4881_v63, %v2280_v11  ;;  %v4973_v11 = vstv %s250_s8  ;;  %s5469_s8 = sld [smem:[#allocation3 + $0x4f]] }
 0x1c3   : > { %7109 = vst [vmem:[#allocation120_spill] sm:$0xff] %v4934_v43 }
 0x1c4   : > { %2252 = vrot.lane.b32.xlu0 %v2244_v22, %s4063_s22  ;;  %v4939_v39 = vpop.permute.xlu1 %1517  ;;  %v4951_v22 = vstv %s3720_s28  ;;  %v2289_v51 = vrot.slane %v2281_v56, 3  ;;  %s5212_s28 = sld [smem:[#allocation3 + $0x3a]] }
 0x1c5   : > { %7110 = vst [vmem:[#allocation121_spill] sm:$0xff] %v4939_v39  ;;  %v267_v56 = vmul.f32 %v4671_v24, %v4951_v22 }
 0x1c6   : > { %v4941_v30 = vpop.permute.xlu0 %1519  ;;  %2254 = vrot.lane.b32.xlu1 %v2247_v49, %s4063_s22 }
 0x1c7   : > { %7111 = vst [vmem:[#allocation122_spill] sm:$0xff] %v4941_v30  ;;  %v3914_v30 = vld [vmem:[#allocation2] sm:$0xe0]  ;;  %v282_v5 = vrot.slane %v267_v56, 1 }
 0x1c8   : > { %2256 = vrot.lane.b32.xlu0 %v2243_v31, %s4063_s22  ;;  %v4947_v0 = vpop.permute.xlu1 %1521  ;;  %v252_v21 = vmul.f32 %v3914_v30, %v4973_v11 }
 0x1c9   : > { %7112 = vst [vmem:[#allocation123_spill] sm:$0xff] %v4947_v0  ;;  %v4963_v0 = vmul.f32 %v4881_v63, %v4951_v22 }
 0x1ca   : > { %v4949_v8 = vpop.permute.xlu0 %1540  ;;  %2258 = vrot.lane.b32.xlu1 %v2251_v15, %s4063_s22  ;;  %v266_v15 = vmul.f32 %v3914_v30, %v4951_v22 }
 0x1cb   : > { %7113 = vst [vmem:[#allocation124_spill] sm:$0xff] %v4949_v8  ;;  %v4965_v8 = vstv %s3721_s30  ;;  %v7129_v9 = vrot.slane %v4963_v0, 1  ;;  %s5386_s30 = sld [smem:[#allocation3 + $0x48]] }
 0x1cc   : > { %2260 = vrot.lane.b32.xlu0 %v2243_v31, %s4063_s22  ;;  %v4959_v49 = vpop.permute.xlu1 %1542  ;;  %v2290_v31 = vrot.slane %v2282_v17, 3  ;;  %v4981_v43 = vmul.f32 %v4881_v63, %v4965_v8  ;;  %v279_v3 = vrot.slane %v266_v15, 1  ;;  %v303_v62 = vmul.f32 %v3914_v30, %v4965_v8  ;;  %v5027_v30 = vld [vmem:[#allocation2 + $0x70] sm:$0x7] }
 0x1cd   : > { %7114 = vst [vmem:[#allocation125_spill] sm:$0xff] %v4959_v49  ;;  %v2293_v49 = vrot.slane %v4957_v28, 3  ;;  %v304_v28 = vmul.f32 %v4671_v24, %v4965_v8 }
 0x1ce   : > { %v4968_v39 = vpop.permute.xlu0 %1544  ;;  %2262 = vrot.lane.b32.xlu1 %v2250_v34, %s4063_s22  ;;  %v2323_v34 = vstv %s3779_s26  ;;  %v316_v60 = vrot.slane %v303_v62, 2  ;;  %s5541_s26 = sld [smem:[#allocation3 + $0x56]] }
 0x1cf   : > { %7115 = vst [vmem:[#allocation126_spill] sm:$0xff] %v4968_v39  ;;  %v4985_v39 = vmul.f32 %v4675_v14, %v4951_v22  ;;  %v2294_v17 = vsel %vm348_vm4, %v2290_v31, %v2293_v49  ;;  %v2324_v15 = vmul.f32 %v4881_v63, %v2323_v34  ;;  %v2325_v50 = vmul.f32 %v2323_v34, %v4878_v35 }
 0x1d0   : > { %2295 = vrot.lane.b32.xlu0 %v2289_v51, %s4063_s22  ;;  %v4987_v54 = vpop.permute.xlu1 %1568 }
 0x1d1   : > { %7116 = vst [vmem:[#allocation127_spill] sm:$0xff] %v4987_v54  ;;  %v5023_v54 = vmul.f32 %v4675_v14, %v4965_v8  ;;  %v2336_v62 = vrot.slane %v2324_v15, 4  ;;  %v7121_v40 = vrot.slane %v4985_v39, 1 }
 0x1d2   : > { %v4993_v53 = vpop.permute.xlu0 %1570  ;;  %2297 = vrot.lane.b32.xlu1 %v2290_v31, %s4063_s22  ;;  %v7119_v31 = vrot.slane %v4963_v0, 1 }
 0x1d3   : > { %7117 = vst [vmem:[#allocation128_spill] sm:$0xff] %v4993_v53  ;;  %v5008_v53 = vmul.f32 %v4881_v63, %v4990_v10  ;;  %v284_v44 = vsel %vm278_vm2, %v282_v5, %v7121_v40  ;;  %v2337_v5 = vrot.slane %v2325_v50, 4  ;;  %v5084_v50 = vmul.f32 %v4675_v14, %v5000_v45 }
 0x1d4   : > { %2299 = vrot.lane.b32.xlu0 %v2289_v51, %s4063_s22  ;;  %v5012_v56 = vpop.permute.xlu1 %1572  ;;  %v281_v16 = vsel %vm278_vm2, %v279_v3, %v7119_v31  ;;  %v253_v3 = vmul.f32 %v4671_v24, %v4973_v11  ;;  %v319_v31 = vrot.slane %v304_v28, 2  ;;  %v5049_v24 = vrot.slane %v369_v12, 4 }
 0x1d5   : > { %7118 = vst [vmem:[#allocation129_spill] sm:$0xff] %v5012_v56  ;;  %v5032_v56 = vstv %s4970_s3  ;;  %v295_v29 = vadd.f32 %v281_v16, %v252_v21  ;;  %v7123_v28 = vrot.slane %v4981_v43, 2  ;;  %v5059_v16 = vrot.slane %v406_v32, 5  ;;  %s5610_s3 = sld [smem:[#allocation3 + $0x5d]] }
 0x1d6   : > { %v5025_v6 = vpop.permute.xlu0 %1596  ;;  %2301 = vrot.lane.b32.xlu1 %v2294_v17, %s4063_s22  ;;  %v2328_v17 = vmul.f32 %v2323_v34, %v5027_v30  ;;  %v5063_v21 = vmul.f32 %v4675_v14, %v4990_v10  ;;  %v271_v12 = vmul.f32 %v4680_v19, %v4951_v22  ;;  %v2329_v32 = vmul.f32 %v2323_v34, %v5047_v18 }
 0x1d7   : > { %7120 = vst [vmem:[#allocation130_spill] sm:$0xff] %v5025_v6  ;;  %v2327_v6 = vmul.f32 %v2323_v34, %v4892_v47  ;;  %v318_v15 = vsel %vm315_vm3, %v316_v60, %v7123_v28  ;;  %v5070_v60 = vmul.f32 %v4675_v14, %v4997_v58  ;;  %v7126_v22 = vrot.slane %v5023_v54, 2 }
 0x1d8   : > { %2303 = vrot.lane.b32.xlu0 %v2289_v51, %s4063_s22  ;;  %v5044_v37 = vpop.permute.xlu1 %1598  ;;  %v443_v51 = vmul.f32 %v4881_v63, %v5032_v56  ;;  %v332_v57 = vadd.f32 %v318_v15, %v295_v29  ;;  %v2342_v25 = vrot.slane %v2328_v17, 4  ;;  %v350_v29 = vrot.slane %v5063_v21, 3 }
 0x1d9   : > { %7122 = vst [vmem:[#allocation131_spill] sm:$0xff] %v5044_v37  ;;  %v296_v37 = vadd.f32 %v284_v44, %v253_v3  ;;  %v2340_v28 = vrot.slane %v2327_v6, 4  ;;  %v321_v44 = vsel %vm315_vm3, %v319_v31, %v7126_v22  ;;  %v254_v6 = vmul.f32 %v4881_v63, %v4973_v11 }
 0x1da   : > { %v5057_v40 = vpop.permute.xlu0 %1600  ;;  %2305 = vrot.lane.b32.xlu1 %v2293_v49, %s4063_s22  ;;  %v5077_v23 = vrot.slane %v443_v51, 6  ;;  %v287_v34 = vrot.slane %v271_v12, 1  ;;  %v308_v3 = vmul.f32 %v4680_v19, %v4965_v8  ;;  %v5096_v31 = vmul.f32 %v4675_v14, %v5032_v56 }
 0x1db   : > { %7124 = vst [vmem:[#allocation132_spill] sm:$0xff] %v5057_v40  ;;  %v2341_v17 = vsel %vm381_vm5, %v2337_v5, %v2340_v28  ;;  %v2344_v51 = vrot.slane %v2329_v32, 4  ;;  %v2375_v15 = vmul.f32 %v4881_v63, %v2374_v13  ;;  %v333_v22 = vadd.f32 %v321_v44, %v296_v37 }
 0x1dc   : > { %2346 = vrot.lane.b32.xlu0 %v2336_v62, %s4063_s22  ;;  %v5074_v40 = vpop.permute.xlu1 %1620  ;;  %v7128_v21 = vrot.slane %v5008_v53, 3  ;;  %v5114_v32 = vmul.f32 %v4680_v19, %v4990_v10  ;;  %v7131_v44 = vrot.slane %v4985_v39, 1  ;;  %v7135_v4 = vrot.slane %v5023_v54, 2 }
 0x1dd   : > { %7125 = vst [vmem:[#allocation133_spill] sm:$0xff] %v5074_v40  ;;  %v2343_v40 = vsel %vm381_vm5, %v2336_v62, %v2342_v25  ;;  %v2345_v10 = vsel %vm381_vm5, %v2340_v28, %v2344_v51  ;;  %v2387_v0 = vrot.slane %v2375_v15, 5  ;;  %v372_v28 = vmul.f32 %v4680_v19, %v4997_v58 }
 0x1de   : > { %v5088_v49 = vpop.permute.xlu0 %1622  ;;  %2348 = vrot.lane.b32.xlu1 %v2337_v5, %s4063_s22  ;;  %v361_v12 = vadd.f32 %v7128_v21, %v332_v57  ;;  %v297_v5 = vadd.f32 %v7129_v9, %v254_v6  ;;  %v324_v57 = vrot.slane %v308_v3, 2  ;;  %v288_v25 = vsel %vm278_vm2, %v7131_v44, %v287_v34 }
 0x1df   : > { %7127 = vst [vmem:[#allocation134_spill] sm:$0xff] %v5088_v49  ;;  %v383_v49 = vrot.slane %v5070_v60, 4  ;;  %v255_v60 = vmul.f32 %v4675_v14, %v4973_v11  ;;  %v257_v9 = vmul.f32 %v4680_v19, %v4973_v11  ;;  %v2378_v6 = vmul.f32 %v2374_v13, %v4892_v47 }
 0x1e0   : > { %2350 = vrot.lane.b32.xlu0 %v2336_v62, %s4063_s22  ;;  %v5104_v8 = vpop.permute.xlu1 %1624  ;;  %v2376_v62 = vmul.f32 %v2374_v13, %v4878_v35  ;;  %v362_v3 = vadd.f32 %v350_v29, %v333_v22  ;;  %v5131_v14 = vadd.f32 %v5049_v24, %v361_v12  ;;  %v7133_v44 = vrot.slane %v4981_v43, 2  ;;  %v3915_v22 = vld [vmem:[#allocation2 + $0x30] sm:$0x7] }
 0x1e1   : > { %v298_v15 = vadd.f32 %v288_v25, %v255_v60  ;;  %v373_v12 = vmul.f32 %v3915_v22, %v4997_v58  ;;  %v325_v43 = vsel %vm315_vm3, %v7135_v4, %v324_v57  ;;  %v409_v54 = vmul.f32 %v4680_v19, %v5000_v45 }
 0x1e2   : > { %v5116_v37 = vpop.permute.xlu0 %1648  ;;  %2352 = vrot.lane.b32.xlu1 %v2341_v17, %s4063_s22  ;;  %v2379_v17 = vmul.f32 %v2374_v13, %v5027_v30  ;;  %v334_v11 = vadd.f32 %v7133_v44, %v297_v5  ;;  %v2388_v39 = vrot.slane %v2376_v62, 5  ;;  %v300_v5 = vadd.f32 %v287_v34, %v257_v9 }
 0x1e3   : > { %7130 = vst [vmem:[#allocation135_spill] sm:$0xff] %v5116_v37  ;;  %v2380_v44 = vmul.f32 %v2374_v13, %v5047_v18  ;;  %v399_v37 = vadd.f32 %v383_v49, %v362_v3  ;;  %v335_v4 = vadd.f32 %v325_v43, %v298_v15  ;;  %v388_v9 = vrot.slane %v373_v12, 4 }
 0x1e4   : > { %2354 = vrot.lane.b32.xlu0 %v2343_v40, %s4063_s22  ;;  %v5134_v21 = vpop.permute.xlu1 %1650  ;;  %v353_v40 = vrot.slane %v5114_v32, 3  ;;  %v2391_v32 = vrot.slane %v2378_v6, 5  ;;  %v2393_v25 = vrot.slane %v2379_v17, 5  ;;  %v337_v13 = vadd.f32 %v324_v57, %v300_v5 }
 0x1e5   : > { %7132 = vst [vmem:[#allocation136_spill] sm:$0xff] %v5134_v21  ;;  %v2425_v21 = vstv %s5107_s17  ;;  %v2395_v6 = vrot.slane %v2380_v44, 5  ;;  %v7137_v17 = vrot.slane %v5008_v53, 3  ;;  %v411_v15 = vmul.f32 %v4741_v1, %v5000_v45  ;;  %s5657_s17 = sld [smem:[#allocation3 + $0x4d]] }
 0x1e6   : > { %v5142_v51 = vpop.permute.xlu0 %1652  ;;  %2356 = vrot.lane.b32.xlu1 %v2345_v10, %s4063_s22  ;;  %v386_v10 = vrot.slane %v372_v28, 4  ;;  %v354_v34 = vsel %vm348_vm4, %v350_v29, %v353_v40  ;;  %v2426_v3 = vmul.f32 %v4881_v63, %v2425_v21  ;;  %v2394_v29 = vsel %vm418_vm6, %v2387_v0, %v2393_v25 }
 0x1e7   : > { %7134 = vst [vmem:[#allocation137_spill] sm:$0xff] %v5142_v51  ;;  %v374_v51 = vmul.f32 %v4741_v1, %v4997_v58  ;;  %v2392_v58 = vsel %vm418_vm6, %v2388_v39, %v2391_v32  ;;  %v363_v28 = vadd.f32 %v7137_v17, %v334_v11  ;;  %v423_v12 = vrot.slane %v409_v54, 5 }
 0x1e8   : > { %2397 = vrot.lane.b32.xlu0 %v2387_v0, %s4063_s22  ;;  %v5153_v60 = vpop.permute.xlu1 %1676  ;;  %v446_v57 = vmul.f32 %v4680_v19, %v5032_v56  ;;  %v410_v5 = vmul.f32 %v3915_v22, %v5000_v45  ;;  %v364_v53 = vadd.f32 %v354_v34, %v335_v4  ;;  %v389_v11 = vsel %vm381_vm5, %v5049_v24, %v388_v9 }
 0x1e9   : > { %7136 = vst [vmem:[#allocation138_spill] sm:$0xff] %v5153_v60  ;;  %v390_v60 = vrot.slane %v374_v51, 4  ;;  %v2427_v51 = vmul.f32 %v2425_v21, %v4878_v35  ;;  %v366_v17 = vadd.f32 %v353_v40, %v337_v13  ;;  %v2438_v19 = vrot.slane %v2426_v3, 6 }
 0x1ea   : > { %v5158_v62 = vpop.permute.xlu0 %1678  ;;  %2399 = vrot.lane.b32.xlu1 %v2388_v39, %s4063_s22  ;;  %v387_v39 = vsel %vm381_vm5, %v383_v49, %v386_v10  ;;  %v2429_v49 = vmul.f32 %v2425_v21, %v4892_v47  ;;  %v427_v25 = vrot.slane %v411_v15, 5  ;;  %v448_v54 = vmul.f32 %v4741_v1, %v5032_v56 }
 0x1eb   : > { %v391_v45 = vsel %vm381_vm5, %v386_v10, %v390_v60  ;;  %v2430_v34 = vmul.f32 %v2425_v21, %v5027_v30  ;;  %v400_v40 = vadd.f32 %v5049_v24, %v363_v28  ;;  %v425_v9 = vrot.slane %v410_v5, 5 }
 0x1ec   : > { %2401 = vrot.lane.b32.xlu0 %v2387_v0, %s4063_s22  ;;  %v5169_v43 = vpop.permute.xlu1 %1680  ;;  %v2396_v0 = vsel %vm418_vm6, %v2391_v32, %v2395_v6  ;;  %v447_v32 = vmul.f32 %v3915_v22, %v5032_v56  ;;  %v401_v6 = vadd.f32 %v387_v39, %v364_v53  ;;  %v7138_v60 = vrot.slane %v5084_v50, 5 }
 0x1ed   : > { %v2439_v1 = vrot.slane %v2427_v51, 6  ;;  %v402_v3 = vadd.f32 %v389_v11, %v363_v28  ;;  %v403_v15 = vadd.f32 %v391_v45, %v366_v17  ;;  %v2431_v24 = vmul.f32 %v2425_v21, %v5047_v18 }
 0x1ee   : > { %v5176_v44 = vpop.permute.xlu0 %1704  ;;  %2403 = vrot.lane.b32.xlu1 %v2392_v58, %s4063_s22  ;;  %v460_v58 = vrot.slane %v446_v57, 6  ;;  %v424_v10 = vsel %vm418_vm6, %v7138_v60, %v423_v12  ;;  %v428_v56 = vsel %vm418_vm6, %v423_v12, %v427_v25  ;;  %v464_v22 = vrot.slane %v448_v54, 6 }
 0x1ef   : > { %v2444_v57 = vrot.slane %v2430_v34, 6  ;;  %v7139_v39 = vmov %v7138_v60  ;;  %v426_v51 = vsel %vm418_vm6, %v5059_v16, %v425_v9  ;;  %v462_v28 = vrot.slane %v447_v32, 6 }
 0x1f0   : > { %2405 = vrot.lane.b32.xlu0 %v2394_v29, %s4063_s22  ;;  %v5188_v4 = vpop.permute.xlu1 %1706  ;;  %v2442_v29 = vrot.slane %v2429_v49, 6  ;;  %v436_v53 = vadd.f32 %v7139_v39, %v399_v37  ;;  %v435_v21 = vadd.f32 %v5059_v16, %v5131_v14  ;;  %v437_v12 = vadd.f32 %v5059_v16, %v400_v40 }
 0x1f1   : > { %v438_v17 = vadd.f32 %v424_v10, %v401_v6  ;;  %v7140_v50 = vrot.slane %v5096_v31, 6  ;;  %v2446_v45 = vrot.slane %v2431_v24, 6  ;;  %v439_v25 = vadd.f32 %v426_v51, %v402_v3 }
 0x1f2   : > { %v5195_v13 = vpop.permute.xlu0 %1708  ;;  %2407 = vrot.lane.b32.xlu1 %v2396_v0, %s4063_s22  ;;  %v440_v0 = vadd.f32 %v428_v56, %v403_v15  ;;  %v2443_v49 = vsel %vm455_vm7, %v2439_v1, %v2442_v29  ;;  %v465_v54 = vsel %vm455_vm7, %v460_v58, %v464_v22  ;;  %v2445_v16 = vsel %vm455_vm7, %v2438_v19, %v2444_v57 }
 0x1f3   : > { %v461_v37 = vsel %vm455_vm7, %v7140_v50, %v460_v58  ;;  %v5228_v14 = vstv %s5191_s23  ;;  %v7141_v40 = vmov %v7140_v50  ;;  %v463_v32 = vsel %vm455_vm7, %v5077_v23, %v462_v28  ;;  %s5664_s23 = sld [smem:[#allocation3 + $0x54]] }
 0x1f4   : > { %2448 = vrot.lane.b32.xlu0 %v2438_v19, %s4063_s22  ;;  %v5204_v5 = vpop.permute.xlu1 %1727  ;;  %v473_v9 = vadd.f32 %v7141_v40, %v436_v53  ;;  %v472_v60 = vadd.f32 %v5077_v23, %v435_v21  ;;  %v474_v10 = vadd.f32 %v5077_v23, %v437_v12  ;;  %v475_v58 = vadd.f32 %v461_v37, %v438_v17  ;;  %v7145_v40 = vld [vmem:[#allocation14_spill] sm:$0xff] }
 0x1f5   : > { %v2447_v31 = vsel %vm455_vm7, %v2442_v29, %v2446_v45  ;;  %v2477_v3 = vmul.f32 %v5228_v14, %v4862_v20  ;;  %v506_v15 = vsel %vm504_vm8, %v4386_v27, %v4395_v36  ;;  %v476_v23 = vadd.f32 %v463_v32, %v439_v25  ;;  %v7142_v45 = vld [vmem:[#allocation13_spill] sm:$0xff]  ;;  %v7143_v25 = vld [vmem:[#allocation12_spill] sm:$0xff] }
 0x1f6   : > { %v5210_v11 = vpop.permute.xlu0 %1729  ;;  %2450 = vrot.lane.b32.xlu1 %v2439_v1, %s4063_s22  ;;  %v477_v1 = vadd.f32 %v465_v54, %v440_v0  ;;  %v515_v56 = vadd.f32 %v4391_v33, %v473_v9  ;;  %v2517_v57 = vstv %s5212_s28  ;;  %v517_v39 = vadd.f32 %v4395_v36, %v475_v58  ;;  %s5699_s28 = sld [smem:[#allocation3 + $0x5b]] }
 0x1f7   : > { %v556_v53 = vsel %vm504_vm8, %v4404_v42, %v4418_v52  ;;  %v2478_v27 = vmul.f32 %v5228_v14, %v4870_v7  ;;  %v2479_v36 = vmul.f32 %v4881_v63, %v5228_v14  ;;  %v557_v42 = vsel %vm504_vm8, %v4413_v48, %v4425_v59 }
 0x1f8   : > { %2452 = vrot.lane.b32.xlu0 %v2438_v19, %s4063_s22  ;;  %v5224_v34 = vpop.permute.xlu1 %1731  ;;  %v505_v19 = vsel %vm504_vm8, %v4383_v26, %v4391_v33  ;;  %v507_v26 = vsel %vm504_vm8, %v4397_v38, %v4402_v41  ;;  %v516_v33 = vadd.f32 %v506_v15, %v474_v10  ;;  %v519_v51 = vadd.f32 %v4402_v41, %v477_v1  ;;  %v7146_v15 = vld [vmem:[#allocation17_spill] sm:$0xff] }
 0x1f9   : > { %v514_v29 = vadd.f32 %v505_v19, %v472_v60  ;;  %v558_v38 = vsel %vm504_vm8, %v4420_v55, %v4410_v46  ;;  %v518_v28 = vadd.f32 %v507_v26, %v476_v23  ;;  %v2518_v12 = vmul.f32 %v2517_v57, %v4862_v20  ;;  %v7147_v23 = vld [vmem:[#allocation16_spill] sm:$0xff] }
 0x1fa   : > { %v5234_v6 = vpop.permute.xlu0 %1755  ;;  %2454 = vrot.lane.b32.xlu1 %v2443_v49, %s4063_s22  ;;  %v2520_v41 = vmul.f32 %v4881_v63, %v2517_v57  ;;  %v570_v17 = vadd.f32 %v4410_v46, %v519_v51  ;;  %v566_v55 = vadd.f32 %v4418_v52, %v515_v56  ;;  %v607_v37 = vsel %vm504_vm8, %v4428_v61, %v4435_v2 }
 0x1fb   : > { %v565_v50 = vadd.f32 %v556_v53, %v514_v29  ;;  %v569_v48 = vadd.f32 %v558_v38, %v518_v28  ;;  %v568_v49 = vadd.f32 %v4425_v59, %v517_v39  ;;  %v608_v54 = vsel %vm504_vm8, %v7143_v25, %v7142_v45  ;;  %v7148_v39 = vld [vmem:[#allocation19_spill] sm:$0xff]  ;;  %v7149_v53 = vld [vmem:[#allocation18_spill] sm:$0xff] }
 0x1fc   : > { %2456 = vrot.lane.b32.xlu0 %v2445_v16, %s4063_s22  ;;  %v5249_v24 = vpop.permute.xlu1 %1757  ;;  %v2480_v46 = vmul.f32 %v5228_v14, %v4878_v35  ;;  %v567_v52 = vadd.f32 %v557_v42, %v516_v33  ;;  %v7144_v16 = vld [vmem:[#allocation15_spill] sm:$0xff]  ;;  %v2519_v9 = vmul.f32 %v2517_v57, %v4870_v7  ;;  %v2521_v59 = vmul.f32 %v2517_v57, %v4878_v35  ;;  %v7151_v33 = vld [vmem:[#allocation20_spill] sm:$0xff]  ;;  %v7153_v42 = vld [vmem:[#allocation22_spill] sm:$0xff] }
 0x1fd   : > { %v609_v61 = vsel %vm504_vm8, %v7145_v40, %v7144_v16  ;;  %v616_v32 = vadd.f32 %v607_v37, %v565_v50  ;;  %v617_v60 = vadd.f32 %v4435_v2, %v566_v55  ;;  %v2530_v58 = vrot.slane %v2518_v12, 1  ;;  %v7152_v28 = vld [vmem:[#allocation23_spill] sm:$0xff] }
 0x1fe   : > { %v5255_v22 = vpop.permute.xlu0 %1759  ;;  %2458 = vrot.lane.b32.xlu1 %v2447_v31, %s4063_s22  ;;  %s5286_s22 = sld [smem:[#allocation3 + $0x41]]  ;;  %v5304_v19 = vrot.slane %v2520_v41, 1  ;;  %v618_v1 = vadd.f32 %v608_v54, %v567_v52  ;;  %v619_v31 = vadd.f32 %v7142_v45, %v568_v49  ;;  %v650_v56 = vsel %vm504_vm8, %v7147_v23, %v7146_v15  ;;  %v7154_v54 = vld [vmem:[#allocation25_spill] sm:$0xff] }
 0x1ff   : > { %v620_v29 = vadd.f32 %v609_v61, %v569_v48  ;;  %v651_v2 = vsel %vm504_vm8, %v7149_v53, %v7148_v39  ;;  %v2482_v38 = vmul.f32 %v5228_v14, %v4892_v47  ;;  %v701_v12 = vsel %vm504_vm8, %v7153_v42, %v7152_v28 }
 0x200   : > { %2489 = vrot.lane.b32.xlu0 %v2477_v3, %s4064_s27  ;;  %v5275_v21 = vpop.permute.xlu1 %1783  ;;  %v621_v3 = vadd.f32 %v7144_v16, %v570_v17  ;;  %v2533_v41 = vrot.slane %v2519_v9, 1  ;;  %v2534_v17 = vrot.slane %v2521_v59, 1  ;;  %v5327_v50 = vmul.f32 %v2517_v57, %v4892_v47  ;;  %v7156_v9 = vld [vmem:[#allocation27_spill] sm:$0xff]  ;;  %v7157_v59 = vld [vmem:[#allocation26_spill] sm:$0xff] }
 0x201   : > { %v659_v55 = vadd.f32 %v650_v56, %v616_v32  ;;  %v660_v37 = vadd.f32 %v7146_v15, %v617_v60  ;;  %v662_v48 = vadd.f32 %v7148_v39, %v619_v31  ;;  %v2532_v14 = vsel %vm278_vm2, %v2530_v58, %v5304_v19  ;;  %v7158_v58 = vld [vmem:[#allocation29_spill] sm:$0xff] }
 0x202   : > { %v5284_v0 = vpop.permute.xlu0 %1785  ;;  %2491 = vrot.lane.b32.xlu1 %v2478_v27, %s4064_s27  ;;  %v7150_v27 = vld [vmem:[#allocation21_spill] sm:$0xff]  ;;  %v661_v45 = vadd.f32 %v651_v2, %v618_v1  ;;  %v703_v32 = vsel %vm504_vm8, %v7157_v59, %v7156_v9  ;;  %v7159_v1 = vld [vmem:[#allocation28_spill] sm:$0xff]  ;;  %v2538_v15 = vrot.slane %v5327_v50, 1 }
 0x203   : > { %v652_v51 = vsel %vm504_vm8, %v7151_v33, %v7150_v27  ;;  %v664_v25 = vadd.f32 %v7150_v27, %v621_v3  ;;  %v710_v40 = vadd.f32 %v701_v12, %v659_v55  ;;  %v711_v61 = vadd.f32 %v7152_v28, %v660_v37  ;;  %v7160_v33 = vld [vmem:[#allocation31_spill] sm:$0xff]  ;;  %v7163_v50 = vld [vmem:[#allocation32_spill] sm:$0xff]  ;;  %v7165_v37 = vld [vmem:[#allocation34_spill] sm:$0xff] }
 0x204   : > { %2493 = vrot.lane.b32.xlu0 %v2479_v36, %s4064_s27  ;;  %v5302_v10 = vpop.permute.xlu1 %1787  ;;  %v2568_v57 = vstv %s5286_s22  ;;  %v663_v16 = vadd.f32 %v652_v51, %v620_v29  ;;  %v713_v60 = vadd.f32 %v7154_v54, %v662_v48  ;;  %v752_v31 = vsel %vm504_vm8, %v7159_v1, %v7158_v58  ;;  %v7161_v51 = vld [vmem:[#allocation30_spill] sm:$0xff]  ;;  %v7164_v55 = vld [vmem:[#allocation35_spill] sm:$0xff]  ;;  %s5752_s22 = sld [smem:[#allocation3 + $0x34]] }
 0x205   : > { %v2535_v3 = vsel %vm278_vm2, %v2533_v41, %v2534_v17  ;;  %v2569_v29 = vmul.f32 %v2568_v57, %v4862_v20  ;;  %v2571_v39 = vmul.f32 %v4881_v63, %v2568_v57  ;;  %v715_v2 = vadd.f32 %v7156_v9, %v664_v25  ;;  %v7162_v41 = vld [vmem:[#allocation33_spill] sm:$0xff]  ;;  %v7168_v1 = vld [vmem:[#allocation39_spill] sm:$0xff] }
 0x206   : > { %v5311_v26 = vpop.permute.xlu0 %1807  ;;  %2495 = vrot.lane.b32.xlu1 %v2480_v46, %s4064_s27  ;;  %v714_v53 = vadd.f32 %v703_v32, %v663_v16  ;;  %v762_v27 = vadd.f32 %v7158_v58, %v711_v61  ;;  %v761_v42 = vadd.f32 %v752_v31, %v710_v40  ;;  %v764_v12 = vadd.f32 %v7160_v33, %v713_v60 }
 0x207   : > { %v754_v20 = vsel %vm504_vm8, %v7163_v50, %v7162_v41  ;;  %v803_v48 = vsel %vm504_vm8, %v7165_v37, %v7164_v55  ;;  %v766_v40 = vadd.f32 %v7162_v41, %v715_v2  ;;  %v2581_v9 = vrot.slane %v2569_v29, 2  ;;  %v7170_v2 = vld [vmem:[#allocation41_spill] sm:$0xff] }
 0x208   : > { %2497 = vrot.lane.b32.xlu0 %v2479_v36, %s4064_s27  ;;  %v5331_v49 = vpop.permute.xlu1 %1809  ;;  %v7155_v36 = vld [vmem:[#allocation24_spill] sm:$0xff]  ;;  %v5384_v59 = vrot.slane %v2571_v39, 2  ;;  %v765_v32 = vadd.f32 %v754_v20, %v714_v53  ;;  %v812_v60 = vadd.f32 %v803_v48, %v761_v42  ;;  %v813_v58 = vadd.f32 %v7164_v55, %v762_v27  ;;  %v7172_v39 = vld [vmem:[#allocation43_spill] sm:$0xff]  ;;  %v7174_v27 = vld [vmem:[#allocation45_spill] sm:$0xff] }
 0x209   : > { %v702_v46 = vsel %vm504_vm8, %v7155_v36, %v7154_v54  ;;  %v2539_v54 = vsel %vm278_vm2, %v2534_v17, %v2538_v15  ;;  %v2570_v36 = vmul.f32 %v2568_v57, %v4870_v7  ;;  %v7169_v17 = vld [vmem:[#allocation38_spill] sm:$0xff]  ;;  %v817_v55 = vadd.f32 %v7168_v1, %v766_v40 }
 0x20a   : > { %v5339_v52 = vpop.permute.xlu0 %1811  ;;  %2499 = vrot.lane.b32.xlu1 %v2482_v38, %s4064_s27  ;;  %v712_v23 = vadd.f32 %v702_v46, %v661_v45  ;;  %v753_v38 = vsel %vm504_vm8, %v7161_v51, %v7160_v33  ;;  %v7167_v45 = vld [vmem:[#allocation36_spill] sm:$0xff]  ;;  %v2572_v46 = vmul.f32 %v2568_v57, %v4878_v35  ;;  %v805_v7 = vsel %vm504_vm8, %v7169_v17, %v7168_v1  ;;  %v7173_v51 = vld [vmem:[#allocation42_spill] sm:$0xff] }
 0x20b   : > { %v7171_v33 = vld [vmem:[#allocation40_spill] sm:$0xff]  ;;  %v846_v53 = vsel %vm844_vm9, %v7173_v51, %v7172_v39  ;;  %v2584_v41 = vrot.slane %v2570_v36, 2  ;;  %v816_v20 = vadd.f32 %v805_v7, %v765_v32  ;;  %v855_v37 = vadd.f32 %v7170_v2, %v813_v58  ;;  %v7177_v36 = vld [vmem:[#allocation46_spill] sm:$0xff]  ;;  %v7179_v58 = vld [vmem:[#allocation49_spill] sm:$0xff] }
 0x20c   : > { %2540 = vrot.lane.b32.xlu0 %v2532_v14, %s4064_s27  ;;  %v5354_v56 = vpop.permute.xlu1 %1835  ;;  %v7166_v14 = vld [vmem:[#allocation37_spill] sm:$0xff]  ;;  %v763_v16 = vadd.f32 %v753_v38, %v712_v23  ;;  %v845_v29 = vsel %vm844_vm9, %v7171_v33, %v7170_v2  ;;  %v7175_v38 = vld [vmem:[#allocation44_spill] sm:$0xff]  ;;  %v2585_v50 = vrot.slane %v2572_v46, 2  ;;  %v859_v40 = vadd.f32 %v7174_v27, %v817_v55  ;;  %v7182_v17 = vld [vmem:[#allocation50_spill] sm:$0xff] }
 0x20d   : > { %v804_v25 = vsel %vm504_vm8, %v7167_v45, %v7166_v14  ;;  %v815_v23 = vadd.f32 %v7166_v14, %v764_v12  ;;  %v847_v42 = vsel %vm844_vm9, %v7175_v38, %v7174_v27  ;;  %v5408_v12 = vmul.f32 %v2568_v57, %v4892_v47  ;;  %v7180_v1 = vld [vmem:[#allocation48_spill] sm:$0xff] }
 0x20e   : > { %v5363_v28 = vpop.permute.xlu0 %1837  ;;  %2542 = vrot.lane.b32.xlu1 %v2535_v3, %s4064_s27  ;;  %v814_v3 = vadd.f32 %v804_v25, %v763_v16  ;;  %v2583_v14 = vsel %vm315_vm3, %v2581_v9, %v5384_v59  ;;  %v854_v45 = vadd.f32 %v845_v29, %v812_v60  ;;  %v858_v16 = vadd.f32 %v847_v42, %v816_v20  ;;  %v7181_v60 = vld [vmem:[#allocation51_spill] sm:$0xff]  ;;  %v7186_v20 = vld [vmem:[#allocation54_spill] sm:$0xff] }
 0x20f   : > { %v897_v9 = vsel %vm844_vm9, %v7180_v1, %v7179_v58  ;;  %v898_v7 = vsel %vm844_vm9, %v7182_v17, %v7181_v60  ;;  %v2586_v33 = vsel %vm315_vm3, %v2584_v41, %v2585_v50  ;;  %v2589_v29 = vrot.slane %v5408_v12, 2  ;;  %v7185_v42 = vld [vmem:[#allocation55_spill] sm:$0xff]  ;;  %v7192_v1 = vld [vmem:[#allocation60_spill] sm:$0xff] }
 0x210   : > { %2544 = vrot.lane.b32.xlu0 %v5304_v19, %s4064_s27  ;;  %v5382_v61 = vpop.permute.xlu1 %1839  ;;  %v856_v25 = vadd.f32 %v846_v53, %v814_v3  ;;  %v7183_v3 = vld [vmem:[#allocation53_spill] sm:$0xff]  ;;  %v910_v38 = vadd.f32 %v7181_v60, %v859_v40  ;;  %v948_v55 = vsel %vm844_vm9, %v7186_v20, %v7185_v42  ;;  %v909_v12 = vadd.f32 %v898_v7, %v858_v16  ;;  %v7197_v20 = vld [vmem:[#allocation64_spill] sm:$0xff] }
 0x211   : > { %v2590_v16 = vsel %vm315_vm3, %v2585_v50, %v2589_v29  ;;  %v7196_v50 = vld [vmem:[#allocation65_spill] sm:$0xff] }
 0x212   : > { %v5392_v31 = vpop.permute.xlu0 %1863  ;;  %2546 = vrot.lane.b32.xlu1 %v2539_v54, %s4064_s27  ;;  %v857_v54 = vadd.f32 %v7172_v39, %v815_v23  ;;  %v7184_v23 = vld [vmem:[#allocation52_spill] sm:$0xff]  ;;  %v907_v27 = vadd.f32 %v897_v9, %v856_v25 }
 0x213   : > { %v947_v2 = vsel %vm844_vm9, %v7184_v23, %v7183_v3  ;;  %v7194_v23 = vld [vmem:[#allocation62_spill] sm:$0xff] }
 0x214   : > { %2548 = vrot.lane.b32.xlu0 %v5304_v19, %s4064_s27  ;;  %v5412_v48 = vpop.permute.xlu1 %1865  ;;  %v7176_v19 = vld [vmem:[#allocation47_spill] sm:$0xff]  ;;  %v908_v51 = vadd.f32 %v7179_v58, %v857_v54  ;;  %v7191_v58 = vld [vmem:[#allocation61_spill] sm:$0xff] }
 0x215   : > { %v896_v57 = vsel %vm844_vm9, %v7177_v36, %v7176_v19  ;;  %v906_v32 = vadd.f32 %v7176_v19, %v855_v37  ;;  %v7187_v37 = vld [vmem:[#allocation57_spill] sm:$0xff]  ;;  %v7188_v19 = vld [vmem:[#allocation56_spill] sm:$0xff]  ;;  %v7189_v36 = vld [vmem:[#allocation59_spill] sm:$0xff]  ;;  %v991_v9 = vsel %vm844_vm9, %v7192_v1, %v7191_v58 }
 0x216   : > { %v5420_v46 = vpop.permute.xlu0 %1867  ;;  %2550 = vrot.lane.b32.xlu1 %v2538_v15, %s4064_s27  ;;  %v905_v39 = vadd.f32 %v896_v57, %v854_v45  ;;  %v2619_v15 = vstv %s5386_s30  ;;  %v7190_v57 = vld [vmem:[#allocation58_spill] sm:$0xff]  ;;  %v959_v40 = vadd.f32 %v7185_v42, %v908_v51  ;;  %v961_v7 = vadd.f32 %v7187_v37, %v910_v38  ;;  %s5754_s30 = sld [smem:[#allocation3 + $0x3b]] }
 0x217   : > { %7178 = vst [vmem:[#allocation13_spill] sm:$0xff] %v5420_v46  ;;  %v957_v54 = vadd.f32 %v7183_v3, %v906_v32  ;;  %v990_v25 = vsel %vm844_vm9, %v7190_v57, %v7189_v36  ;;  %v2620_v60 = vmul.f32 %v4881_v63, %v2619_v15  ;;  %v958_v32 = vadd.f32 %v948_v55, %v907_v27  ;;  %v7193_v3 = vld [vmem:[#allocation63_spill] sm:$0xff] }
 0x218   : > { %2591 = vrot.lane.b32.xlu0 %v2583_v14, %s4064_s27  ;;  %v5438_v53 = vpop.permute.xlu1 %1891  ;;  %v949_v14 = vsel %vm844_vm9, %v7188_v19, %v7187_v37  ;;  %v956_v45 = vadd.f32 %v947_v2, %v905_v39  ;;  %v992_v2 = vsel %vm844_vm9, %v7194_v23, %v7193_v3  ;;  %v1002_v42 = vadd.f32 %v7191_v58, %v959_v40  ;;  %v7199_v55 = vld [vmem:[#allocation67_spill] sm:$0xff]  ;;  %v7200_v37 = vld [vmem:[#allocation66_spill] sm:$0xff] }
 0x219   : > { %v960_v17 = vadd.f32 %v949_v14, %v909_v12  ;;  %v1000_v51 = vadd.f32 %v7189_v36, %v957_v54  ;;  %v1041_v63 = vsel %vm844_vm9, %v7197_v20, %v7196_v50  ;;  %v1001_v38 = vadd.f32 %v991_v9, %v958_v32  ;;  %v7201_v14 = vld [vmem:[#allocation69_spill] sm:$0xff]  ;;  %v7202_v12 = vld [vmem:[#allocation68_spill] sm:$0xff]  ;;  %v7203_v9 = vld [vmem:[#allocation71_spill] sm:$0xff] }
 0x21a   : > { %v5448_v41 = vpop.permute.xlu0 %1893  ;;  %2593 = vrot.lane.b32.xlu1 %v2586_v33, %s4064_s27  ;;  %v999_v39 = vadd.f32 %v990_v25, %v956_v45  ;;  %v1042_v19 = vsel %vm844_vm9, %v7200_v37, %v7199_v55  ;;  %v1043_v57 = vsel %vm844_vm9, %v7202_v12, %v7201_v14  ;;  %v2621_v45 = vmul.f32 %v2619_v15, %v4878_v35  ;;  %v7204_v32 = vld [vmem:[#allocation70_spill] sm:$0xff] }
 0x21b   : > { %v1003_v54 = vadd.f32 %v992_v2, %v960_v17  ;;  %v1004_v36 = vadd.f32 %v7193_v3, %v961_v7  ;;  %v2628_v25 = vrot.slane %v2620_v60, 3  ;;  %v5490_v40 = vmul.f32 %v2619_v15, %v4892_v47  ;;  %v7207_v15 = vld [vmem:[#allocation73_spill] sm:$0xff]  ;;  %v7208_v3 = vld [vmem:[#allocation72_spill] sm:$0xff]  ;;  %v7214_v12 = vld [vmem:[#allocation78_spill] sm:$0xff] }
 0x21c   : > { %2595 = vrot.lane.b32.xlu0 %v5384_v59, %s4064_s27  ;;  %v5467_v33 = vpop.permute.xlu1 %1895  ;;  %v1050_v58 = vadd.f32 %v1041_v63, %v999_v39  ;;  %v1051_v1 = vadd.f32 %v7196_v50, %v1000_v51  ;;  %v1092_v23 = vsel %vm844_vm9, %v7204_v32, %v7203_v9  ;;  %v1052_v35 = vadd.f32 %v1042_v19, %v1001_v38  ;;  %v7209_v39 = vld [vmem:[#allocation75_spill] sm:$0xff]  ;;  %v7210_v51 = vld [vmem:[#allocation74_spill] sm:$0xff]  ;;  %v7211_v38 = vld [vmem:[#allocation77_spill] sm:$0xff] }
 0x21d   : > { %7195 = vst [vmem:[#allocation12_spill] sm:$0xff] %v5467_v33  ;;  %v1053_v17 = vadd.f32 %v7199_v55, %v1002_v42  ;;  %v1054_v7 = vadd.f32 %v1043_v57, %v1003_v54  ;;  %v1093_v2 = vsel %vm844_vm9, %v7208_v3, %v7207_v15  ;;  %v1094_v50 = vsel %vm844_vm9, %v7210_v51, %v7209_v39  ;;  %v7212_v55 = vld [vmem:[#allocation76_spill] sm:$0xff]  ;;  %v7215_v54 = vld [vmem:[#allocation81_spill] sm:$0xff] }
 0x21e   : > { %v5476_v27 = vpop.permute.xlu0 %2150  ;;  %2597 = vrot.lane.b32.xlu1 %v2590_v16, %s4064_s27  ;;  %v1102_v47 = vadd.f32 %v7203_v9, %v1051_v1  ;;  %v2629_v20 = vrot.slane %v2621_v45, 3  ;;  %v1101_v42 = vadd.f32 %v1092_v23, %v1050_v58  ;;  %v1143_v37 = vsel %vm844_vm9, %v7212_v55, %v7211_v38 }
 0x21f   : > { %7198 = vst [vmem:[#allocation15_spill] sm:$0xff] %v5476_v27  ;;  %v1104_v63 = vadd.f32 %v7207_v15, %v1053_v17  ;;  %v2632_v19 = vrot.slane %v5490_v40, 3  ;;  %v2662_v58 = vstv %s5469_s8  ;;  %v1103_v1 = vadd.f32 %v1093_v2, %v1052_v35  ;;  %s5799_s8 = sld [smem:[#allocation3 + $0x42]] }
 0x220   : > { %2599 = vrot.lane.b32.xlu0 %v5384_v59, %s4064_s27  ;;  %v5496_v16 = vpop.permute.xlu1 %2152  ;;  %v1055_v59 = vadd.f32 %v7201_v14, %v1004_v36  ;;  %v7213_v14 = vld [vmem:[#allocation79_spill] sm:$0xff]  ;;  %v7216_v36 = vld [vmem:[#allocation80_spill] sm:$0xff]  ;;  %v1105_v9 = vadd.f32 %v1094_v50, %v1054_v7  ;;  %v1152_v17 = vadd.f32 %v1143_v37, %v1101_v42  ;;  %v1153_v40 = vadd.f32 %v7211_v38, %v1102_v47 }
 0x221   : > { %7205 = vst [vmem:[#allocation14_spill] sm:$0xff] %v5496_v16  ;;  %v1144_v57 = vsel %vm844_vm9, %v7214_v12, %v7213_v14  ;;  %v1155_v15 = vadd.f32 %v7213_v14, %v1104_v63  ;;  %v2633_v55 = vsel %vm348_vm4, %v2629_v20, %v2632_v19  ;;  %v5533_v12 = vld [vmem:[#allocation2] sm:$0xff]  ;;  %v7221_v50 = vld [vmem:[#allocation83_spill] sm:$0xff] }
 0x222   : > { %v5500_v60 = vpop.permute.xlu0 %2154  ;;  %2601 = vrot.lane.b32.xlu1 %v2589_v29, %s4064_s27  ;;  %v1145_v29 = vsel %vm844_vm9, %v7216_v36, %v7215_v54  ;;  %v1106_v23 = vadd.f32 %v7209_v39, %v1055_v59  ;;  %v1154_v3 = vadd.f32 %v1144_v57, %v1103_v1  ;;  %v2663_v35 = vmul.f32 %v5533_v12, %v2662_v58  ;;  %v7219_v59 = vld [vmem:[#allocation82_spill] sm:$0xff]  ;;  %v7222_v38 = vld [vmem:[#allocation84_spill] sm:$0xff]  ;;  %v7224_v57 = vld [vmem:[#allocation85_spill] sm:$0xff] }
 0x223   : > { %7206 = vst [vmem:[#allocation17_spill] sm:$0xff] %v5500_v60  ;;  %v1156_v51 = vadd.f32 %v1145_v29, %v1105_v9  ;;  %v1175_v2 = vadd.f32 %v7219_v59, %v1152_v17  ;;  %v1176_v47 = vadd.f32 %v7219_v59, %v1153_v40  ;;  %v1178_v63 = vadd.f32 %v7221_v50, %v1155_v15  ;;  %v5552_v29 = vld [vmem:[#allocation2 + $0x58] sm:$0xff]  ;;  %v7225_v9 = vld [vmem:[#allocation86_spill] sm:$0xff]  ;;  %v5560_v15 = vld [vmem:[#allocation2 + $0x68] sm:$0xff] }
 0x224   : > { %2634 = vrot.lane.b32.xlu0 %v2628_v25, %s4064_s27  ;;  %v5522_v45 = vpop.permute.xlu1 %2156  ;;  %v1157_v7 = vadd.f32 %v7215_v54, %v1106_v23  ;;  %v1177_v42 = vadd.f32 %v7221_v50, %v1154_v3  ;;  %v2664_v1 = vmul.f32 %v5552_v29, %v2662_v58  ;;  %v2675_v40 = vrot.slane %v2663_v35, 4  ;;  %v7227_v59 = vld [vmem:[#allocation88_spill] sm:$0xff] }
 0x225   : > { %7217 = vst [vmem:[#allocation16_spill] sm:$0xff] %v5522_v45  ;;  %v1203_v54 = vadd.f32 %v7224_v57, %v1175_v2  ;;  %v1204_v36 = vadd.f32 %v7224_v57, %v1176_v47  ;;  %v1206_v17 = vadd.f32 %v7225_v9, %v1178_v63  ;;  %v2666_v3 = vmul.f32 %v5560_v15, %v2662_v58  ;;  %v7229_v63 = vld [vmem:[#allocation89_spill] sm:$0xff]  ;;  %v7231_v57 = vld [vmem:[#allocation90_spill] sm:$0xff] }
 0x226   : > { %v5525_v32 = vpop.permute.xlu0 %2158  ;;  %2636 = vrot.lane.b32.xlu1 %v2629_v20, %s4064_s27  ;;  %v1179_v20 = vadd.f32 %v7222_v38, %v1156_v51  ;;  %v1180_v14 = vadd.f32 %v7222_v38, %v1157_v7  ;;  %v1205_v23 = vadd.f32 %v7225_v9, %v1177_v42  ;;  %v7226_v51 = vld [vmem:[#allocation87_spill] sm:$0xff]  ;;  %v2667_v50 = vmul.f32 %v2662_v58, %v5027_v30 }
 0x227   : > { %7218 = vst [vmem:[#allocation19_spill] sm:$0xff] %v5525_v32  ;;  %v1231_v2 = vadd.f32 %v7227_v59, %v1203_v54  ;;  %v1232_v42 = vadd.f32 %v7227_v59, %v1204_v36  ;;  %v2676_v54 = vrot.slane %v2664_v1, 4  ;;  %v7233_v59 = vld [vmem:[#allocation92_spill] sm:$0xff] }
 0x228   : > { %2638 = vrot.lane.b32.xlu0 %v2628_v25, %s4064_s27  ;;  %v5539_v39 = vpop.permute.xlu1 %2160  ;;  %v1207_v7 = vadd.f32 %v7226_v51, %v1179_v20  ;;  %v1233_v38 = vadd.f32 %v7229_v63, %v1205_v23 }
 0x229   : > { %7220 = vst [vmem:[#allocation18_spill] sm:$0xff] %v5539_v39 }
 0x22a   : > { %v5546_v37 = vpop.permute.xlu0 %2201  ;;  %2640 = vrot.lane.b32.xlu1 %v2633_v55, %s4064_s27  ;;  %v1208_v55 = vadd.f32 %v7226_v51, %v1180_v14  ;;  %v1235_v9 = vadd.f32 %v7231_v57, %v1207_v7  ;;  %v7232_v14 = vld [vmem:[#allocation91_spill] sm:$0xff]  ;;  %v1257_v23 = vadd.f32 %v7233_v59, %v1233_v38  ;;  %v2668_v7 = vmul.f32 %v2662_v58, %v5047_v18  ;;  %v7237_v38 = vld [vmem:[#allocation94_spill] sm:$0xff] }
 0x22b   : > { %7223 = vst [vmem:[#allocation21_spill] sm:$0xff] %v5546_v37  ;;  %v1255_v51 = vadd.f32 %v7232_v14, %v1231_v2  ;;  %v1256_v36 = vadd.f32 %v7232_v14, %v1232_v42 }
 0x22c   : > { %2642 = vrot.lane.b32.xlu0 %v2628_v25, %s4064_s27  ;;  %v5566_v47 = vpop.permute.xlu1 %2203  ;;  %v1234_v25 = vadd.f32 %v7229_v63, %v1206_v17  ;;  %v1236_v20 = vadd.f32 %v7231_v57, %v1208_v55  ;;  %v2679_v17 = vrot.slane %v2666_v3, 4  ;;  %v2681_v63 = vrot.slane %v2667_v50, 4 }
 0x22d   : > { %7228 = vst [vmem:[#allocation20_spill] sm:$0xff] %v5566_v47  ;;  %v2713_v57 = vstv %s5541_s26  ;;  %v1284_v37 = vadd.f32 %v7237_v38, %v1256_v36  ;;  %v7238_v47 = vld [vmem:[#allocation95_spill] sm:$0xff]  ;;  %s5858_s26 = sld [smem:[#allocation3 + $0x49]] }
 0x22e   : > { %v5572_v35 = vpop.permute.xlu0 %2205  ;;  %2644 = vrot.lane.b32.xlu1 %v2632_v19, %s4064_s27  ;;  %v1258_v55 = vadd.f32 %v7233_v59, %v1234_v25  ;;  %v7235_v19 = vld [vmem:[#allocation93_spill] sm:$0xff]  ;;  %v1285_v3 = vadd.f32 %v7238_v47, %v1257_v23  ;;  %v5600_v25 = vstv %s5557_s18  ;;  %v2680_v50 = vsel %vm381_vm5, %v2676_v54, %v2679_v17  ;;  %v7239_v59 = vld [vmem:[#allocation96_spill] sm:$0xff]  ;;  %s5923_s18 = sld [smem:[#allocation3 + $0x57]] }
 0x22f   : > { %7230 = vst [vmem:[#allocation23_spill] sm:$0xff] %v5572_v35  ;;  %v1259_v1 = vadd.f32 %v7235_v19, %v1235_v9  ;;  %v1260_v42 = vadd.f32 %v7235_v19, %v1236_v20  ;;  %v1283_v35 = vadd.f32 %v7237_v38, %v1255_v51  ;;  %v2683_v9 = vrot.slane %v2668_v7, 4 }
 0x230   : > { %2685 = vrot.lane.b32.xlu0 %v2675_v40, %s4064_s27  ;;  %v5587_v2 = vpop.permute.xlu1 %2207  ;;  %v1286_v58 = vadd.f32 %v7238_v47, %v1258_v55  ;;  %v2714_v20 = vmul.f32 %v5533_v12, %v2713_v57  ;;  %v2682_v47 = vsel %vm381_vm5, %v2675_v40, %v2681_v63  ;;  %v7241_v55 = vld [vmem:[#allocation97_spill] sm:$0xff]  ;;  %v2718_v39 = vmul.f32 %v2713_v57, %v5027_v30 }
 0x231   : > { %7234 = vst [vmem:[#allocation22_spill] sm:$0xff] %v5587_v2  ;;  %v1287_v51 = vadd.f32 %v7239_v59, %v1259_v1  ;;  %v1288_v36 = vadd.f32 %v7239_v59, %v1260_v42  ;;  %v1311_v19 = vadd.f32 %v7241_v55, %v1283_v35  ;;  %v1312_v38 = vadd.f32 %v7241_v55, %v1284_v37  ;;  %v3919_v42 = vld [vmem:[#allocation2 + $0x40] sm:$0xe0] }
 0x232   : > { %v5592_v14 = vpop.permute.xlu0 %2209  ;;  %2687 = vrot.lane.b32.xlu1 %v2676_v54, %s4064_s27  ;;  %v5619_v1 = vstv %s5577_s19  ;;  %v1930_v59 = vmul.f32 %v3919_v42, %v5600_v25  ;;  %v2715_v37 = vmul.f32 %v5552_v29, %v2713_v57  ;;  %v5629_v35 = vstv %s5582_s24  ;;  %s5958_s19 = sld [smem:[#allocation3 + $0x5e]]  ;;  %s6000_s24 = sld [smem:[#allocation3 + $0x3c]] }
 0x233   : > { %7236 = vst [vmem:[#allocation25_spill] sm:$0xff] %v5592_v14  ;;  %v7242_v14 = vld [vmem:[#allocation98_spill] sm:$0xff]  ;;  %7244 = vst [vmem:[#allocation26_spill] sm:$0xff] %v5619_v1  ;;  %v2684_v63 = vsel %vm381_vm5, %v2679_v17, %v2683_v9  ;;  %v5647_v17 = vmul.f32 %v3919_v42, %v5619_v1  ;;  %v1968_v45 = vmul.f32 %v5533_v12, %v5629_v35 }
 0x234   : > { %2689 = vrot.lane.b32.xlu0 %v2675_v40, %s4064_s27  ;;  %v5607_v23 = vpop.permute.xlu1 %2211  ;;  %v1313_v54 = vadd.f32 %v7242_v14, %v1285_v3  ;;  %v1314_v7 = vadd.f32 %v7242_v14, %v1286_v58  ;;  %v1932_v40 = vmul.f32 %v5533_v12, %v5600_v25  ;;  %v2726_v14 = vrot.slane %v2714_v20, 5  ;;  %v7245_v58 = vld [vmem:[#allocation99_spill] sm:$0xff] }
 0x235   : > { %7240 = vst [vmem:[#allocation24_spill] sm:$0xff] %v5607_v23  ;;  %v5634_v3 = vmul.f32 %v5560_v15, %v2713_v57  ;;  %v1315_v55 = vadd.f32 %v7245_v58, %v1287_v51  ;;  %v5638_v23 = vld [vmem:[#allocation2 + $0x48] sm:$0xe0]  ;;  %7248 = vst [vmem:[#allocation28_spill] sm:$0xff] %v5647_v17  ;;  %v5655_v20 = vmul.f32 %v5552_v29, %v5600_v25 }
 0x236   : > { %v5616_v2 = vpop.permute.xlu0 %2252  ;;  %2691 = vrot.lane.b32.xlu1 %v2680_v50, %s4064_s27  ;;  %v1931_v50 = vmul.f32 %v5638_v23, %v5600_v25  ;;  %v5651_v9 = vmul.f32 %v5638_v23, %v5619_v1  ;;  %v5661_v30 = vrot.slane %v1932_v40, 1  ;;  %v2719_v40 = vmul.f32 %v2713_v57, %v5047_v18  ;;  %v7255_v18 = vld [vmem:[#allocation101_spill] sm:$0xff] }
 0x237   : > { %7243 = vst [vmem:[#allocation27_spill] sm:$0xff] %v5616_v2  ;;  %v1316_v2 = vadd.f32 %v7245_v58, %v1288_v36  ;;  %v1942_v36 = vrot.slane %v1930_v59, 1  ;;  %v2727_v58 = vrot.slane %v2715_v37, 5  ;;  %v2730_v59 = vrot.slane %v5634_v3, 5 }
 0x238   : > { %2693 = vrot.lane.b32.xlu0 %v2682_v47, %s4064_s27  ;;  %v5642_v32 = vpop.permute.xlu1 %2254  ;;  %v7247_v47 = vld [vmem:[#allocation100_spill] sm:$0xff]  ;;  %7249 = vst [vmem:[#allocation31_spill] sm:$0xff] %v5651_v9  ;;  %7251 = vst [vmem:[#allocation33_spill] sm:$0xff] %v5661_v30  ;;  %v2732_v37 = vrot.slane %v2718_v39, 5  ;;  %v1945_v16 = vrot.slane %v1931_v50, 1  ;;  %v5685_v9 = vmul.f32 %v5533_v12, %v5619_v1  ;;  %v1341_v57 = vadd.f32 %v7255_v18, %v1313_v54 }
 0x239   : > { %7246 = vst [vmem:[#allocation29_spill] sm:$0xff] %v5642_v32  ;;  %v1339_v60 = vadd.f32 %v7247_v47, %v1311_v19  ;;  %v1966_v19 = vmul.f32 %v3919_v42, %v5629_v35  ;;  %v1967_v32 = vmul.f32 %v5638_v23, %v5629_v35  ;;  %v5676_v42 = vmul.f32 %v5552_v29, %v5629_v35 }
 0x23a   : > { %v5659_v51 = vpop.permute.xlu0 %2256  ;;  %2695 = vrot.lane.b32.xlu1 %v2684_v63, %s4064_s27  ;;  %v2764_v63 = vstv %s5610_s3  ;;  %v1340_v27 = vadd.f32 %v7247_v47, %v1312_v38  ;;  %7253 = vst [vmem:[#allocation35_spill] sm:$0xff] %v5685_v9  ;;  %v1342_v17 = vadd.f32 %v7255_v18, %v1314_v7  ;;  %v5696_v39 = vstv %s5624_s16  ;;  %s6010_s3 = sld [smem:[#allocation3 + $0x35]]  ;;  %s6055_s16 = sld [smem:[#allocation3 + $0x43]] }
 0x23b   : > { %7250 = vst [vmem:[#allocation30_spill] sm:$0xff] %v5659_v51  ;;  %v1978_v38 = vrot.slane %v1966_v19, 2  ;;  %v2731_v50 = vsel %vm418_vm6, %v2727_v58, %v2730_v59  ;;  %v2734_v54 = vrot.slane %v2719_v40, 5  ;;  %v2765_v7 = vmul.f32 %v5533_v12, %v2764_v63 }
 0x23c   : > { %2736 = vrot.lane.b32.xlu0 %v2726_v14, %s4064_s27  ;;  %v5678_v51 = vpop.permute.xlu1 %2258  ;;  %v5704_v47 = vrot.slane %v1968_v45, 2  ;;  %v2733_v19 = vsel %vm418_vm6, %v2726_v14, %v2732_v37  ;;  %v7260_v9 = vrot.slane %v5655_v20, 1  ;;  %v2002_v45 = vmul.f32 %v5533_v12, %v5696_v39 }
 0x23d   : > { %7252 = vst [vmem:[#allocation32_spill] sm:$0xff] %v5678_v51  ;;  %v5693_v51 = vsel %vm278_vm2, %v1942_v36, %v5661_v30  ;;  %v1981_v36 = vrot.slane %v1967_v32, 2  ;;  %v5723_v32 = vmul.f32 %v5552_v29, %v5696_v39  ;;  %v5726_v18 = vstv %s5657_s17  ;;  %s6104_s17 = sld [smem:[#allocation3 + $0x4a]] }
 0x23e   : > { %v5687_v3 = vpop.permute.xlu0 %2260  ;;  %7256 = vst [vmem:[#allocation37_spill] sm:$0xff] %v5693_v51  ;;  %2738 = vrot.lane.b32.xlu1 %v2727_v58, %s4064_s27  ;;  %7257 = vst [vmem:[#allocation36_spill] sm:$0xff] %v5704_v47  ;;  %v5715_v58 = vsel %vm278_vm2, %v1945_v16, %v7260_v9  ;;  %v2735_v9 = vsel %vm418_vm6, %v2730_v59, %v2734_v54  ;;  %v2777_v37 = vrot.slane %v2765_v7, 6  ;;  %v5758_v7 = vrot.slane %v2002_v45, 3 }
 0x23f   : > { %7254 = vst [vmem:[#allocation34_spill] sm:$0xff] %v5687_v3  ;;  %v7259_v3 = vld [vmem:[#allocation102_spill] sm:$0xff]  ;;  %7261 = vst [vmem:[#allocation38_spill] sm:$0xff] %v5715_v58  ;;  %v7267_v58 = vrot.slane %v5676_v42, 2  ;;  %v5777_v45 = vstv %s5699_s28  ;;  %s6204_s28 = sld [smem:[#allocation3 + $0x5f]] }
 0x240   : > { %2740 = vrot.lane.b32.xlu0 %v2726_v14, %s4064_s27  ;;  %v5707_v33 = vpop.permute.xlu1 %2262  ;;  %v1343_v30 = vadd.f32 %v7259_v3, %v1315_v55  ;;  %v1344_v51 = vadd.f32 %v7259_v3, %v1316_v2  ;;  %7263 = vst [vmem:[#allocation40_spill] sm:$0xff] %v5723_v32  ;;  %7264 = vst [vmem:[#allocation43_spill] sm:$0xff] %v5726_v18  ;;  %v5729_v14 = vstv %s5664_s23  ;;  %v7265_v55 = vld [vmem:[#allocation103_spill] sm:$0xff]  ;;  %s6197_s23 = sld [smem:[#allocation3 + $0x58]] }
 0x241   : > { %7258 = vst [vmem:[#allocation39_spill] sm:$0xff] %v5707_v33  ;;  %v2766_v2 = vmul.f32 %v5552_v29, %v2764_v63  ;;  %v1362_v16 = vadd.f32 %v7265_v55, %v1339_v60  ;;  %v2768_v3 = vmul.f32 %v5560_v15, %v2764_v63  ;;  %v1363_v33 = vadd.f32 %v7265_v55, %v1340_v27  ;;  %v5749_v60 = vld [vmem:[#allocation2 + $0x70] sm:$0x7]  ;;  %v7271_v27 = vld [vmem:[#allocation104_spill] sm:$0xff] }
 0x242   : > { %v5719_v40 = vpop.permute.xlu0 %2295  ;;  %2742 = vrot.lane.b32.xlu1 %v2731_v50, %s4064_s27  ;;  %v5745_v50 = vsel %vm315_vm3, %v1981_v36, %v7267_v58  ;;  %7270 = vst [vmem:[#allocation47_spill] sm:$0xff] %v5749_v60  ;;  %v2769_v59 = vmul.f32 %v5749_v60, %v2764_v63  ;;  %v1364_v54 = vadd.f32 %v7271_v27, %v1341_v57  ;;  %7272 = vst [vmem:[#allocation46_spill] sm:$0xff] %v5758_v7  ;;  %v5780_v58 = vld [vmem:[#allocation2 + $0x78] sm:$0x7] }
 0x243   : > { %7262 = vst [vmem:[#allocation41_spill] sm:$0xff] %v5719_v40  ;;  %v5740_v40 = vsel %vm315_vm3, %v1978_v38, %v5704_v47  ;;  %7268 = vst [vmem:[#allocation45_spill] sm:$0xff] %v5745_v50  ;;  %v1365_v38 = vadd.f32 %v7271_v27, %v1342_v17  ;;  %v2030_v36 = vmul.f32 %v5533_v12, %v5726_v18  ;;  %v2778_v57 = vrot.slane %v2766_v2, 6  ;;  %v7279_v50 = vld [vmem:[#allocation105_spill] sm:$0xff] }
 0x244   : > { %2744 = vrot.lane.b32.xlu0 %v2733_v19, %s4064_s27  ;;  %7266 = vst [vmem:[#allocation42_spill] sm:$0xff] %v5740_v40  ;;  %v5747_v46 = vpop.permute.xlu1 %2297  ;;  %v5767_v55 = vmul.f32 %v5552_v29, %v5726_v18  ;;  %v5774_v17 = vmul.f32 %v5552_v29, %v5729_v14  ;;  %7276 = vst [vmem:[#allocation50_spill] sm:$0xff] %v5777_v45  ;;  %v2781_v27 = vrot.slane %v2768_v3, 6  ;;  %v2783_v47 = vrot.slane %v2769_v59, 6 }
 0x245   : > { %7269 = vst [vmem:[#allocation44_spill] sm:$0xff] %v5747_v46  ;;  %v2066_v46 = vmul.f32 %v5533_v12, %v5729_v14  ;;  %v5785_v7 = vmul.f32 %v5552_v29, %v5619_v1  ;;  %v5789_v2 = vmul.f32 %v5560_v15, %v5600_v25  ;;  %v1366_v40 = vadd.f32 %v7279_v50, %v1343_v30  ;;  %v7286_v1 = vld [vmem:[#allocation107_spill] sm:$0xff] }
 0x246   : > { %v5762_v19 = vpop.permute.xlu0 %2299  ;;  %7274 = vst [vmem:[#allocation48_spill] sm:$0xff] %v5767_v55  ;;  %2746 = vrot.lane.b32.xlu1 %v2735_v9, %s4064_s27  ;;  %7275 = vst [vmem:[#allocation51_spill] sm:$0xff] %v5774_v17  ;;  %v1367_v60 = vadd.f32 %v7279_v50, %v1344_v51  ;;  %v5795_v3 = vrot.slane %v2030_v36, 4  ;;  %v5810_v30 = vmul.f32 %v5533_v12, %v5777_v45  ;;  %v2815_v36 = vstv %s5752_s22  ;;  %s6277_s22 = sld [smem:[#allocation3 + $0x3d]] }
 0x247   : > { %7273 = vst [vmem:[#allocation49_spill] sm:$0xff] %v5762_v19  ;;  %v2770_v19 = vmul.f32 %v5780_v58, %v2764_v63  ;;  %7277 = vst [vmem:[#allocation53_spill] sm:$0xff] %v5785_v7  ;;  %v7282_v63 = vld [vmem:[#allocation106_spill] sm:$0xff]  ;;  %v2782_v50 = vsel %vm455_vm7, %v2778_v57, %v2781_v27  ;;  %v5826_v12 = vmul.f32 %v5560_v15, %v5629_v35  ;;  %v2866_v55 = vstv %s5799_s8  ;;  %s6297_s8 = sld [smem:[#allocation3 + $0x44]] }
 0x248   : > { %2787 = vrot.lane.b32.xlu0 %v2777_v37, %s4064_s27  ;;  %v5791_v9 = vpop.permute.xlu1 %2301  ;;  %7280 = vst [vmem:[#allocation55_spill] sm:$0xff] %v5795_v3  ;;  %v1390_v7 = vadd.f32 %v7282_v63, %v1362_v16  ;;  %v1391_v25 = vadd.f32 %v7282_v63, %v1363_v33  ;;  %v5816_v33 = vmul.f32 %v5552_v29, %v5777_v45  ;;  %v2838_v63 = vstv %s5754_s30  ;;  %s6295_s30 = sld [smem:[#allocation3 + $0x36]] }
 0x249   : > { %7278 = vst [vmem:[#allocation52_spill] sm:$0xff] %v5791_v9  ;;  %v5804_v9 = vrot.slane %v2066_v46, 5  ;;  %v2785_v59 = vrot.slane %v2770_v19, 6  ;;  %v2784_v46 = vsel %vm455_vm7, %v2777_v37, %v2783_v47  ;;  %v2839_v51 = vmul.f32 %v5638_v23, %v2838_v63 }
 0x24a   : > { %v5797_v32 = vpop.permute.xlu0 %2303  ;;  %2789 = vrot.lane.b32.xlu1 %v2778_v57, %s4064_s27  ;;  %v5830_v57 = vmul.f32 %v5560_v15, %v5696_v39  ;;  %v2816_v39 = vmul.f32 %v5638_v23, %v2815_v36 }
 0x24b   : > { %7281 = vst [vmem:[#allocation54_spill] sm:$0xff] %v5797_v32  ;;  %7283 = vst [vmem:[#allocation57_spill] sm:$0xff] %v5804_v9  ;;  %v1392_v32 = vadd.f32 %v7286_v1, %v1364_v54  ;;  %v7287_v9 = vld [vmem:[#allocation108_spill] sm:$0xff]  ;;  %v2786_v35 = vsel %vm455_vm7, %v2781_v27, %v2785_v59  ;;  %v7288_v54 = vld [vmem:[#allocation109_spill] sm:$0xff] }
 0x24c   : > { %2791 = vrot.lane.b32.xlu0 %v2777_v37, %s4064_s27  ;;  %v5818_v16 = vpop.permute.xlu1 %2305  ;;  %v1394_v47 = vadd.f32 %v7287_v9, %v1366_v40  ;;  %v1395_v37 = vadd.f32 %v7287_v9, %v1367_v60  ;;  %v1418_v3 = vadd.f32 %v7288_v54, %v1390_v7  ;;  %v7289_v40 = vld [vmem:[#allocation110_spill] sm:$0xff]  ;;  %v5850_v9 = vmul.f32 %v5560_v15, %v2838_v63  ;;  %v7291_v27 = vld [vmem:[#allocation111_spill] sm:$0xff]  ;;  %v7293_v7 = vld [vmem:[#allocation112_spill] sm:$0xff] }
 0x24d   : > { %7284 = vst [vmem:[#allocation56_spill] sm:$0xff] %v5818_v16  ;;  %v1393_v16 = vadd.f32 %v7286_v1, %v1365_v38  ;;  %v1419_v1 = vadd.f32 %v7288_v54, %v1391_v25  ;;  %v1420_v38 = vadd.f32 %v7289_v40, %v1392_v32  ;;  %v7294_v54 = vld [vmem:[#allocation113_spill] sm:$0xff] }
 0x24e   : > { %v5832_v19 = vpop.permute.xlu0 %2346  ;;  %2793 = vrot.lane.b32.xlu1 %v2782_v50, %s4064_s27  ;;  %v1422_v59 = vadd.f32 %v7291_v27, %v1394_v47  ;;  %v1442_v25 = vadd.f32 %v7293_v7, %v1418_v3  ;;  %v2818_v47 = vmul.f32 %v5560_v15, %v2815_v36  ;;  %v2848_v3 = vrot.slane %v5850_v9, 1 }
 0x24f   : > { %7285 = vst [vmem:[#allocation59_spill] sm:$0xff] %v5832_v19  ;;  %v2840_v19 = vmul.f32 %v5552_v29, %v2838_v63  ;;  %v1421_v50 = vadd.f32 %v7289_v40, %v1393_v16  ;;  %v1443_v32 = vadd.f32 %v7293_v7, %v1419_v1  ;;  %v2817_v63 = vmul.f32 %v5552_v29, %v2815_v36  ;;  %v7297_v7 = vld [vmem:[#allocation115_spill] sm:$0xff] }
 0x250   : > { %2795 = vrot.lane.b32.xlu0 %v2784_v46, %s4064_s27  ;;  %v5847_v60 = vpop.permute.xlu1 %2348  ;;  %v1423_v46 = vadd.f32 %v7291_v27, %v1395_v37  ;;  %v2845_v37 = vrot.slane %v2839_v51, 1  ;;  %v7295_v27 = vld [vmem:[#allocation114_spill] sm:$0xff]  ;;  %v2867_v1 = vmul.f32 %v5638_v23, %v2866_v55 }
 0x251   : > { %7290 = vst [vmem:[#allocation58_spill] sm:$0xff] %v5847_v60  ;;  %v1444_v60 = vadd.f32 %v7294_v54, %v1420_v38  ;;  %v1445_v16 = vadd.f32 %v7294_v54, %v1421_v50  ;;  %v2846_v40 = vrot.slane %v2840_v19, 1  ;;  %v1470_v50 = vadd.f32 %v7297_v7, %v1442_v25  ;;  %v7299_v19 = vld [vmem:[#allocation116_spill] sm:$0xff]  ;;  %v7300_v54 = vld [vmem:[#allocation117_spill] sm:$0xff]  ;;  %v7301_v25 = vld [vmem:[#allocation118_spill] sm:$0xff] }
 0x252   : > { %v5855_v17 = vpop.permute.xlu0 %2350  ;;  %2797 = vrot.lane.b32.xlu1 %v2786_v35, %s4064_s27  ;;  %v2868_v35 = vmul.f32 %v5552_v29, %v2866_v55  ;;  %v1447_v38 = vadd.f32 %v7295_v27, %v1423_v46  ;;  %v1471_v36 = vadd.f32 %v7297_v7, %v1443_v32  ;;  %s5896_s27 = sld [smem:[#allocation3 + $0x50]] }
 0x253   : > { %7292 = vst [vmem:[#allocation61_spill] sm:$0xff] %v5855_v17  ;;  %v1446_v17 = vadd.f32 %v7295_v27, %v1422_v59  ;;  %v1472_v59 = vadd.f32 %v7299_v19, %v1444_v60  ;;  %v1473_v9 = vadd.f32 %v7299_v19, %v1445_v16  ;;  %v1498_v27 = vadd.f32 %v7301_v25, %v1470_v50  ;;  %v7304_v19 = vld [vmem:[#allocation120_spill] sm:$0xff] }
 0x254   : > { %2822 = vrot.lane.b32.xlu0 %v2816_v39, %s4065_s29  ;;  %v5869_v45 = vpop.permute.xlu1 %2352  ;;  %v5878_v39 = vmul.f32 %v5560_v15, %v5726_v18  ;;  %v1475_v46 = vadd.f32 %v7300_v54, %v1447_v38  ;;  %v2847_v18 = vsel %vm278_vm2, %v2845_v37, %v2846_v40  ;;  %v1499_v32 = vadd.f32 %v7301_v25, %v1471_v36  ;;  %v7306_v36 = vld [vmem:[#allocation121_spill] sm:$0xff] }
 0x255   : > { %7296 = vst [vmem:[#allocation60_spill] sm:$0xff] %v5869_v45  ;;  %v1474_v45 = vadd.f32 %v7300_v54, %v1446_v17  ;;  %v2849_v16 = vsel %vm278_vm2, %v2846_v40, %v2848_v3  ;;  %v2873_v17 = vrot.slane %v2867_v1, 2  ;;  %v2874_v7 = vrot.slane %v2868_v35, 2  ;;  %v7307_v1 = vld [vmem:[#allocation122_spill] sm:$0xff] }
 0x256   : > { %v5880_v51 = vpop.permute.xlu0 %2354  ;;  %2824 = vrot.lane.b32.xlu1 %v2817_v63, %s4065_s29  ;;  %v7303_v63 = vld [vmem:[#allocation119_spill] sm:$0xff]  ;;  %v2894_v37 = vstv %s5858_s26  ;;  %v1526_v25 = vadd.f32 %v7306_v36, %v1498_v27  ;;  %v5908_v40 = vrot.slane %v5810_v30, 6  ;;  %s6322_s26 = sld [smem:[#allocation3 + $0x4b]] }
 0x257   : > { %7298 = vst [vmem:[#allocation63_spill] sm:$0xff] %v5880_v51  ;;  %v2869_v51 = vmul.f32 %v5560_v15, %v2866_v55  ;;  %v1500_v38 = vadd.f32 %v7303_v63, %v1472_v59  ;;  %v1501_v50 = vadd.f32 %v7303_v63, %v1473_v9  ;;  %v1503_v55 = vadd.f32 %v7304_v19, %v1475_v46  ;;  %v7308_v9 = vld [vmem:[#allocation123_spill] sm:$0xff] }
 0x258   : > { %2826 = vrot.lane.b32.xlu0 %v2818_v47, %s4065_s29  ;;  %v5893_v60 = vpop.permute.xlu1 %2356  ;;  %v1502_v47 = vadd.f32 %v7304_v19, %v1474_v45  ;;  %v2875_v27 = vsel %vm315_vm3, %v2873_v17, %v2874_v7  ;;  %v2895_v30 = vmul.f32 %v5552_v29, %v2894_v37 }
 0x259   : > { %7302 = vst [vmem:[#allocation62_spill] sm:$0xff] %v5893_v60  ;;  %v1527_v60 = vadd.f32 %v7306_v36, %v1499_v32  ;;  %v1528_v35 = vadd.f32 %v7307_v1, %v1500_v38  ;;  %v1529_v59 = vadd.f32 %v7307_v1, %v1501_v50  ;;  %v2876_v63 = vrot.slane %v2869_v51, 2  ;;  %v7313_v36 = vld [vmem:[#allocation126_spill] sm:$0xff]  ;;  %v7317_v51 = vld [vmem:[#allocation128_spill] sm:$0xff] }
 0x25a   : > { %v5901_v54 = vpop.permute.xlu0 %2397  ;;  %2850 = vrot.lane.b32.xlu1 %v2847_v18, %s4065_s29  ;;  %v1530_v45 = vadd.f32 %v7308_v9, %v1502_v47  ;;  %v1531_v46 = vadd.f32 %v7308_v9, %v1503_v55  ;;  %v5921_v32 = vmul.f32 %v5560_v15, %v2894_v37  ;;  %v7310_v18 = vld [vmem:[#allocation124_spill] sm:$0xff]  ;;  %v7311_v47 = vld [vmem:[#allocation125_spill] sm:$0xff]  ;;  %v7314_v9 = vrot.slane %v5789_v2, 1 }
 0x25b   : > { %7305 = vst [vmem:[#allocation65_spill] sm:$0xff] %v5901_v54  ;;  %v1549_v38 = vadd.f32 %v7310_v18, %v1526_v25  ;;  %v1550_v50 = vadd.f32 %v7310_v18, %v1527_v60  ;;  %v1552_v17 = vadd.f32 %v7311_v47, %v1529_v59  ;;  %v7315_v54 = vrot.slane %v5655_v20, 1  ;;  %v7316_v60 = vld [vmem:[#allocation127_spill] sm:$0xff] }
 0x25c   : > { %2852 = vrot.lane.b32.xlu0 %v2849_v16, %s4065_s29  ;;  %v5916_v19 = vpop.permute.xlu1 %2399  ;;  %v1551_v16 = vadd.f32 %v7311_v47, %v1528_v35  ;;  %v1553_v1 = vadd.f32 %v7313_v36, %v1530_v45  ;;  %v1554_v37 = vadd.f32 %v7313_v36, %v1531_v46  ;;  %v2877_v59 = vsel %vm315_vm3, %v2874_v7, %v2876_v63  ;;  %v7319_v36 = vld [vmem:[#allocation129_spill] sm:$0xff]  ;;  %v7321_v7 = vld [vmem:[#allocation130_spill] sm:$0xff] }
 0x25d   : > { %7309 = vst [vmem:[#allocation64_spill] sm:$0xff] %v5916_v19  ;;  %v5939_v25 = vsel %vm278_vm2, %v7315_v54, %v7314_v9  ;;  %v1577_v35 = vadd.f32 %v7316_v60, %v1549_v38  ;;  %v1578_v18 = vadd.f32 %v7316_v60, %v1550_v50  ;;  %v1580_v45 = vadd.f32 %v7317_v51, %v1552_v17  ;;  %v7324_v50 = vld [vmem:[#allocation133_spill] sm:$0xff] }
 0x25e   : > { %v5929_v55 = vpop.permute.xlu0 %2401  ;;  %2854 = vrot.lane.b32.xlu1 %v2848_v3, %s4065_s29  ;;  %v2899_v20 = vrot.slane %v2895_v30, 3  ;;  %v2900_v54 = vrot.slane %v5921_v32, 3  ;;  %v2918_v47 = vstv %s5896_s27  ;;  %v1581_v3 = vadd.f32 %v7319_v36, %v1553_v1  ;;  %v7323_v1 = vld [vmem:[#allocation132_spill] sm:$0xff]  ;;  %s6335_s27 = sld [smem:[#allocation3 + $0x52]] }
 0x25f   : > { %7312 = vst [vmem:[#allocation67_spill] sm:$0xff] %v5929_v55  ;;  %v1579_v55 = vadd.f32 %v7317_v51, %v1551_v16  ;;  %v1582_v38 = vadd.f32 %v7319_v36, %v1554_v37  ;;  %v1606_v30 = vadd.f32 %v7321_v7, %v1578_v18  ;;  %v7322_v51 = vld [vmem:[#allocation131_spill] sm:$0xff]  ;;  %v2919_v36 = vmul.f32 %v5552_v29, %v2918_v47 }
 0x260   : > { %2878 = vrot.lane.b32.xlu0 %v2875_v27, %s4065_s29  ;;  %v5948_v46 = vpop.permute.xlu1 %2403  ;;  %v1605_v27 = vadd.f32 %v7321_v7, %v1577_v35  ;;  %v1608_v17 = vadd.f32 %v7322_v51, %v1580_v45  ;;  %v1609_v37 = vadd.f32 %v7323_v1, %v1581_v3  ;;  %v2920_v16 = vmul.f32 %v5560_v15, %v2918_v47  ;;  %v7326_v3 = vld [vmem:[#allocation134_spill] sm:$0xff] }
 0x261   : > { %7318 = vst [vmem:[#allocation66_spill] sm:$0xff] %v5948_v46  ;;  %v1607_v32 = vadd.f32 %v7322_v51, %v1579_v55  ;;  %v1610_v60 = vadd.f32 %v7323_v1, %v1582_v38  ;;  %v2901_v55 = vsel %vm348_vm4, %v2899_v20, %v2900_v54  ;;  %v2921_v18 = vmul.f32 %v5780_v58, %v2918_v47 }
 0x262   : > { %v5956_v9 = vpop.permute.xlu0 %2405  ;;  %2880 = vrot.lane.b32.xlu1 %v2877_v59, %s4065_s29  ;;  %v1629_v35 = vadd.f32 %v7324_v50, %v1605_v27  ;;  %v2946_v45 = vstv %s5923_s18  ;;  %v1630_v59 = vadd.f32 %v7324_v50, %v1606_v30  ;;  %v1632_v51 = vadd.f32 %v7326_v3, %v1608_v17  ;;  %v7329_v17 = vld [vmem:[#allocation136_spill] sm:$0xff]  ;;  %s6378_s18 = sld [smem:[#allocation3 + $0x59]] }
 0x263   : > { %7320 = vst [vmem:[#allocation69_spill] sm:$0xff] %v5956_v9  ;;  %v1631_v7 = vadd.f32 %v7326_v3, %v1607_v32  ;;  %v1633_v1 = vadd.f32 %v5104_v8, %v1609_v37  ;;  %v1634_v27 = vadd.f32 %v5104_v8, %v1610_v60  ;;  %v2925_v47 = vrot.slane %v2919_v36, 4 }
 0x264   : > { %2882 = vrot.lane.b32.xlu0 %v2876_v63, %s4065_s29  ;;  %v5971_v9 = vpop.permute.xlu1 %2407  ;;  %v2926_v50 = vrot.slane %v2920_v16, 4  ;;  %v2947_v30 = vmul.f32 %v5552_v29, %v2946_v45  ;;  %v2948_v32 = vmul.f32 %v5560_v15, %v2946_v45  ;;  %v1660_v37 = vadd.f32 %v7329_v17, %v1632_v51 }
 0x265   : > { %7325 = vst [vmem:[#allocation68_spill] sm:$0xff] %v5971_v9  ;;  %v7328_v9 = vld [vmem:[#allocation135_spill] sm:$0xff]  ;;  %v1659_v3 = vadd.f32 %v7329_v17, %v1631_v7  ;;  %v2928_v60 = vrot.slane %v2921_v18, 4  ;;  %v2974_v19 = vstv %s5958_s19  ;;  %v2949_v18 = vmul.f32 %v5780_v58, %v2946_v45  ;;  %s6631_s19 = sld [smem:[#allocation3 + $0x3e]] }
 0x266   : > { %v5979_v63 = vpop.permute.xlu0 %2448  ;;  %v1657_v46 = vadd.f32 %v7328_v9, %v1629_v35  ;;  %2902 = vrot.lane.b32.xlu1 %v2899_v20, %s4065_s29  ;;  %v1658_v38 = vadd.f32 %v7328_v9, %v1630_v59  ;;  %v7330_v35 = vld [vmem:[#allocation137_spill] sm:$0xff]  ;;  %v1688_v7 = vadd.f32 %v5158_v62, %v1660_v37  ;;  %v2977_v45 = vmul.f32 %v5780_v58, %v2974_v19 }
 0x267   : > { %7327 = vst [vmem:[#allocation71_spill] sm:$0xff] %v5979_v63  ;;  %v1661_v63 = vadd.f32 %v7330_v35, %v1633_v1  ;;  %v1662_v20 = vadd.f32 %v7330_v35, %v1634_v27  ;;  %v1687_v59 = vadd.f32 %v5158_v62, %v1659_v3  ;;  %v2953_v1 = vrot.slane %v2947_v30, 5 }
 0x268   : > { %2904 = vrot.lane.b32.xlu0 %v2901_v55, %s4065_s29  ;;  %v5992_v8 = vpop.permute.xlu1 %2450  ;;  %v7331_v55 = vld [vmem:[#allocation138_spill] sm:$0xff]  ;;  %v2954_v27 = vrot.slane %v2948_v32, 5  ;;  %v2975_v62 = vmul.f32 %v5552_v29, %v2974_v19  ;;  %v6023_v30 = vmul.f32 %v5560_v15, %v5729_v14  ;;  %v1716_v37 = vadd.f32 %v5188_v4, %v1688_v7 }
 0x269   : > { %v1685_v36 = vadd.f32 %v7331_v55, %v1657_v46  ;;  %v1686_v9 = vadd.f32 %v7331_v55, %v1658_v38  ;;  %v1689_v51 = vadd.f32 %v5169_v43, %v1661_v63  ;;  %v2927_v46 = vsel %vm381_vm5, %v2925_v47, %v2926_v50 }
 0x26a   : > { %v5997_v16 = vpop.permute.xlu0 %2452  ;;  %2906 = vrot.lane.b32.xlu1 %v2900_v54, %s4065_s29  ;;  %v2929_v38 = vsel %vm381_vm5, %v2926_v50, %v2928_v60  ;;  %v2976_v54 = vmul.f32 %v5560_v15, %v2974_v19  ;;  %v1690_v63 = vadd.f32 %v5169_v43, %v1662_v20  ;;  %v1715_v50 = vadd.f32 %v5188_v4, %v1687_v59 }
 0x26b   : > { %v1713_v3 = vadd.f32 %v5176_v44, %v1685_v36  ;;  %v1717_v60 = vadd.f32 %v5195_v13, %v1689_v51  ;;  %v2956_v43 = vrot.slane %v2949_v18, 5  ;;  %v2955_v20 = vsel %vm418_vm6, %v2953_v1, %v2954_v27 }
 0x26c   : > { %2930 = vrot.lane.b32.xlu0 %v2925_v47, %s4065_s29  ;;  %v6012_v17 = vpop.permute.xlu1 %2454  ;;  %v1714_v47 = vadd.f32 %v5176_v44, %v1686_v9  ;;  %v1718_v19 = vadd.f32 %v5195_v13, %v1690_v63  ;;  %v1738_v55 = vadd.f32 %v5210_v11, %v1715_v50  ;;  %v2981_v4 = vrot.slane %v2975_v62, 6 }
 0x26d   : > { %v1736_v44 = vadd.f32 %v5204_v5, %v1713_v3  ;;  %v2982_v9 = vrot.slane %v2976_v54, 6  ;;  %v2984_v59 = vrot.slane %v2977_v45, 6  ;;  %v1739_v7 = vadd.f32 %v5210_v11, %v1716_v37 }
 0x26e   : > { %v6025_v32 = vpop.permute.xlu0 %2456  ;;  %2932 = vrot.lane.b32.xlu1 %v2927_v46, %s4065_s29  ;;  %v1737_v35 = vadd.f32 %v5204_v5, %v1714_v47  ;;  %v3025_v5 = vstv %s6000_s24  ;;  %v1740_v46 = vadd.f32 %v5224_v34, %v1717_v60  ;;  %v1766_v63 = vadd.f32 %v5249_v24, %v1738_v55  ;;  %s6646_s24 = sld [smem:[#allocation3 + $0x37]] }
 0x26f   : > { %v1764_v13 = vadd.f32 %v5234_v6, %v1736_v44  ;;  %v2957_v62 = vsel %vm418_vm6, %v2954_v27, %v2956_v43  ;;  %v1767_v54 = vadd.f32 %v5249_v24, %v1739_v7  ;;  %v2983_v47 = vsel %vm455_vm7, %v2981_v4, %v2982_v9 }
 0x270   : > { %2934 = vrot.lane.b32.xlu0 %v2929_v38, %s4065_s29  ;;  %v6037_v36 = vpop.permute.xlu1 %2458  ;;  %v1765_v18 = vadd.f32 %v5234_v6, %v1737_v35  ;;  %v1741_v38 = vadd.f32 %v5224_v34, %v1718_v19  ;;  %v3002_v6 = vstv %s6010_s3  ;;  %v1794_v3 = vadd.f32 %v5284_v0, %v1766_v63  ;;  %s3812_s3 = sld [smem:[#allocation3 + $0x45]] }
 0x271   : > { %v1792_v11 = vadd.f32 %v5275_v21, %v1764_v13  ;;  %v3026_v27 = vmul.f32 %v5638_v23, %v3025_v5  ;;  %v1795_v24 = vadd.f32 %v5284_v0, %v1767_v54  ;;  %v6069_v60 = vmul.f32 %v5552_v29, %v3025_v5 }
 0x272   : > { %v6042_v51 = vpop.permute.xlu0 %2489  ;;  %2958 = vrot.lane.b32.xlu1 %v2953_v1, %s4065_s29  ;;  %v1793_v45 = vadd.f32 %v5275_v21, %v1765_v18  ;;  %v2985_v1 = vsel %vm455_vm7, %v2982_v9, %v2984_v59  ;;  %v1768_v43 = vadd.f32 %v5255_v22, %v1740_v46  ;;  %v1769_v19 = vadd.f32 %v5255_v22, %v1741_v38 }
 0x273   : > { %v1816_v50 = vadd.f32 %v5311_v26, %v1792_v11  ;;  %v1818_v44 = vadd.f32 %v5331_v49, %v1794_v3  ;;  %v3003_v35 = vmul.f32 %v5638_v23, %v3002_v6  ;;  %v1819_v0 = vadd.f32 %v5331_v49, %v1795_v24 }
 0x274   : > { %2960 = vrot.lane.b32.xlu0 %v2955_v20, %s4065_s29  ;;  %v6058_v34 = vpop.permute.xlu1 %2491  ;;  %v1817_v21 = vadd.f32 %v5311_v26, %v1793_v45  ;;  %v3004_v55 = vmul.f32 %v5552_v29, %v3002_v6  ;;  %v1796_v9 = vadd.f32 %v5302_v10, %v1768_v43  ;;  %v1797_v22 = vadd.f32 %v5302_v10, %v1769_v19 }
 0x275   : > { %v1844_v20 = vadd.f32 %v5354_v56, %v1816_v50  ;;  %v1846_v59 = vadd.f32 %v5363_v28, %v1818_v44  ;;  %v3032_v13 = vrot.slane %v3026_v27, 1  ;;  %v1847_v49 = vadd.f32 %v5363_v28, %v1819_v0  ;;  %v7336_v44 = vld [vmem:[#allocation28_spill] sm:$0xff] }
 0x276   : > { %v6066_v37 = vpop.permute.xlu0 %2493  ;;  %2962 = vrot.lane.b32.xlu1 %v2957_v62, %s4065_s29  ;;  %v1845_v26 = vadd.f32 %v5354_v56, %v1817_v21  ;;  %v1820_v38 = vadd.f32 %v5339_v52, %v1796_v9  ;;  %v1821_v10 = vadd.f32 %v5339_v52, %v1797_v22  ;;  %v6097_v62 = vmul.f32 %v5560_v15, %v3025_v5  ;;  %v7335_v21 = vld [vmem:[#allocation13_spill] sm:$0xff]  ;;  %v7338_v9 = vld [vmem:[#allocation35_spill] sm:$0xff] }
 0x277   : > { %v1872_v18 = vadd.f32 %v5392_v31, %v1844_v20  ;;  %v1874_v63 = vadd.f32 %v5412_v48, %v1846_v59  ;;  %v1875_v28 = vadd.f32 %v5412_v48, %v1847_v49  ;;  %v3053_v11 = vstv %s6055_s16  ;;  %v7339_v59 = vld [vmem:[#allocation12_spill] sm:$0xff]  ;;  %s6677_s16 = sld [smem:[#allocation3 + $0x4c]] }
 0x278   : > { %2986 = vrot.lane.b32.xlu0 %v2981_v4, %s4065_s29  ;;  %v6084_v7 = vpop.permute.xlu1 %2495  ;;  %v1873_v56 = vadd.f32 %v5392_v31, %v1845_v26  ;;  %v3033_v4 = vrot.slane %v6069_v60, 1  ;;  %v1848_v52 = vadd.f32 %v5382_v61, %v1820_v38  ;;  %v1849_v45 = vadd.f32 %v5382_v61, %v1821_v10  ;;  %v7343_v10 = vld [vmem:[#allocation50_spill] sm:$0xff] }
 0x279   : > { %v1900_v54 = vadd.f32 %v5438_v53, %v1872_v18  ;;  %v7332_v3 = vrot.slane %v5826_v12, 2  ;;  %v7333_v5 = vrot.slane %v5676_v42, 2  ;;  %v1902_v48 = vadd.f32 %v5448_v41, %v1874_v63 }
 0x27a   : > { %v6089_v46 = vpop.permute.xlu0 %2497  ;;  %2988 = vrot.lane.b32.xlu1 %v2983_v47, %s4065_s29  ;;  %v1901_v31 = vadd.f32 %v5438_v53, %v1873_v56  ;;  %v1903_v53 = vadd.f32 %v5448_v41, %v1875_v28  ;;  %v3005_v61 = vmul.f32 %v5560_v15, %v3002_v6  ;;  %v1876_v60 = vadd.f32 %v7335_v21, %v1848_v52  ;;  %v7337_v41 = vld [vmem:[#allocation31_spill] sm:$0xff]  ;;  %v7341_v56 = vld [vmem:[#allocation40_spill] sm:$0xff] }
 0x27b   : > { %v6113_v47 = vsel %vm315_vm3, %v7333_v5, %v7332_v3  ;;  %v1877_v42 = vadd.f32 %v7335_v21, %v1849_v45  ;;  %v3035_v43 = vrot.slane %v6097_v62, 1  ;;  %v3054_v19 = vmul.f32 %v5638_v23, %v3053_v11  ;;  %v7344_v62 = vld [vmem:[#allocation53_spill] sm:$0xff]  ;;  %v7347_v52 = vld [vmem:[#allocation48_spill] sm:$0xff] }
 0x27c   : > { %2990 = vrot.lane.b32.xlu0 %v2985_v1, %s4065_s29  ;;  %v6116_v27 = vpop.permute.xlu1 %2499  ;;  %v7334_v1 = vld [vmem:[#allocation26_spill] sm:$0xff]  ;;  %v1922_v0 = vadd.f32 %v7336_v44, %v1900_v54  ;;  %v1923_v20 = vadd.f32 %v7337_v41, %v1901_v31  ;;  %v3034_v26 = vsel %vm278_vm2, %v3032_v13, %v3033_v4  ;;  %v3055_v6 = vmul.f32 %v5552_v29, %v3053_v11  ;;  %s6134_s29 = sld [smem:[#allocation3 + $0x51]]  ;;  %v7351_v41 = vld [vmem:[#allocation33_spill] sm:$0xff] }
 0x27d   : > { %v1921_v24 = vmul.f32 %v5560_v15, %v7334_v1  ;;  %v1924_v22 = vadd.f32 %v7338_v9, %v1902_v48  ;;  %v1905_v49 = vadd.f32 %v7339_v59, %v1877_v42  ;;  %v6142_v18 = vmul.f32 %v5560_v15, %v3053_v11  ;;  %v7349_v1 = vld [vmem:[#allocation37_spill] sm:$0xff] }
 0x27e   : > { %v6121_v50 = vpop.permute.xlu0 %2540  ;;  %3009 = vrot.lane.b32.xlu1 %v3003_v35, %s4066_s6  ;;  %v1904_v35 = vadd.f32 %v7339_v59, %v1876_v60  ;;  %v7342_v13 = vrot.slane %v7341_v56, 3  ;;  %v6151_v63 = vmul.f32 %v5560_v15, %v7343_v10  ;;  %v1925_v28 = vadd.f32 %v7344_v62, %v1903_v53  ;;  %v7350_v60 = vld [vmem:[#allocation38_spill] sm:$0xff] }
 0x27f   : > { %v7346_v31 = vrot.slane %v5878_v39, 4  ;;  %v7348_v45 = vrot.slane %v7347_v52, 4  ;;  %v6979_v3 = vrot.slane %v6023_v30, 5  ;;  %v3036_v5 = vsel %vm278_vm2, %v3033_v4, %v3035_v43 }
 0x280   : > { %3011 = vrot.lane.b32.xlu0 %v3004_v55, %s4066_s6  ;;  %v6139_v23 = vpop.permute.xlu1 %2542  ;;  %v7340_v55 = vrot.slane %v5830_v57, 3  ;;  %v3060_v48 = vrot.slane %v3054_v19, 2  ;;  %v1958_v21 = vadd.f32 %v7349_v1, %v1922_v0  ;;  %v1959_v53 = vadd.f32 %v7350_v60, %v1923_v20  ;;  %v7353_v19 = vld [vmem:[#allocation43_spill] sm:$0xff] }
 0x281   : > { %v6161_v11 = vsel %vm381_vm5, %v7348_v45, %v7346_v31  ;;  %v3061_v42 = vrot.slane %v3055_v6, 2  ;;  %v3081_v44 = vstv %s6104_s17  ;;  %v1960_v59 = vadd.f32 %v7351_v41, %v1924_v22  ;;  %v7354_v0 = vld [vmem:[#allocation47_spill] sm:$0xff]  ;;  %v7358_v45 = vld [vmem:[#allocation45_spill] sm:$0xff]  ;;  %s3815_s17 = sld [smem:[#allocation3 + $0x5a]] }
 0x282   : > { %v2015_v38 = vsel %vm348_vm4, %v7342_v13, %v7340_v55  ;;  %v6154_v54 = vpop.permute.xlu0 %2544  ;;  %3013 = vrot.lane.b32.xlu1 %v3005_v61, %s4066_s6  ;;  %v1926_v55 = vadd.f32 %v7338_v9, %v1904_v35  ;;  %v1927_v13 = vadd.f32 %v1921_v24, %v1905_v49  ;;  %v3063_v61 = vrot.slane %v6142_v18, 2  ;;  %v7355_v24 = vld [vmem:[#allocation51_spill] sm:$0xff]  ;;  %v7357_v18 = vld [vmem:[#allocation42_spill] sm:$0xff] }
 0x283   : > { %7345 = vst [vmem:[#allocation70_spill] sm:$0xff] %v6154_v54  ;;  %v1961_v4 = vadd.f32 %v5939_v25, %v1925_v28  ;;  %v2034_v31 = vmul.f32 %v7354_v0, %v7353_v19  ;;  %v2035_v20 = vmul.f32 %v5780_v58, %v7353_v19  ;;  %v7356_v9 = vrot.slane %v7355_v24, 5 }
 0x284   : > { %3037 = vrot.lane.b32.xlu0 %v3034_v26, %s4066_s6  ;;  %v6172_v62 = vpop.permute.xlu1 %2546  ;;  %v2070_v26 = vmul.f32 %v7354_v0, %v5729_v14  ;;  %v3082_v35 = vmul.f32 %v5552_v29, %v3081_v44  ;;  %v6195_v49 = vmul.f32 %v5560_v15, %v3081_v44  ;;  %v1994_v28 = vadd.f32 %v7357_v18, %v1958_v21 }
 0x285   : > { %7352 = vst [vmem:[#allocation73_spill] sm:$0xff] %v6172_v62  ;;  %v6189_v22 = vsel %vm418_vm6, %v7356_v9, %v6979_v3  ;;  %v1995_v1 = vadd.f32 %v7358_v45, %v1959_v53  ;;  %v3062_v60 = vsel %vm315_vm3, %v3060_v48, %v3061_v42  ;;  %v3105_v19 = vstv %s6134_s29  ;;  %v7359_v9 = vld [vmem:[#allocation36_spill] sm:$0xff]  ;;  %s3816_s29 = sld [smem:[#allocation3 + $0x61]] }
 0x286   : > { %v6182_v6 = vpop.permute.xlu0 %2548  ;;  %3039 = vrot.lane.b32.xlu1 %v3036_v5, %s4066_s6  ;;  %v1996_v5 = vadd.f32 %v7359_v9, %v1960_v59  ;;  %v1962_v25 = vadd.f32 %v7351_v41, %v1926_v55  ;;  %v7360_v44 = vrot.slane %v5789_v2, 1  ;;  %v3064_v21 = vsel %vm315_vm3, %v3061_v42, %v3063_v61  ;;  %v7361_v55 = vld [vmem:[#allocation46_spill] sm:$0xff] }
 0x287   : > { %v1997_v53 = vadd.f32 %v6113_v47, %v1961_v4  ;;  %v2048_v18 = vrot.slane %v2034_v31, 4  ;;  %v2084_v45 = vrot.slane %v2070_v26, 5  ;;  %v2071_v62 = vmul.f32 %v5780_v58, %v5729_v14 }
 0x288   : > { %3041 = vrot.lane.b32.xlu0 %v3035_v43, %s4066_s6  ;;  %v1963_v3 = vadd.f32 %v7360_v44, %v1927_v13  ;;  %v6210_v54 = vpop.permute.xlu1 %2550  ;;  %v2050_v43 = vrot.slane %v2035_v20, 4  ;;  %v3086_v41 = vrot.slane %v3082_v35, 3  ;;  %v3087_v2 = vrot.slane %v6195_v49, 3  ;;  %v7364_v49 = vld [vmem:[#allocation55_spill] sm:$0xff] }
 0x289   : > { %v6221_v59 = vmul.f32 %v5552_v29, %v3105_v19  ;;  %v2022_v42 = vadd.f32 %v7361_v55, %v1994_v28  ;;  %v7362_v47 = vrot.slane %v7341_v56, 3  ;;  %v6228_v4 = vmul.f32 %v7354_v0, %v7343_v10 }
 0x28a   : > { %v6214_v48 = vpop.permute.xlu0 %2591  ;;  %3065 = vrot.lane.b32.xlu1 %v3062_v60, %s4066_s6  ;;  %v6232_v14 = vmul.f32 %v5780_v58, %v7343_v10  ;;  %v2024_v31 = vadd.f32 %v7361_v55, %v1996_v5  ;;  %v1998_v29 = vadd.f32 %v7359_v9, %v1962_v25  ;;  %v7363_v20 = vrot.slane %v5826_v12, 2  ;;  %v7366_v60 = vld [vmem:[#allocation57_spill] sm:$0xff] }
 0x28b   : > { %v2023_v13 = vadd.f32 %v7362_v47, %v1995_v1  ;;  %v3107_v0 = vmul.f32 %v5560_v15, %v3105_v19  ;;  %v2025_v35 = vadd.f32 %v2015_v38, %v1997_v53  ;;  %v2049_v10 = vsel %vm381_vm5, %v7364_v49, %v2048_v18 }
 0x28c   : > { %3067 = vrot.lane.b32.xlu0 %v3064_v21, %s4066_s6  ;;  %v1999_v26 = vadd.f32 %v7363_v20, %v1963_v3  ;;  %v6239_v56 = vpop.permute.xlu1 %2593  ;;  %v7365_v28 = vrot.slane %v5878_v39, 4  ;;  %v2085_v5 = vsel %vm418_vm6, %v7366_v60, %v2084_v45  ;;  %v2086_v12 = vrot.slane %v2071_v62, 5 }
 0x28d   : > { %v3088_v3 = vsel %vm348_vm4, %v3086_v41, %v3087_v2  ;;  %v3112_v15 = vrot.slane %v6221_v59, 4  ;;  %v3133_v38 = vstv %s6197_s23  ;;  %v2058_v9 = vadd.f32 %v7364_v49, %v2022_v42  ;;  %s3713_s23 = sshll.u32 %s4226_s7, 4 }
 0x28e   : > { %v2051_v1 = vsel %vm381_vm5, %v7365_v28, %v2050_v43  ;;  %v6249_v25 = vpop.permute.xlu0 %2595  ;;  %3069 = vrot.lane.b32.xlu1 %v3063_v61, %s4066_s6  ;;  %v7368_v44 = vrot.slane %v7347_v52, 4  ;;  %v3108_v21 = vmul.f32 %v5780_v58, %v3105_v19  ;;  %v3161_v53 = vstv %s6204_s28  ;;  %v6270_v52 = vld [vmem:[#allocation2 + $0x58] sm:$0xff]  ;;  %v6273_v19 = vld [vmem:[#allocation2 + $0x68] sm:$0xff]  ;;  %s190_s28 = scalar_lea.vmem [#allocation8], %s3713_s23 }
 0x28f   : > { %7367 = vst [vmem:[#allocation72_spill] sm:$0xff] %v6249_v25  ;;  %v2060_v18 = vadd.f32 %v7364_v49, %v2024_v31  ;;  %v2026_v62 = vadd.f32 %v7361_v55, %v1998_v29  ;;  %v7369_v61 = vrot.slane %v5830_v57, 3  ;;  %v3113_v59 = vrot.slane %v3107_v0, 4  ;;  %7371 = vst [vmem:[#allocation74_spill] sm:$0xff] %v6270_v52  ;;  %v7408_v25 = vld [vmem:[#allocation58_spill] sm:$0xff] }
 0x290   : > { %v2059_v39 = vadd.f32 %v7368_v44, %v2023_v13  ;;  %3089 = vrot.lane.b32.xlu0 %v3086_v41, %s4066_s6  ;;  %v6265_v45 = vpop.permute.xlu1 %2597  ;;  %v2061_v42 = vadd.f32 %v6161_v11, %v2025_v35  ;;  %v3134_v41 = vmul.f32 %v6270_v52, %v3133_v38  ;;  %7372 = vst [vmem:[#allocation77_spill] sm:$0xff] %v6273_v19  ;;  %v2120_v57 = vrot.slane %v6228_v4, 6 }
 0x291   : > { %v2027_v43 = vadd.f32 %v7369_v61, %v1999_v26  ;;  %7370 = vst [vmem:[#allocation75_spill] sm:$0xff] %v6265_v45  ;;  %v3135_v13 = vmul.f32 %v6273_v19, %v3133_v38  ;;  %v3136_v55 = vmul.f32 %v5780_v58, %v3133_v38  ;;  %v2122_v31 = vrot.slane %v6232_v14, 6 }
 0x292   : > { %v6268_v47 = vpop.permute.xlu0 %2599  ;;  %3091 = vrot.lane.b32.xlu1 %v3088_v3, %s4066_s6  ;;  %v6283_v11 = vmul.f32 %v6270_v52, %v3161_v53  ;;  %v6286_v29 = vmul.f32 %v6273_v19, %v3161_v53  ;;  %v2094_v20 = vadd.f32 %v7366_v60, %v2058_v9  ;;  %v7373_v26 = vrot.slane %v7355_v24, 5 }
 0x293   : > { %v7374_v35 = vrot.slane %v6023_v30, 5  ;;  %v3115_v4 = vrot.slane %v3108_v21, 4  ;;  %v2096_v14 = vadd.f32 %v7366_v60, %v2060_v18  ;;  %v2062_v28 = vadd.f32 %v2049_v10, %v2026_v62 }
 0x294   : > { %v2095_v0 = vadd.f32 %v7373_v26, %v2059_v39  ;;  %3093 = vrot.lane.b32.xlu0 %v3087_v2, %s4066_s6  ;;  %v2063_v3 = vadd.f32 %v2051_v1, %v2027_v43  ;;  %v6300_v38 = vpop.permute.xlu1 %2601  ;;  %v3114_v24 = vsel %vm381_vm5, %v3112_v15, %v3113_v59  ;;  %v2097_v9 = vadd.f32 %v6189_v22, %v2061_v42  ;;  %v7383_v26 = vld [vmem:[#allocation17_spill] sm:$0xff] }
 0x295   : > { %v2087_v49 = vsel %vm418_vm6, %v7374_v35, %v2086_v12  ;;  %v3140_v12 = vrot.slane %v3134_v41, 5  ;;  %v3141_v44 = vrot.slane %v3135_v13, 5  ;;  %v3143_v2 = vrot.slane %v3136_v55, 5 }
 0x296   : > { %v6304_v30 = vpop.permute.xlu0 %2634  ;;  %v7375_v39 = vrot.slane %v6151_v63, 6  ;;  %v7376_v21 = vrot.slane %v5816_v33, 6  ;;  %3117 = vrot.lane.b32.xlu1 %v3112_v15, %s4066_s6  ;;  %v3168_v10 = vrot.slane %v6283_v11, 6  ;;  %v3169_v1 = vrot.slane %v6286_v29, 6  ;;  %v7381_v63 = vld [vmem:[#allocation15_spill] sm:$0xff] }
 0x297   : > { %v3164_v60 = vmul.f32 %v5780_v58, %v3161_v53  ;;  %v2130_v22 = vadd.f32 %v5908_v40, %v2094_v20  ;;  %v2121_v43 = vsel %vm455_vm7, %v5908_v40, %v2120_v57  ;;  %v3116_v42 = vsel %vm381_vm5, %v3113_v59, %v3115_v4 }
 0x298   : > { %v2119_v61 = vsel %vm455_vm7, %v7376_v21, %v7375_v39  ;;  %v7377_v18 = vmov %v7376_v21  ;;  %3119 = vrot.lane.b32.xlu0 %v3114_v24, %s4066_s6  ;;  %v2132_v15 = vadd.f32 %v5908_v40, %v2096_v14  ;;  %v7378_v41 = vmov %v7375_v39  ;;  %v6328_v33 = vpop.permute.xlu1 %2636  ;;  %v7380_v40 = vld [vmem:[#allocation14_spill] sm:$0xff]  ;;  %v6351_v39 = vld [vmem:[#allocation2 + $0x48] sm:$0xe0] }
 0x299   : > { %v2131_v62 = vadd.f32 %v7377_v18, %v2095_v0  ;;  %v2123_v53 = vsel %vm455_vm7, %v7378_v41, %v2122_v31  ;;  %v2098_v13 = vadd.f32 %v2085_v5, %v2062_v28  ;;  %v2099_v55 = vadd.f32 %v2087_v49, %v2063_v3  ;;  %v7382_v5 = vld [vmem:[#allocation16_spill] sm:$0xff]  ;;  %7385 = vst [vmem:[#allocation78_spill] sm:$0xff] %v6351_v39 }
 0x29a   : > { %v2133_v11 = vadd.f32 %v2119_v61, %v2097_v9  ;;  %v6330_v57 = vpop.permute.xlu0 %2638  ;;  %v3142_v29 = vsel %vm418_vm6, %v3140_v12, %v3141_v44  ;;  %v3144_v59 = vsel %vm418_vm6, %v3141_v44, %v3143_v2  ;;  %v3212_v20 = vstv %s6277_s22  ;;  %3121 = vrot.lane.b32.xlu1 %v3116_v42, %s4066_s6  ;;  %s3606_s22 = sshll.u32 %s190_s28, 4  ;;  %s6783_s22 = int_to_ptr.vmem [resolvable:$true] %s3606_s22 }
 0x29b   : > { %7379 = vst [vmem:[#allocation76_spill] sm:$0xff] %v6330_v57  ;;  %v2162_v31 = vsel %vm504_vm8, %v7381_v63, %v7380_v40  ;;  %v2163_v0 = vsel %vm504_vm8, %v7383_v26, %v7382_v5  ;;  %v3170_v35 = vsel %vm455_vm7, %v3168_v10, %v3169_v1  ;;  %v3171_v49 = vrot.slane %v3164_v60, 6  ;;  %v7386_v60 = vld [vmem:[#allocation18_spill] sm:$0xff]  ;;  %v7390_v63 = vld [vmem:[#allocation21_spill] sm:$0xff]  ;;  %v7394_v57 = vld [vmem:[#allocation24_spill] sm:$0xff] }
 0x29c   : > { %v2171_v4 = vadd.f32 %v2162_v31, %v2130_v22  ;;  %v2172_v14 = vadd.f32 %v7380_v40, %v2131_v62  ;;  %3145 = vrot.lane.b32.xlu0 %v3140_v12, %s4066_s6  ;;  %v3189_v28 = vstv %s6295_s30  ;;  %v3240_v3 = vstv %s6297_s8  ;;  %v6349_v2 = vpop.permute.xlu1 %2640  ;;  %v7387_v22 = vld [vmem:[#allocation19_spill] sm:$0xff]  ;;  %v7389_v40 = vld [vmem:[#allocation20_spill] sm:$0xff]  ;;  %v7392_v26 = vld [vmem:[#allocation22_spill] sm:$0xff]  ;;  %s3823_s30 = sshll.u32 %s4048_s12, 8  ;;  %s3593_s12 = scalar_lea.sflag [#allocation5], %s4226_s7 }
 0x29d   : > { %v2134_v24 = vadd.f32 %v2121_v43, %v2098_v13  ;;  %v2135_v9 = vadd.f32 %v2123_v53, %v2099_v55  ;;  %v2173_v44 = vadd.f32 %v2163_v0, %v2132_v15  ;;  %7384 = vst [vmem:[#allocation79_spill] sm:$0xff] %v6349_v2  ;;  %v3213_v21 = vmul.f32 %v6351_v39, %v3212_v20  ;;  %v7393_v0 = vld [vmem:[#allocation23_spill] sm:$0xff] }
 0x29e   : > { %v2174_v61 = vadd.f32 %v7382_v5, %v2133_v11  ;;  %v2164_v18 = vsel %vm504_vm8, %v7387_v22, %v7386_v60  ;;  %v6358_v62 = vpop.permute.xlu0 %2642  ;;  %v3214_v12 = vmul.f32 %v6270_v52, %v3212_v20  ;;  %v6362_v43 = vmul.f32 %v6273_v19, %v3212_v20  ;;  %3147 = vrot.lane.b32.xlu1 %v3142_v29, %s4066_s6 }
 0x29f   : > { %7388 = vst [vmem:[#allocation81_spill] sm:$0xff] %v6358_v62  ;;  %v3172_v42 = vsel %vm455_vm7, %v3169_v1, %v3171_v49  ;;  %v3190_v15 = vmul.f32 %v6351_v39, %v3189_v28  ;;  %v3241_v41 = vmul.f32 %v6351_v39, %v3240_v3  ;;  %v3242_v53 = vmul.f32 %v6270_v52, %v3240_v3  ;;  %v7400_v62 = vld [vmem:[#allocation44_spill] sm:$0xff] }
 0x2a0   : > { %3149 = vrot.lane.b32.xlu0 %v3144_v59, %s4066_s6  ;;  %v3191_v13 = vmul.f32 %v6270_v52, %v3189_v28  ;;  %v6372_v55 = vmul.f32 %v6273_v19, %v3189_v28  ;;  %v6375_v11 = vmul.f32 %v6273_v19, %v3240_v3  ;;  %v3268_v29 = vstv %s6322_s26  ;;  %v6384_v5 = vpop.permute.xlu1 %2644 }
 0x2a1   : > { %v2175_v1 = vadd.f32 %v2164_v18, %v2134_v24  ;;  %v2176_v20 = vadd.f32 %v7386_v60, %v2135_v9  ;;  %v2213_v31 = vsel %vm504_vm8, %v7390_v63, %v7389_v40  ;;  %7391 = vst [vmem:[#allocation80_spill] sm:$0xff] %v6384_v5  ;;  %v3219_v59 = vrot.slane %v3213_v21, 1 }
 0x2a2   : > { %v2214_v49 = vsel %vm504_vm8, %v7393_v0, %v7392_v26  ;;  %v6389_v28 = vpop.permute.xlu0 %2685  ;;  %v3220_v3 = vrot.slane %v3214_v12, 1  ;;  %v3292_v39 = vstv %s6335_s27  ;;  %3173 = vrot.lane.b32.xlu1 %v3168_v10, %s4066_s6  ;;  %v3247_v24 = vrot.slane %v3241_v41, 2  ;;  %v7395_v10 = vld [vmem:[#allocation25_spill] sm:$0xff]  ;;  %v7406_v12 = vld [vmem:[#allocation39_spill] sm:$0xff]  ;;  %s6789_s27 = scalar_lea.hbm %s6841_s2, %s3823_s30 }
 0x2a3   : > { %v3248_v9 = vrot.slane %v3242_v53, 2  ;;  %v6395_v60 = vmul.f32 %v6270_v52, %v3268_v29  ;;  %v6398_v18 = vmul.f32 %v6273_v19, %v3268_v29  ;;  %v2222_v21 = vadd.f32 %v2213_v31, %v2171_v4  ;;  %v7397_v29 = vld [vmem:[#allocation27_spill] sm:$0xff] }
 0x2a4   : > { %v2223_v63 = vadd.f32 %v7389_v40, %v2172_v14  ;;  %v2225_v0 = vadd.f32 %v7392_v26, %v2174_v61  ;;  %3175 = vrot.lane.b32.xlu0 %v3170_v35, %s4066_s6  ;;  %v2224_v22 = vadd.f32 %v2214_v49, %v2173_v44  ;;  %v2215_v41 = vsel %vm504_vm8, %v7395_v10, %v7394_v57  ;;  %v6407_v53 = vpop.permute.xlu1 %2687  ;;  %v7396_v14 = vld [vmem:[#allocation29_spill] sm:$0xff] }
 0x2a5   : > { %v6410_v2 = vmul.f32 %v6270_v52, %v3292_v39  ;;  %v3294_v4 = vmul.f32 %v6273_v19, %v3292_v39  ;;  %v2264_v61 = vsel %vm504_vm8, %v7397_v29, %v7396_v14  ;;  %v3221_v44 = vsel %vm278_vm2, %v3219_v59, %v3220_v3  ;;  %v7401_v59 = vld [vmem:[#allocation41_spill] sm:$0xff] }
 0x2a6   : > { %v6416_v35 = vpop.permute.xlu0 %2689  ;;  %v7399_v40 = vrot.slane %v6362_v43, 1  ;;  %v3295_v26 = vmul.f32 %v5780_v58, %v3292_v39  ;;  %v2227_v49 = vadd.f32 %v7394_v57, %v2176_v20  ;;  %3177 = vrot.lane.b32.xlu1 %v3172_v42, %s4066_s6  ;;  %v6426_v10 = vsel %vm315_vm3, %v3247_v24, %v3248_v9  ;;  %v7403_v20 = vld [vmem:[#allocation32_spill] sm:$0xff]  ;;  %s6496_s6 = sld [smem:[#allocation3 + $0x60]] }
 0x2a7   : > { %7398 = vst [vmem:[#allocation82_spill] sm:$0xff] %v6416_v35  ;;  %v2226_v35 = vadd.f32 %v2215_v41, %v2175_v1  ;;  %v2307_v5 = vsel %vm504_vm8, %v7401_v59, %v7400_v62  ;;  %v7402_v58 = vrot.slane %v6375_v11, 2  ;;  %v3320_v39 = vstv %s6378_s18  ;;  %s3970_s18 = scalar_lea.vmem %s6783_s22, 256 }
 0x2a8   : > { %v3223_v31 = vsel %vm278_vm2, %v3220_v3, %v7399_v40  ;;  %3196 = vrot.lane.b32.xlu0 %v3190_v15, %s4067_s5  ;;  %v2273_v42 = vadd.f32 %v2264_v61, %v2222_v21  ;;  %v7404_v3 = vld [vmem:[#allocation30_spill] sm:$0xff]  ;;  %v6443_v40 = vpop.permute.xlu1 %2691  ;;  %v3300_v41 = vrot.slane %v3294_v4, 4  ;;  %v2274_v59 = vadd.f32 %v7396_v14, %v2223_v63  ;;  %p3971_p8 = scmp.ne.s32.totalorder %s6783_s22, %s3970_s18 }
 0x2a9   : > { %v6437_v57 = vsel %vm315_vm3, %v3248_v9, %v7402_v58  ;;  %v2265_v24 = vsel %vm504_vm8, %v7404_v3, %v7403_v20  ;;  %7405 = vst [vmem:[#allocation83_spill] sm:$0xff] %v6443_v40  ;;  %v7407_v15 = vld [vmem:[#allocation34_spill] sm:$0xff]  ;;  %v7409_v9 = vld [vmem:[#allocation59_spill] sm:$0xff]  ;;  %v3302_v61 = vrot.slane %v3295_v26, 4  ;;  %v7411_v3 = vrot.slane %v6398_v18, 3  ;;  %v7413_v26 = vld [vmem:[#allocation64_spill] sm:$0xff] }
 0x2aa   : > { %v2266_v29 = vsel %vm504_vm8, %v7407_v15, %v7406_v12  ;;  %v2358_v58 = vsel %vm504_vm8, %v7409_v9, %v7408_v25  ;;  %v6453_v21 = vpop.permute.xlu0 %2693  ;;  %v2316_v45 = vadd.f32 %v2307_v5, %v2273_v42  ;;  %3198 = vrot.lane.b32.xlu1 %v3191_v13, %s4067_s5  ;;  %v7412_v4 = vrot.slane %v6395_v60, 3  ;;  %v7414_v13 = vld [vmem:[#allocation65_spill] sm:$0xff]  ;;  %p3972_p0 = pnand %p3971_p8, %p7454_p13 }
 0x2ab   : > { %7410 = vst [vmem:[#allocation84_spill] sm:$0xff] %v6453_v21  ;;  %v6464_v14 = vmul.f32 %v6270_v52, %v3320_v39  ;;  %v6467_v15 = vmul.f32 %v6273_v19, %v3320_v39  ;;  %v2275_v9 = vadd.f32 %v2265_v24, %v2224_v22  ;;  %v2276_v1 = vadd.f32 %v7403_v20, %v2225_v0  ;;  %v7416_v40 = vld [vmem:[#allocation49_spill] sm:$0xff]  ;;  %v7419_v20 = vld [vmem:[#allocation54_spill] sm:$0xff] }
 0x2ac   : > { %v6461_v63 = vsel %vm348_vm4, %v7412_v4, %v7411_v3  ;;  %v2278_v5 = vadd.f32 %v7406_v12, %v2227_v49  ;;  %v2409_v42 = vsel %vm504_vm8, %v7414_v13, %v7413_v26  ;;  %3200 = vrot.lane.b32.xlu0 %v6372_v55, %s4067_s5  ;;  %v2277_v3 = vadd.f32 %v2266_v29, %v2226_v35  ;;  %v7415_v4 = vld [vmem:[#allocation52_spill] sm:$0xff]  ;;  %v6479_v19 = vpop.permute.xlu1 %2695  ;;  %v7420_v55 = vld [vmem:[#allocation71_spill] sm:$0xff]  ;;  %p3973_p2 = pneg %p3972_p0 }
 0x2ad   : > { %v2308_v52 = vsel %vm504_vm8, %v7416_v40, %v7415_v4  ;;  %v2367_v21 = vadd.f32 %v2358_v58, %v2316_v45  ;;  %v7417_v22 = vrot.slane %v6410_v2, 4  ;;  %v2317_v12 = vadd.f32 %v7400_v62, %v2274_v59  ;;  %v7418_v49 = vld [vmem:[#allocation56_spill] sm:$0xff]  ;;  %v6501_v59 = vld [vmem:[#allocation2 + $0x78] sm:$0x7]  ;;  %v7424_v58 = vld [vmem:[#allocation62_spill] sm:$0xff] }
 0x2ae   : > { %v2309_v24 = vsel %vm504_vm8, %v7419_v20, %v7418_v49  ;;  %v2460_v35 = vsel %vm504_vm8, %v7420_v55, %v5992_v8  ;;  %v2737_v29 = vpop.permute.xlu0 %2736  ;;  %v6494_v45 = vsel %vm381_vm5, %v3300_v41, %v3302_v61  ;;  %3224 = vrot.lane.b32.xlu1 %v3221_v44, %s4067_s5  ;;  %7421 = vst [vmem:[#allocation85_spill] sm:$0xff] %v6501_v59  ;;  %v7422_v55 = vld [vmem:[#allocation60_spill] sm:$0xff]  ;;  %v7425_v62 = vld [vmem:[#allocation63_spill] sm:$0xff] }
 0x2af   : > { %v6484_v0 = vsel %vm381_vm5, %v7417_v22, %v3300_v41  ;;  %v2418_v40 = vadd.f32 %v2409_v42, %v2367_v21  ;;  %v6504_v13 = vmul.f32 %v6501_v59, %v3320_v39  ;;  %v2318_v22 = vadd.f32 %v2308_v52, %v2275_v9  ;;  %v7423_v41 = vld [vmem:[#allocation61_spill] sm:$0xff]  ;;  %v7427_v59 = vld [vmem:[#allocation67_spill] sm:$0xff] }
 0x2b0   : > { %v2319_v20 = vadd.f32 %v7415_v4, %v2276_v1  ;;  %v2359_v61 = vsel %vm504_vm8, %v7423_v41, %v7422_v55  ;;  %v2501_v44 = vsel %vm844_vm9, %v6042_v51, %v6058_v34  ;;  %3226 = vrot.lane.b32.xlu0 %v3223_v31, %s4067_s5  ;;  %v2320_v21 = vadd.f32 %v2309_v24, %v2277_v3  ;;  %v6518_v9 = vpop.permute.xlu1 %2738  ;;  %v7426_v41 = vld [vmem:[#allocation66_spill] sm:$0xff]  ;;  %v7428_v24 = vld [vmem:[#allocation68_spill] sm:$0xff] }
 0x2b1   : > { %v2321_v42 = vadd.f32 %v7418_v49, %v2278_v5  ;;  %v2360_v39 = vsel %vm504_vm8, %v7425_v62, %v7424_v58  ;;  %v2469_v52 = vadd.f32 %v2460_v35, %v2418_v40  ;;  %v2368_v1 = vadd.f32 %v7408_v25, %v2317_v12  ;;  %v7429_v35 = vld [vmem:[#allocation69_spill] sm:$0xff] }
 0x2b2   : > { %v2370_v4 = vadd.f32 %v7422_v55, %v2319_v20  ;;  %v2410_v51 = vsel %vm504_vm8, %v7427_v59, %v7426_v41  ;;  %v2552_v31 = vsel %vm844_vm9, %v6121_v50, %v6139_v23  ;;  %v6528_v5 = vpop.permute.xlu0 %2740  ;;  %v2369_v3 = vadd.f32 %v2359_v61, %v2318_v22 }
 0x2b3   : > { %v2372_v49 = vadd.f32 %v7424_v58, %v2321_v42  ;;  %v2411_v40 = vsel %vm504_vm8, %v7429_v35, %v7428_v24  ;;  %v2510_v25 = vadd.f32 %v2501_v44, %v2469_v52  ;;  %v7430_v12 = vrot.slane %v6362_v43, 1 }
 0x2b4   : > { %v2371_v62 = vadd.f32 %v2360_v39, %v2320_v21  ;;  %v2419_v59 = vadd.f32 %v7413_v26, %v2368_v1  ;;  %v2461_v50 = vsel %vm504_vm8, %v5997_v16, %v6012_v17  ;;  %v2603_v58 = vsel %vm844_vm9, %v6214_v48, %v6239_v56  ;;  %3252 = vrot.lane.b32.xlu0 %v6426_v10, %s4067_s5  ;;  %v6550_v26 = vpop.permute.xlu1 %2742 }
 0x2b5   : > { %3228 = vrot.lane.b32.xlu1 %v7430_v12, %s4067_s5  ;;  %v2420_v22 = vadd.f32 %v2410_v51, %v2369_v3  ;;  %v2421_v20 = vadd.f32 %v7426_v41, %v2370_v4  ;;  %v2462_v43 = vsel %vm504_vm8, %v6025_v32, %v6037_v36  ;;  %v2561_v55 = vadd.f32 %v2552_v31, %v2510_v25 }
 0x2b6   : > { %v2422_v61 = vadd.f32 %v2411_v40, %v2371_v62  ;;  %v2423_v16 = vadd.f32 %v7428_v24, %v2372_v49  ;;  %v2646_v48 = vsel %vm844_vm9, %v6304_v30, %v6328_v33  ;;  %v2745_v44 = vpop.permute.xlu0 %2744  ;;  %v6557_v21 = vstv %s6496_s6  ;;  %v7433_v24 = vld [vmem:[#allocation70_spill] sm:$0xff]  ;;  %v7435_v62 = vld [vmem:[#allocation75_spill] sm:$0xff]  ;;  %s4070_s6 = smov [#allocation8]  }
 0x2b7   : > { %v2470_v10 = vadd.f32 %v5992_v8, %v2419_v59  ;;  %v2471_v42 = vadd.f32 %v2461_v50, %v2420_v22  ;;  %v2472_v39 = vadd.f32 %v6012_v17, %v2421_v20  ;;  %v2612_v52 = vadd.f32 %v2603_v58, %v2561_v55  ;;  %v7436_v59 = vld [vmem:[#allocation72_spill] sm:$0xff] }
 0x2b8   : > { %v2473_v32 = vadd.f32 %v2462_v43, %v2422_v61  ;;  %v2474_v1 = vadd.f32 %v6037_v36, %v2423_v16  ;;  %v2503_v4 = vsel %vm844_vm9, %v6089_v46, %v6116_v27  ;;  %v2697_v30 = vsel %vm844_vm9, %v6389_v28, %v6407_v53  ;;  %v2747_v51 = vpop.permute.xlu1 %2746  ;;  %v7438_v43 = vld [vmem:[#allocation81_spill] sm:$0xff] }
 0x2b9   : > { %3254 = vrot.lane.b32.xlu1 %v6437_v57, %s4067_s5  ;;  %v7431_v8 = vrot.slane %v6375_v11, 2  ;;  %v2511_v17 = vadd.f32 %v6058_v34, %v2470_v10  ;;  %v2502_v57 = vsel %vm844_vm9, %v6066_v37, %v6084_v7  ;;  %v2513_v36 = vadd.f32 %v6084_v7, %v2472_v39  ;;  %v7432_v37 = vld [vmem:[#allocation73_spill] sm:$0xff] }
 0x2ba   : > { %v2655_v41 = vadd.f32 %v2646_v48, %v2612_v52  ;;  %v2515_v46 = vadd.f32 %v6116_v27, %v2474_v1  ;;  %v2554_v28 = vsel %vm844_vm9, %v6182_v6, %v6210_v54  ;;  %v2748_v11 = vsel %vm844_vm9, %v2737_v29, %v6518_v9  ;;  %v2788_v34 = vpop.permute.xlu0 %2787  ;;  %v7440_v48 = vld [vmem:[#allocation76_spill] sm:$0xff] }
 0x2bb   : > { %3256 = vrot.lane.b32.xlu0 %v7431_v8, %s4067_s5  ;;  %v2750_v31 = vsel %vm844_vm9, %v2745_v44, %v2747_v51  ;;  %v2514_v3 = vadd.f32 %v2503_v4, %v2473_v32  ;;  %v2562_v49 = vadd.f32 %v6139_v23, %v2511_v17  ;;  %v2553_v7 = vsel %vm844_vm9, %v7433_v24, %v7432_v37  ;;  %v7442_v32 = vld [vmem:[#allocation84_spill] sm:$0xff]  ;;  %v7444_v8 = vld [vmem:[#allocation83_spill] sm:$0xff]  ;;  %v7445_v17 = vld [vmem:[#allocation82_spill] sm:$0xff] }
 0x2bc   : > { %v2706_v35 = vadd.f32 %v2697_v30, %v2655_v41  ;;  %v7434_v27 = vrot.slane %v6395_v60, 3  ;;  %v2512_v40 = vadd.f32 %v2502_v57, %v2471_v42  ;;  %v2564_v6 = vadd.f32 %v7432_v37, %v2513_v36  ;;  %v2790_v58 = vpop.permute.xlu1 %2789 }
 0x2bd   : > { %v2566_v29 = vadd.f32 %v6210_v54, %v2515_v46  ;;  %v2605_v25 = vsel %vm844_vm9, %v6268_v47, %v6300_v38  ;;  %v2565_v23 = vadd.f32 %v2554_v28, %v2514_v3  ;;  %v2613_v12 = vadd.f32 %v6239_v56, %v2562_v49  ;;  %v7437_v54 = vld [vmem:[#allocation80_spill] sm:$0xff]  ;;  %v7439_v56 = vld [vmem:[#allocation79_spill] sm:$0xff] }
 0x2be   : > { %3276 = vrot.lane.b32.xlu1 %v7434_v27, %s4067_s5  ;;  %v2604_v60 = vsel %vm844_vm9, %v7436_v59, %v7435_v62  ;;  %v2757_v50 = vadd.f32 %v2748_v11, %v2706_v35  ;;  %v2563_v22 = vadd.f32 %v2553_v7, %v2512_v40  ;;  %v2648_v55 = vsel %vm844_vm9, %v7438_v43, %v7437_v54  ;;  %v2792_v61 = vpop.permute.xlu0 %2791  ;;  %v7447_v7 = vld [vmem:[#allocation77_spill] sm:$0xff] }
 0x2bf   : > { %3278 = vrot.lane.b32.xlu0 %v6461_v63, %s4067_s5  ;;  %v2617_v20 = vadd.f32 %v6300_v38, %v2566_v29  ;;  %v2799_v47 = vsel %vm844_vm9, %v2788_v34, %v2790_v58  ;;  %v2616_v63 = vadd.f32 %v2605_v25, %v2565_v23  ;;  %v2656_v16 = vadd.f32 %v6328_v33, %v2613_v12  ;;  %v7450_v29 = vld [vmem:[#allocation85_spill] sm:$0xff] }
 0x2c0   : > { %v2647_v44 = vsel %vm844_vm9, %v7440_v48, %v7439_v56  ;;  %v2808_v10 = vadd.f32 %v2799_v47, %v2757_v50  ;;  %v7441_v42 = vrot.slane %v6398_v18, 3  ;;  %v2614_v38 = vadd.f32 %v2604_v60, %v2563_v22  ;;  %v2794_v57 = vpop.permute.xlu1 %2793 }
 0x2c1   : > { %v2615_v39 = vadd.f32 %v7435_v62, %v2564_v6  ;;  %v2660_v52 = vadd.f32 %v7437_v54, %v2617_v20  ;;  %v2699_v1 = vsel %vm844_vm9, %v7442_v32, %v6479_v19  ;;  %v7443_v33 = vrot.slane %v6410_v2, 4 }
 0x2c2   : > { %3280 = vrot.lane.b32.xlu1 %v7441_v42, %s4067_s5  ;;  %v2659_v4 = vadd.f32 %v2648_v55, %v2616_v63  ;;  %v2707_v30 = vadd.f32 %v6407_v53, %v2656_v16  ;;  %v2698_v18 = vsel %vm844_vm9, %v7445_v17, %v7444_v8  ;;  %v3330_v36 = vrot.slane %v6504_v13, 5  ;;  %v2796_v34 = vpop.permute.xlu0 %2795  ;;  %v7446_v13 = vld [vmem:[#allocation74_spill] sm:$0xff] }
 0x2c3   : > { %3304 = vrot.lane.b32.xlu0 %v7443_v33, %s4067_s5  ;;  %v2657_v41 = vadd.f32 %v2647_v44, %v2614_v38  ;;  %v2658_v46 = vadd.f32 %v7439_v56, %v2615_v39  ;;  %v2711_v28 = vadd.f32 %v6479_v19, %v2660_v52  ;;  %v2800_v11 = vsel %vm844_vm9, %v2792_v61, %v2794_v57  ;;  %v7453_v42 = vld [vmem:[#allocation78_spill] sm:$0xff] }
 0x2c4   : > { %v2710_v2 = vadd.f32 %v2699_v1, %v2659_v4  ;;  %v2758_v53 = vadd.f32 %v6518_v9, %v2707_v30  ;;  %v2749_v3 = vsel %vm844_vm9, %v6528_v5, %v6550_v26  ;;  %v3349_v49 = vmul.f32 %v7446_v13, %v6557_v21  ;;  %v2798_v27 = vpop.permute.xlu1 %2797 }
 0x2c5   : > { %v2708_v37 = vadd.f32 %v2698_v18, %v2657_v41  ;;  %v2709_v19 = vadd.f32 %v7444_v8, %v2658_v46  ;;  %v2762_v24 = vadd.f32 %v2747_v51, %v2711_v28  ;;  %v3350_v9 = vmul.f32 %v7447_v7, %v6557_v21 }
 0x2c6   : > { %3306 = vrot.lane.b32.xlu1 %v6484_v0, %s4067_s5  ;;  %v2761_v35 = vadd.f32 %v2750_v31, %v2710_v2  ;;  %v2809_v5 = vadd.f32 %v2790_v58, %v2758_v53  ;;  %v7448_v0 = vrot.slane %v6467_v15, 5  ;;  %v7449_v40 = vrot.slane %v6464_v14, 5  ;;  %v2823_v62 = vpop.permute.xlu0 %2822 }
 0x2c7   : > { %3308 = vrot.lane.b32.xlu0 %v6494_v45, %s4067_s5  ;;  %v3351_v51 = vmul.f32 %v7450_v29, %v6557_v21  ;;  %v2759_v25 = vadd.f32 %v2749_v3, %v2708_v37  ;;  %v2760_v45 = vadd.f32 %v6550_v26, %v2709_v19  ;;  %v2801_v23 = vsel %vm844_vm9, %v2796_v34, %v2798_v27 }
 0x2c8   : > { %v3329_v6 = vsel %vm418_vm6, %v7449_v40, %v7448_v0  ;;  %v2813_v12 = vadd.f32 %v2798_v27, %v2762_v24  ;;  %v2812_v59 = vadd.f32 %v2801_v23, %v2761_v35  ;;  %v2831_v31 = vadd.f32 %v2823_v62, %v2808_v10  ;;  %v2825_v43 = vpop.permute.xlu1 %2824 }
 0x2c9   : > { %v2832_v60 = vadd.f32 %v2823_v62, %v2809_v5  ;;  %v7451_v50 = vmov %v7449_v40  ;;  %v7452_v58 = vmov %v7448_v0  ;;  %v2810_v21 = vadd.f32 %v2800_v11, %v2759_v25 }
 0x2ca   : > { %3332 = vrot.lane.b32.xlu1 %v7451_v50, %s4067_s5  ;;  %v3331_v22 = vsel %vm418_vm6, %v7452_v58, %v3330_v36  ;;  %v2811_v20 = vadd.f32 %v2794_v57, %v2760_v45  ;;  %v3355_v26 = vrot.slane %v3349_v49, 6  ;;  %v3356_v54 = vrot.slane %v3350_v9, 6  ;;  %v2827_v63 = vpop.permute.xlu0 %2826 }
 0x2cb   : > { %3334 = vrot.lane.b32.xlu0 %v3329_v6, %s4067_s5  ;;  %v3358_v55 = vrot.slane %v3351_v51, 6  ;;  %v2833_v47 = vadd.f32 %v2825_v43, %v2810_v21  ;;  %v3399_v16 = vstv %s6631_s19  ;;  %v2835_v14 = vadd.f32 %v2827_v63, %v2812_v59  ;;  %s3974_s19 = sshll.u32 %s4070_s6, 4  ;;  %s3975_s19 = int_to_ptr.vmem [resolvable:$false] %s3974_s19 }
 0x2cc   : > { %v2834_v61 = vadd.f32 %v2825_v43, %v2811_v20  ;;  %v2836_v56 = vadd.f32 %v2827_v63, %v2813_v12  ;;  %v3357_v15 = vsel %vm455_vm7, %v3355_v26, %v3356_v54  ;;  %v3376_v48 = vstv %s6646_s24  ;;  %v2851_v44 = vpop.permute.xlu1 %2850  ;;  %s3976_s24 = scalar_lea.vmem %s3975_s19, 512  ;;  %p3977_p6 = scmp.lt.s32.totalorder %s6783_s22, %s3975_s19 }
 0x2cd   : > { %v3359_v10 = vsel %vm455_vm7, %v3356_v54, %v3358_v55  ;;  %v3400_v38 = vmul.f32 %v7453_v42, %v3399_v16  ;;  %v3401_v39 = vmul.f32 %v7446_v13, %v3399_v16  ;;  %v2859_v52 = vadd.f32 %v2851_v44, %v2831_v31  ;;  %p3978_p1 = scmp.lt.s32.totalorder %s3976_s24, %s3970_s18 }
 0x2ce   : > { %3336 = vrot.lane.b32.xlu1 %v3331_v22, %s4067_s5  ;;  %v2860_v32 = vadd.f32 %v2851_v44, %v2832_v60  ;;  %v2853_v1 = vpop.permute.xlu0 %2852  ;;  %v3377_v30 = vmul.f32 %v7453_v42, %v3376_v48  ;;  %v3378_v8 = vmul.f32 %v7446_v13, %v3376_v48  ;;  %v3402_v17 = vmul.f32 %v7447_v7, %v3399_v16 }
 0x2cf   : > { %3360 = vrot.lane.b32.xlu0 %v3355_v26, %s4067_s5  ;;  %v2861_v33 = vadd.f32 %v2853_v1, %v2833_v47  ;;  %v2862_v4 = vadd.f32 %v2853_v1, %v2834_v61  ;;  %v3406_v57 = vrot.slane %v3400_v38, 1  ;;  %v3407_v36 = vrot.slane %v3401_v39, 1  ;;  %p3979_p7 = por %p3978_p1, %p3977_p6 }
 0x2d0   : > { %v2855_v18 = vpop.permute.xlu1 %2854  ;;  %v3427_v41 = vstv %s3812_s3  ;;  %v3379_v53 = vmul.f32 %v7447_v7, %v3376_v48  ;;  %v3409_v3 = vrot.slane %v3402_v17, 1  ;;  %v3455_v12 = vstv %s6677_s16 }
 0x2d1   : > { %v2863_v46 = vadd.f32 %v2855_v18, %v2835_v14  ;;  %v2864_v28 = vadd.f32 %v2855_v18, %v2836_v56  ;;  %v3428_v49 = vmul.f32 %v7453_v42, %v3427_v41  ;;  %v3429_v37 = vmul.f32 %v7446_v13, %v3427_v41  ;;  %p3980_p12 = pnand %p3979_p7, %p3973_p2 }
 0x2d2   : > { %3362 = vrot.lane.b32.xlu1 %v3357_v15, %s4067_s5  ;;  %v2879_v11 = vpop.permute.xlu0 %2878  ;;  %v3408_v24 = vsel %vm278_vm2, %v3406_v57, %v3407_v36  ;;  %v3430_v9 = vmul.f32 %v7447_v7, %v3427_v41  ;;  %v3410_v6 = vsel %vm278_vm2, %v3407_v36, %v3409_v3  ;;  %v3456_v22 = vmul.f32 %v7446_v13, %v3455_v12 }
 0x2d3   : > { %3364 = vrot.lane.b32.xlu0 %v3359_v10, %s4067_s5  ;;  %v2887_v34 = vadd.f32 %v2879_v11, %v2859_v52  ;;  %v2888_v2 = vadd.f32 %v2879_v11, %v2860_v32  ;;  %s3814_s5 = sld [smem:[#allocation3 + $0x53]]  ;;  %v3434_v51 = vrot.slane %v3428_v49, 2  ;;  %v3435_v25 = vrot.slane %v3429_v37, 2 }
 0x2d4   : > { %v2881_v19 = vpop.permute.xlu1 %2880  ;;  %v3437_v23 = vrot.slane %v3430_v9, 2  ;;  %v3457_v21 = vmul.f32 %v7447_v7, %v3455_v12  ;;  %v3460_v16 = vrot.slane %v3456_v22, 3  ;;  %v3535_v37 = vstv %s3816_s29 }
 0x2d5   : > { %v2889_v35 = vadd.f32 %v2881_v19, %v2861_v33  ;;  %v2890_v5 = vadd.f32 %v2881_v19, %v2862_v4  ;;  %v3436_v58 = vsel %vm315_vm3, %v3434_v51, %v3435_v25 }
 0x2d6   : > { %3383 = vrot.lane.b32.xlu1 %v3377_v30, %s4068_s15  ;;  %v2883_v27 = vpop.permute.xlu0 %2882  ;;  %v3438_v26 = vsel %vm315_vm3, %v3435_v25, %v3437_v23  ;;  %v3461_v14 = vrot.slane %v3457_v21, 3  ;;  %v3507_v30 = vstv %s3815_s17 }
 0x2d7   : > { %3385 = vrot.lane.b32.xlu0 %v3378_v8, %s4068_s15  ;;  %v2891_v0 = vadd.f32 %v2883_v27, %v2863_v46  ;;  %v2892_v40 = vadd.f32 %v2883_v27, %v2864_v28  ;;  %v3508_v46 = vmul.f32 %v7446_v13, %v3507_v30  ;;  %v3509_v28 = vmul.f32 %v7447_v7, %v3507_v30 }
 0x2d8   : > { %v2903_v45 = vpop.permute.xlu1 %2902  ;;  %v3462_v52 = vsel %vm348_vm4, %v3460_v16, %v3461_v14 }
 0x2d9   : > { %v2911_v62 = vadd.f32 %v2903_v45, %v2887_v34  ;;  %v2912_v59 = vadd.f32 %v2903_v45, %v2888_v2  ;;  %v3479_v47 = vstv %s3814_s5  ;;  %v3510_v2 = vmul.f32 %v7450_v29, %v3507_v30 }
 0x2da   : > { %3387 = vrot.lane.b32.xlu1 %v3379_v53, %s4068_s15  ;;  %v2905_v31 = vpop.permute.xlu0 %2904  ;;  %v3480_v15 = vmul.f32 %v7446_v13, %v3479_v47  ;;  %v3481_v48 = vmul.f32 %v7447_v7, %v3479_v47  ;;  %v3482_v32 = vmul.f32 %v7450_v29, %v3479_v47 }
 0x2db   : > { %3411 = vrot.lane.b32.xlu0 %v3408_v24, %s4068_s15  ;;  %v2913_v60 = vadd.f32 %v2905_v31, %v2889_v35  ;;  %v2914_v50 = vadd.f32 %v2905_v31, %v2890_v5  ;;  %v3514_v35 = vrot.slane %v3508_v46, 5  ;;  %v3515_v5 = vrot.slane %v3509_v28, 5 }
 0x2dc   : > { %v2907_v20 = vpop.permute.xlu1 %2906  ;;  %v3486_v33 = vrot.slane %v3480_v15, 4  ;;  %v3487_v4 = vrot.slane %v3481_v48, 4  ;;  %v3489_v41 = vrot.slane %v3482_v32, 4 }
 0x2dd   : > { %v2915_v54 = vadd.f32 %v2907_v20, %v2891_v0  ;;  %v2916_v43 = vadd.f32 %v2907_v20, %v2892_v40  ;;  %v3517_v0 = vrot.slane %v3510_v2, 5  ;;  %v3536_v40 = vmul.f32 %v7446_v13, %v3535_v37 }
 0x2de   : > { %3413 = vrot.lane.b32.xlu1 %v3410_v6, %s4068_s15  ;;  %v2931_v55 = vpop.permute.xlu0 %2930  ;;  %v3488_v34 = vsel %vm381_vm5, %v3486_v33, %v3487_v4  ;;  %v3490_v9 = vsel %vm381_vm5, %v3487_v4, %v3489_v41  ;;  %v3537_v6 = vmul.f32 %v7447_v7, %v3535_v37 }
 0x2df   : > { %3415 = vrot.lane.b32.xlu0 %v3409_v3, %s4068_s15  ;;  %v2939_v61 = vadd.f32 %v2931_v55, %v2911_v62  ;;  %v2940_v63 = vadd.f32 %v2931_v55, %v2912_v59  ;;  %v3516_v62 = vsel %vm418_vm6, %v3514_v35, %v3515_v5  ;;  %v3538_v59 = vmul.f32 %v7450_v29, %v3535_v37 }
 0x2e0   : > { %v2933_v56 = vpop.permute.xlu1 %2932  ;;  %v3543_v13 = vrot.slane %v3537_v6, 6 }
 0x2e1   : > { %v2941_v44 = vadd.f32 %v2933_v56, %v2913_v60  ;;  %v2942_v10 = vadd.f32 %v2933_v56, %v2914_v50  ;;  %v3518_v60 = vsel %vm418_vm6, %v3515_v5, %v3517_v0  ;;  %v3542_v50 = vrot.slane %v3536_v40, 6 }
 0x2e2   : > { %3439 = vrot.lane.b32.xlu1 %v3436_v58, %s4068_s15  ;;  %v2935_v42 = vpop.permute.xlu0 %2934 }
 0x2e3   : > { %3441 = vrot.lane.b32.xlu0 %v3438_v26, %s4068_s15  ;;  %v2943_v38 = vadd.f32 %v2935_v42, %v2915_v54  ;;  %v2944_v39 = vadd.f32 %v2935_v42, %v2916_v43  ;;  %v3545_v26 = vrot.slane %v3538_v59, 6  ;;  %v3544_v43 = vsel %vm455_vm7, %v3542_v50, %v3543_v13 }
 0x2e4   : > { %v2959_v1 = vpop.permute.xlu1 %2958 }
 0x2e5   : > { %v2967_v8 = vadd.f32 %v2959_v1, %v2939_v61  ;;  %v2968_v17 = vadd.f32 %v2959_v1, %v2940_v63 }
 0x2e6   : > { %3443 = vrot.lane.b32.xlu1 %v3437_v23, %s4068_s15  ;;  %v2961_v18 = vpop.permute.xlu0 %2960 }
 0x2e7   : > { %3463 = vrot.lane.b32.xlu0 %v3460_v16, %s4068_s15  ;;  %v2969_v57 = vadd.f32 %v2961_v18, %v2941_v44  ;;  %v2970_v36 = vadd.f32 %v2961_v18, %v2942_v10  ;;  %v3546_v16 = vsel %vm455_vm7, %v3543_v13, %v3545_v26 }
 0x2e8   : > { %v2963_v11 = vpop.permute.xlu1 %2962 }
 0x2e9   : > { %v2971_v53 = vadd.f32 %v2963_v11, %v2943_v38  ;;  %v2972_v3 = vadd.f32 %v2963_v11, %v2944_v39 }
 0x2ea   : > { %3465 = vrot.lane.b32.xlu1 %v3462_v52, %s4068_s15  ;;  %v2987_v49 = vpop.permute.xlu0 %2986 }
 0x2eb   : > { %3467 = vrot.lane.b32.xlu0 %v3461_v14, %s4068_s15  ;;  %v2995_v19 = vadd.f32 %v2987_v49, %v2967_v8  ;;  %v2996_v24 = vadd.f32 %v2987_v49, %v2968_v17 }
 0x2ec   : > { %v2989_v27 = vpop.permute.xlu1 %2988 }
 0x2ed   : > { %v2997_v51 = vadd.f32 %v2989_v27, %v2969_v57  ;;  %v2998_v25 = vadd.f32 %v2989_v27, %v2970_v36 }
 0x2ee   : > { %3491 = vrot.lane.b32.xlu1 %v3486_v33, %s4068_s15  ;;  %v2991_v45 = vpop.permute.xlu0 %2990 }
 0x2ef   : > { %3493 = vrot.lane.b32.xlu0 %v3488_v34, %s4068_s15  ;;  %v2999_v23 = vadd.f32 %v2991_v45, %v2971_v53  ;;  %v3000_v12 = vadd.f32 %v2991_v45, %v2972_v3 }
 0x2f0   : > { %v3010_v31 = vpop.permute.xlu1 %3009 }
 0x2f1   : > { %v3018_v58 = vadd.f32 %v3010_v31, %v2995_v19  ;;  %v3019_v7 = vadd.f32 %v3010_v31, %v2996_v24 }
 0x2f2   : > { %3495 = vrot.lane.b32.xlu1 %v3490_v9, %s4068_s15  ;;  %v3012_v22 = vpop.permute.xlu0 %3011 }
 0x2f3   : > { %3519 = vrot.lane.b32.xlu0 %v3514_v35, %s4068_s15  ;;  %v3020_v21 = vadd.f32 %v3012_v22, %v2997_v51  ;;  %v3021_v20 = vadd.f32 %v3012_v22, %v2998_v25 }
 0x2f4   : > { %v3014_v54 = vpop.permute.xlu1 %3013 }
 0x2f5   : > { %v3022_v55 = vadd.f32 %v3014_v54, %v2999_v23  ;;  %v3023_v29 = vadd.f32 %v3014_v54, %v3000_v12 }
 0x2f6   : > { %3521 = vrot.lane.b32.xlu1 %v3516_v62, %s4068_s15  ;;  %v3038_v47 = vpop.permute.xlu0 %3037 }
 0x2f7   : > { %3523 = vrot.lane.b32.xlu0 %v3518_v60, %s4068_s15  ;;  %v3046_v61 = vadd.f32 %v3038_v47, %v3018_v58  ;;  %v3047_v63 = vadd.f32 %v3038_v47, %v3019_v7 }
 0x2f8   : > { %v3040_v14 = vpop.permute.xlu1 %3039 }
 0x2f9   : > { %v3048_v56 = vadd.f32 %v3040_v14, %v3020_v21  ;;  %v3049_v15 = vadd.f32 %v3040_v14, %v3021_v20 }
 0x2fa   : > { %3547 = vrot.lane.b32.xlu1 %v3542_v50, %s4068_s15  ;;  %v3042_v48 = vpop.permute.xlu0 %3041 }
 0x2fb   : > { %3549 = vrot.lane.b32.xlu0 %v3544_v43, %s4068_s15  ;;  %v3050_v44 = vadd.f32 %v3042_v48, %v3022_v55  ;;  %v3051_v10 = vadd.f32 %v3042_v48, %v3023_v29 }
 0x2fc   : > { %v3066_v42 = vpop.permute.xlu1 %3065 }
 0x2fd   : > { %v3074_v38 = vadd.f32 %v3066_v42, %v3046_v61  ;;  %v3075_v39 = vadd.f32 %v3066_v42, %v3047_v63 }
 0x2fe   : > { %3551 = vrot.lane.b32.xlu1 %v3546_v16, %s4068_s15  ;;  %v3068_v52 = vpop.permute.xlu0 %3067  ;;  %s4069_s15 = smov 3  }
 0x2ff   : > { %v3076_v32 = vadd.f32 %v3068_v52, %v3048_v56  ;;  %v3077_v1 = vadd.f32 %v3068_v52, %v3049_v15 }
 0x300   : > { %v3070_v33 = vpop.permute.xlu1 %3069 }
 0x301   : > { %v3078_v4 = vadd.f32 %v3070_v33, %v3050_v44  ;;  %v3079_v30 = vadd.f32 %v3070_v33, %v3051_v10 }
 0x302   : > { %v3090_v8 = vpop.permute.xlu0 %3089 }
 0x303   : > { %v3098_v17 = vadd.f32 %v3090_v8, %v3074_v38  ;;  %v3099_v18 = vadd.f32 %v3090_v8, %v3075_v39 }
 0x304   : > { %v3092_v57 = vpop.permute.xlu1 %3091 }
 0x305   : > { %v3100_v36 = vadd.f32 %v3092_v57, %v3076_v32  ;;  %v3101_v41 = vadd.f32 %v3092_v57, %v3077_v1 }
 0x306   : > { %v3094_v46 = vpop.permute.xlu0 %3093 }
 0x307   : > { %v3102_v28 = vadd.f32 %v3094_v46, %v3078_v4  ;;  %v3103_v11 = vadd.f32 %v3094_v46, %v3079_v30 }
 0x308   : > { %v3118_v34 = vpop.permute.xlu1 %3117 }
 0x309   : > { %v3126_v2 = vadd.f32 %v3118_v34, %v3098_v17  ;;  %v3127_v53 = vadd.f32 %v3118_v34, %v3099_v18 }
 0x30a   : > { %v3120_v3 = vpop.permute.xlu0 %3119 }
 0x30b   : > { %v3128_v49 = vadd.f32 %v3120_v3, %v3100_v36  ;;  %v3129_v37 = vadd.f32 %v3120_v3, %v3101_v41 }
 0x30c   : > { %v3122_v19 = vpop.permute.xlu1 %3121 }
 0x30d   : > { %v3130_v24 = vadd.f32 %v3122_v19, %v3102_v28  ;;  %v3131_v9 = vadd.f32 %v3122_v19, %v3103_v11 }
 0x30e   : > { %v3146_v35 = vpop.permute.xlu0 %3145 }
 0x30f   : > { %v3154_v14 = vadd.f32 %v3146_v35, %v3126_v2  ;;  %v3155_v56 = vadd.f32 %v3146_v35, %v3127_v53 }
 0x310   : > { %v3148_v5 = vpop.permute.xlu1 %3147 }
 0x311   : > { %v3156_v42 = vadd.f32 %v3148_v5, %v3128_v49  ;;  %v3157_v38 = vadd.f32 %v3148_v5, %v3129_v37 }
 0x312   : > { %v3150_v27 = vpop.permute.xlu0 %3149 }
 0x313   : > { %v3158_v17 = vadd.f32 %v3150_v27, %v3130_v24  ;;  %v3159_v18 = vadd.f32 %v3150_v27, %v3131_v9 }
 0x314   : > { %v3174_v0 = vpop.permute.xlu1 %3173 }
 0x315   : > { %v3182_v48 = vadd.f32 %v3174_v0, %v3154_v14  ;;  %v3183_v44 = vadd.f32 %v3174_v0, %v3155_v56 }
 0x316   : > { %v3176_v40 = vpop.permute.xlu0 %3175 }
 0x317   : > { %v3184_v1 = vadd.f32 %v3176_v40, %v3156_v42  ;;  %v3185_v33 = vadd.f32 %v3176_v40, %v3157_v38 }
 0x318   : > { %v3178_v6 = vpop.permute.xlu1 %3177 }
 0x319   : > { %v3186_v28 = vadd.f32 %v3178_v6, %v3158_v17  ;;  %v3187_v11 = vadd.f32 %v3178_v6, %v3159_v18 }
 0x31a   : > { %v3197_v51 = vpop.permute.xlu0 %3196 }
 0x31b   : > { %v3205_v39 = vadd.f32 %v3197_v51, %v3182_v48  ;;  %v3206_v52 = vadd.f32 %v3197_v51, %v3183_v44 }
 0x31c   : > { %v3199_v25 = vpop.permute.xlu1 %3198 }
 0x31d   : > { %v3207_v57 = vadd.f32 %v3199_v25, %v3184_v1  ;;  %v3208_v36 = vadd.f32 %v3199_v25, %v3185_v33 }
 0x31e   : > { %v3201_v45 = vpop.permute.xlu0 %3200 }
 0x31f   : > { %v3209_v19 = vadd.f32 %v3201_v45, %v3186_v28  ;;  %v3210_v35 = vadd.f32 %v3201_v45, %v3187_v11 }
 0x320   : > { %v3225_v23 = vpop.permute.xlu1 %3224 }
 0x321   : > { %v3233_v4 = vadd.f32 %v3225_v23, %v3205_v39  ;;  %v3234_v30 = vadd.f32 %v3225_v23, %v3206_v52 }
 0x322   : > { %v3227_v12 = vpop.permute.xlu0 %3226 }
 0x323   : > { %v3235_v2 = vadd.f32 %v3227_v12, %v3207_v57  ;;  %v3236_v53 = vadd.f32 %v3227_v12, %v3208_v36 }
 0x326   : > { %v3253_v59 = vpop.permute.xlu0 %3252 }
 0x327   : > { %v3229_v62 = vpop.permute.xlu1 %3228  ;;  %v3261_v41 = vadd.f32 %v3253_v59, %v3233_v4  ;;  %v3262_v46 = vadd.f32 %v3253_v59, %v3234_v30 }
 0x328   : > { %v3237_v9 = vadd.f32 %v3229_v62, %v3209_v19  ;;  %v3238_v27 = vadd.f32 %v3229_v62, %v3210_v35 }
 0x32b   : > { %v3255_v31 = vpop.permute.xlu1 %3254 }
 0x32c   : > { %v3263_v5 = vadd.f32 %v3255_v31, %v3235_v2  ;;  %v3264_v0 = vadd.f32 %v3255_v31, %v3236_v53 }
 0x32d   : > { %v3257_v60 = vpop.permute.xlu0 %3256 }
 0x32e   : > { %v3265_v56 = vadd.f32 %v3257_v60, %v3237_v9  ;;  %v3266_v48 = vadd.f32 %v3257_v60, %v3238_v27 }
 0x330   : > { %v3277_v50 = vpop.permute.xlu1 %3276 }
 0x331   : > { %v3279_v13 = vpop.permute.xlu0 %3278  ;;  %v3285_v3 = vadd.f32 %v3277_v50, %v3261_v41  ;;  %v3286_v49 = vadd.f32 %v3277_v50, %v3262_v46 }
 0x332   : > { %v3287_v25 = vadd.f32 %v3279_v13, %v3263_v5  ;;  %v3288_v23 = vadd.f32 %v3279_v13, %v3264_v0 }
 0x334   : > { %v6727_v58 = vpop.permute.xlu1 %3280 }
 0x335   : > { %v3305_v7 = vpop.permute.xlu0 %3304  ;;  %v3289_v45 = vadd.f32 %v6727_v58, %v3265_v56  ;;  %v3290_v31 = vadd.f32 %v6727_v58, %v3266_v48 }
 0x336   : > { %v3313_v40 = vadd.f32 %v3305_v7, %v3285_v3  ;;  %v3314_v24 = vadd.f32 %v3305_v7, %v3286_v49 }
 0x338   : > { %v3307_v22 = vpop.permute.xlu1 %3306 }
 0x339   : > { %v6729_v21 = vpop.permute.xlu0 %3308  ;;  %v3315_v12 = vadd.f32 %v3307_v22, %v3287_v25  ;;  %v3316_v44 = vadd.f32 %v3307_v22, %v3288_v23 }
 0x33a   : > { %v3318_v60 = vadd.f32 %v6729_v21, %v3290_v31 }
 0x33c   : > { %v3333_v20 = vpop.permute.xlu1 %3332 }
 0x33d   : > { %v6731_v26 = vpop.permute.xlu0 %3334  ;;  %v3341_v59 = vadd.f32 %v3333_v20, %v3313_v40  ;;  %v3342_v6 = vadd.f32 %v3333_v20, %v3314_v24  ;;  %v3317_v20 = vadd.f32 %v6729_v21, %v3289_v45 }
 0x33e   : > { %v3343_v7 = vadd.f32 %v6731_v26, %v3315_v12  ;;  %v3344_v62 = vadd.f32 %v6731_v26, %v3316_v44 }
 0x340   : > { %v6733_v54 = vpop.permute.xlu1 %3336 }
 0x341   : > { %v3361_v43 = vpop.permute.xlu0 %3360  ;;  %v3345_v33 = vadd.f32 %v6733_v54, %v3317_v20  ;;  %v3346_v4 = vadd.f32 %v6733_v54, %v3318_v60 }
 0x342   : > { %v3369_v50 = vadd.f32 %v3361_v43, %v3341_v59  ;;  %v3370_v42 = vadd.f32 %v3361_v43, %v3342_v6 }
 0x344   : > { %v6735_v55 = vpop.permute.xlu1 %3362 }
 0x345   : > { %v6737_v29 = vpop.permute.xlu0 %3364  ;;  %v3371_v22 = vadd.f32 %v6735_v55, %v3343_v7  ;;  %v3372_v43 = vadd.f32 %v6735_v55, %v3344_v62 }
 0x346   : > { %v3373_v57 = vadd.f32 %v6737_v29, %v3345_v33  ;;  %v3374_v55 = vadd.f32 %v6737_v29, %v3346_v4 }
 0x348   : > { %v3384_v47 = vpop.permute.xlu1 %3383 }
 0x349   : > { %v6739_v61 = vpop.permute.xlu0 %3385  ;;  %v3392_v39 = vadd.f32 %v3384_v47, %v3369_v50  ;;  %v3393_v13 = vadd.f32 %v3384_v47, %v3370_v42 }
 0x34a   : > { %v3394_v47 = vadd.f32 %v6739_v61, %v3371_v22  ;;  %v3395_v30 = vadd.f32 %v6739_v61, %v3372_v43 }
 0x34c   : > { %v6741_v63 = vpop.permute.xlu1 %3387 }
 0x34d   : > { %v6743_v16 = vpop.permute.xlu0 %3411  ;;  %v3396_v54 = vadd.f32 %v6741_v63, %v3373_v57  ;;  %v3397_v28 = vadd.f32 %v6741_v63, %v3374_v55 }
 0x34e   : > { %v3420_v1 = vadd.f32 %v6743_v16, %v3392_v39  ;;  %v3421_v58 = vadd.f32 %v6743_v16, %v3393_v13 }
 0x350   : > { %v6745_v15 = vpop.permute.xlu1 %3413 }
 0x351   : > { %v6747_v10 = vpop.permute.xlu0 %3415  ;;  %v3422_v36 = vadd.f32 %v6745_v15, %v3394_v47  ;;  %v3423_v16 = vadd.f32 %v6745_v15, %v3395_v30 }
 0x352   : > { %v3424_v29 = vadd.f32 %v6747_v10, %v3396_v54  ;;  %v3425_v49 = vadd.f32 %v6747_v10, %v3397_v28 }
 0x354   : > { %v3440_v32 = vpop.permute.xlu1 %3439 }
 0x355   : > { %v6749_v8 = vpop.permute.xlu0 %3441  ;;  %v3448_v17 = vadd.f32 %v3440_v32, %v3420_v1  ;;  %v3449_v18 = vadd.f32 %v3440_v32, %v3421_v58 }
 0x356   : > { %v3450_v61 = vadd.f32 %v6749_v8, %v3422_v36  ;;  %v3451_v32 = vadd.f32 %v6749_v8, %v3423_v16 }
 0x358   : > { %v6751_v34 = vpop.permute.xlu1 %3443 }
 0x359   : > { %v3464_v37 = vpop.permute.xlu0 %3463  ;;  %v3452_v5 = vadd.f32 %v6751_v34, %v3424_v29  ;;  %v3453_v63 = vadd.f32 %v6751_v34, %v3425_v49 }
 0x35a   : > { %v3472_v41 = vadd.f32 %v3464_v37, %v3448_v17  ;;  %v3473_v46 = vadd.f32 %v3464_v37, %v3449_v18 }
 0x35c   : > { %v3466_v51 = vpop.permute.xlu1 %3465 }
 0x35d   : > { %v3468_v14 = vpop.permute.xlu0 %3467  ;;  %v3474_v19 = vadd.f32 %v3466_v51, %v3450_v61  ;;  %v3475_v15 = vadd.f32 %v3466_v51, %v3451_v32 }
 0x35e   : > { %v3476_v27 = vadd.f32 %v3468_v14, %v3452_v5  ;;  %v3477_v23 = vadd.f32 %v3468_v14, %v3453_v63 }
 0x360   : > { %v3492_v38 = vpop.permute.xlu1 %3491 }
 0x361   : > { %v3494_v52 = vpop.permute.xlu0 %3493  ;;  %v3500_v2 = vadd.f32 %v3492_v38, %v3472_v41  ;;  %v3501_v53 = vadd.f32 %v3492_v38, %v3473_v46 }
 0x362   : > { %v3502_v40 = vadd.f32 %v3494_v52, %v3474_v19  ;;  %v3503_v24 = vadd.f32 %v3494_v52, %v3475_v15 }
 0x364   : > { %v3496_v26 = vpop.permute.xlu1 %3495 }
 0x365   : > { %v3520_v21 = vpop.permute.xlu0 %3519  ;;  %v3504_v10 = vadd.f32 %v3496_v26, %v3476_v27  ;;  %v3505_v51 = vadd.f32 %v3496_v26, %v3477_v23 }
 0x366   : > { %v3528_v35 = vadd.f32 %v3520_v21, %v3500_v2  ;;  %v3529_v37 = vadd.f32 %v3520_v21, %v3501_v53 }
 0x368   : > { %v3522_v11 = vpop.permute.xlu1 %3521 }
 0x369   : > { %v3524_v3 = vpop.permute.xlu0 %3523  ;;  %v3530_v59 = vadd.f32 %v3522_v11, %v3502_v40  ;;  %v3531_v6 = vadd.f32 %v3522_v11, %v3503_v24 }
 0x36a   : > { %v3532_v34 = vadd.f32 %v3524_v3, %v3504_v10  ;;  %v3533_v44 = vadd.f32 %v3524_v3, %v3505_v51 }
 0x36c   : > { %v3548_v0 = vpop.permute.xlu1 %3547 }
 0x36d   : > { %v3556_v9 = vadd.f32 %v3548_v0, %v3528_v35  ;;  %v3557_v8 = vadd.f32 %v3548_v0, %v3529_v37  ;;  %v3550_v25 = vpop.permute.xlu0 %3549 }
 0x36e   : > { %v3558_v56 = vadd.f32 %v3550_v25, %v3530_v59  ;;  %v3559_v48 = vadd.f32 %v3550_v25, %v3531_v6 }
 0x36f   : > { %3568 = vrot.lane.b32.xlu0 %v3556_v9, %s4069_s15  ;;  %3570 = vrot.lane.b32.xlu1 %v3557_v8, %s4069_s15 }
 0x370   : > { %v3552_v12 = vpop.permute.xlu1 %3551 }
 0x371   : > { %v3560_v50 = vadd.f32 %v3552_v12, %v3532_v34  ;;  %v3561_v42 = vadd.f32 %v3552_v12, %v3533_v44 }
 0x373   : > { %3572 = vrot.lane.b32.xlu0 %v3558_v56, %s4069_s15  ;;  %3574 = vrot.lane.b32.xlu1 %v3559_v48, %s4069_s15 }
 0x377   : > { %3576 = vrot.lane.b32.xlu0 %v3560_v50, %s4069_s15  ;;  %3578 = vrot.lane.b32.xlu1 %v3561_v42, %s4069_s15 }
 0x3e1   : > { %v3569_v14 = vpop.permute.xlu0 %3568  ;;  %v3571_v45 = vpop.permute.xlu1 %3570 }
 0x3e2   : > { %v3581_v31 = vsel %vm3580_vm10, %v3569_v14, %v3571_v45 }
 0x3e3   : > { %3588 = vst.msk [vmem:[%s190_s28 - $0x5] sm:$0xe0] %vm3587_vm11, %v3581_v31 }
 0x3e5   : > { %v3573_v38 = vpop.permute.xlu0 %3572  ;;  %v3575_v7 = vpop.permute.xlu1 %3574 }
 0x3e6   : > { %v3582_v62 = vsel %vm3580_vm10, %v3573_v38, %v3575_v7 }
 0x3e7   : > { %3589 = vst.msk [vmem:[%s190_s28 + $0x3] sm:$0xff] %vm237_vm1, %v3582_v62 }
 0x3e9   : > { %v3577_v39 = vpop.permute.xlu0 %3576  ;;  %v3579_v13 = vpop.permute.xlu1 %3578 }
 0x3ea   : > { %v3583_v52 = vsel %vm3580_vm10, %v3577_v39, %v3579_v13 }
 0x3eb   : > { %3591 = vst.msk [vmem:[%s190_s28 + $0xb] sm:$0x1f] %vm3590_vm12, %v3583_v52 }
 0x3ec   : > { %3983 = shalt.err (!%p3980_p12)
}
 0x3ed   : > { %s3984_s3 = scalar_lea.hbm %s6789_s27, 256  ;;  %s3988_s17 = scalar_lea.hbm %s6841_s2, 512 }
 0x3ee   : > { %p3985_p4 = scmp.ne.s32.totalorder %s6789_s27, %s3984_s3  ;;  %p3989_p5 = scmp.lt.u32.totalorder %s6789_s27, %s6841_s2 }
 0x3ef   : > { %p3990_p9 = scmp.lt.u32.totalorder %s3988_s17, %s3984_s3  ;;  %p3992_p8 = scmp.lt.u32.totalorder %s3984_s3, %s6789_s27 }
 0x3f0   : > { %p3986_p10 = pnand %p3985_p4, %p7454_p13 }
 0x3f1   : > { %p3991_p3 = por %p3990_p9, %p3989_p5 }
 0x3f2   : > { %p3987_p11 = pneg %p3986_p10 }
 0x3f3   : > { %p3993_p0 = por %p3992_p8, %p3991_p3 }
 0x3f5   : > { %p3994_p2 = pnand %p3993_p0, %p3987_p11 }
 0x3f7   : > { %3997 = shalt.err (!%p3994_p2)
}
 0x3f8   : > { %s4071_s23 = smov 128   ;;  %s4072_s28 = smov 8  }
 0x3f9   : > { %3830 = dma.vmem_to_hbm [thread:$0]  (%p7454_p13), %s6783_s22, 256, %s6789_s27, %s3593_s12, %s4071_s23, %s4071_s23, %s4072_s28  }
 0x3fa PF: > { %s3621_s30 = sand.u32 1, %s4036_s9   ;;  %p7455_p6 = scmp.ne.s32.totalorder %s6996_s21, 0 }
 0x3fb   : > { %p7456_p1 = scmp.ge.s32.totalorder %s4056_s14, 2  ;;  %s3622_s8 = scalar_lea.sflag [#allocation5], %s3621_s30 }
 0x3fd   : > { %p3841_p7 = pnand %p7456_p1, %p7455_p6 }
 0x3ff   : > { %4031 = dma.done.wait (!%p3841_p7), %s3622_s8, 256  }
 0x400   : > { %4033 = vsyncadd (!%p3841_p7), %s3622_s8, 4294967040  ;;  %s19_s14 = sadd.s32 1, %s4056_s14   ;;  %s7457_s9 = smov %s4040_s10 }
 0x401   : > { %p16_p12 = scmp.ge.s32.totalorder %s19_s14, 4   ;;  %s7458_s10 = smov %s4044_s11 }
 0x402   : > { %s7459_s11 = smov %s4189_s4  ;;  %s7460_s12 = smov %s4052_s13 }
 0x403   : > { %s7461_s13 = smov %s7463_s25  ;;  %18 = sbr.rel (!%p16_p12) target bundleno = 7 (0x7), region = 86 }
 0x40a   :  { %3627 = vsyncpa [#allocation4], 1 }
 0x40b   :  { %3629 = vsyncpa [#allocation4 + $0x1], 1 }
 0x40c   :  { %3630 = vsyncpa [#allocation5], 1 }
 0x40d   :  { %3632 = vsyncpa [#allocation5 + $0x1], 1 }
 0x40e   :  { %3633 = vsyncpa [#allocation6], 1 }
 0x40f   :  { %3635 = vsyncpa [#allocation6 + $0x1], 1 }

</bundles_post_ra>
